<compile_context>
chip_gen: v5e
topology: v5e:2x2
jax: 0.10.0
libtpu: 0.0.40
codegen_flags: <defaults>
</compile_context>

<pallas_src>
import math

import jax
import jax.numpy as jnp
from jax.experimental import pallas as pl
from jax.experimental.pallas import tpu as pltpu

EPS = 1e-6
NEG_INF = -1e9      # finite fill, same as PyTorch masked_fill(mask == 0, -1e9)
M_INIT = -1e30      # online-softmax running-max init (finite -> no inf-inf NaN)
MXU_DTYPE = jnp.bfloat16   # bf16-native MXU on v5e/v6e/v7x; f32 accumulation kept

# Single-buffer grid-invariant weight blocks.  Flipped to False at runtime if
# this jax build rejects pipeline_mode=pl.Buffered(1).
_WEIGHT_SINGLE_BUFFER = [True]


def _detect_vmem_limit():
    cap = None
    try:
        cap = getattr(pltpu.get_tpu_info(), "vmem_capacity_bytes", None)
    except Exception:
        cap = None
    if not cap:
        cap = 64 * 1024 * 1024          # conservative: v7x per-TC VMEM
    return int(cap) * 3 // 4            # ~48 MiB on v7x, ~96 MiB on v5e/v6e


_VMEM_LIMIT_BYTES = _detect_vmem_limit()


def _compiler_params(dimension_semantics):
    return pltpu.CompilerParams(
        dimension_semantics=tuple(dimension_semantics),
        vmem_limit_bytes=_VMEM_LIMIT_BYTES,
    )


def _invariant_spec(shape):
    """BlockSpec for a grid-invariant (weight/bias) operand.

    Single-buffered when supported: the block index never changes, so double
    buffering only wastes VMEM.
    """
    nd = len(shape)

    def idx(*_):
        return (0,) * nd

    if _WEIGHT_SINGLE_BUFFER[0]:
        try:
            return pl.BlockSpec(shape, idx, pipeline_mode=pl.Buffered(1))
        except (TypeError, ValueError):
            pass
    return pl.BlockSpec(shape, idx)


def _row_tile(n, row_bytes):
    """Largest row tile dividing n (multiple of 8) that fits a VMEM sub-budget."""
    budget = max(_VMEM_LIMIT_BYTES // 8, 1 << 20)
    fallback = None
    for t in (1024, 512, 256, 128, 64, 32, 16, 8):
        if n % t == 0:
            if fallback is None:
                fallback = t
            if t * row_bytes <= budget:
                return t
    return fallback if fallback is not None else n


def _seq_tile(s):
    """Sequence tile for flash attention: lane/MXU friendly (256/128) or full S."""
    for t in (256, 128):
        if s % t == 0:
            return t
    return s


def _ffn_chunk(f):
    """Column chunk of the FFN hidden dimension (bounds the (tm, F) hidden)."""
    for c in (1024, 512):
        if f % c == 0:
            return c
    return f


def _layernorm(x, alpha, beta, eps=EPS):
    """Torch LayerNormalization: unbiased std, alpha*(x-mean)/(std+eps)+beta."""
    d = x.shape[-1]
    mean = jnp.mean(x, axis=-1, keepdims=True)
    diff = x - mean
    var = jnp.sum(diff * diff, axis=-1, keepdims=True) * (1.0 / (d - 1))
    return alpha * (diff / (jnp.sqrt(var) + eps)) + beta


# ---------------------------------------------------------------------------
# Kernel 1: fused pre-norm + QKV projections (row-tiled), bf16 Q/K/V outputs.
# ---------------------------------------------------------------------------
def _ln_qkv_kernel(x_ref, a_ref, g_ref, wq_ref, bq_ref, wk_ref, bk_ref,
                   wv_ref, bv_ref, q_ref, k_ref, v_ref):
    x = x_ref[...]                                        # (tm, D) f32
    xn = _layernorm(x, a_ref[...], g_ref[...])
    xnm = xn.astype(wq_ref.dtype)                         # one cast, reused 3x
    q_ref[...] = (jnp.dot(xnm, wq_ref[...], preferred_element_type=jnp.float32)
                  + bq_ref[...]).astype(q_ref.dtype)
    k_ref[...] = (jnp.dot(xnm, wk_ref[...], preferred_element_type=jnp.float32)
                  + bk_ref[...]).astype(k_ref.dtype)
    v_ref[...] = (jnp.dot(xnm, wv_ref[...], preferred_element_type=jnp.float32)
                  + bv_ref[...]).astype(v_ref.dtype)


def ln_qkv(x2d, alpha, beta, wq, bq, wk, bk, wv, bv):
    N, D = x2d.shape
    # x (f32) + 3 bf16 outputs per row, roughly.
    tm = _row_tile(N, 4 * D + 3 * 2 * D)
    out_dtype = wq.dtype
    row_spec = pl.BlockSpec((tm, D), lambda i: (i, 0))
    return pl.pallas_call(
        _ln_qkv_kernel,
        out_shape=(jax.ShapeDtypeStruct((N, D), out_dtype),
                   jax.ShapeDtypeStruct((N, D), out_dtype),
                   jax.ShapeDtypeStruct((N, D), out_dtype)),
        grid=(N // tm,),
        in_specs=[
            row_spec,
            _invariant_spec((1, D)), _invariant_spec((1, D)),
            _invariant_spec((D, D)), _invariant_spec((1, D)),
            _invariant_spec((D, D)), _invariant_spec((1, D)),
            _invariant_spec((D, D)), _invariant_spec((1, D)),
        ],
        out_specs=(pl.BlockSpec((tm, D), lambda i: (i, 0)),
                   pl.BlockSpec((tm, D), lambda i: (i, 0)),
                   pl.BlockSpec((tm, D), lambda i: (i, 0))),
        compiler_params=_compiler_params(("parallel",)),
    )(x2d, alpha, beta, wq, bq, wk, bk, wv, bv)


# ---------------------------------------------------------------------------
# Kernel 2: flash-style attention + output projection + residual add.
#   grid = (B, S//tq, S//tkv), kv axis innermost ("arbitrary" reduction).
#   Per-head online-softmax state lives in VMEM scratch; heads never get
#   concatenated — each head accumulates its own Wo slice at finalize.
# ---------------------------------------------------------------------------
def _make_attn_kernel(num_heads, d_model):
    d_k = d_model // num_heads
    scale = 1.0 / math.sqrt(d_k)

    def kernel(q_ref, k_ref, v_ref, mask_ref, wo_ref, bo_ref, xres_ref, o_ref,
               m_sc, l_sc, acc_sc):
        kj = pl.program_id(2)

        @pl.when(kj == 0)
        def _():
            m_sc[...] = jnp.full_like(m_sc, M_INIT)
            l_sc[...] = jnp.zeros_like(l_sc)
            acc_sc[...] = jnp.zeros_like(acc_sc)

        q = q_ref[0]              # (tq,  D) bf16
        k = k_ref[0]              # (tkv, D) bf16
        v = v_ref[0]              # (tkv, D) bf16
        keep = mask_ref[0]        # (tq, tkv) bf16: 1 = keep, 0 = masked

        for h in range(num_heads):            # small H -> unrolled at trace time
            lo = h * d_k
            qh = q[:, lo:lo + d_k]
            kh = k[:, lo:lo + d_k]
            vh = v[:, lo:lo + d_k]
            # q @ k^T (no explicit transpose), f32 accumulation on the MXU.
            s = jax.lax.dot_general(
                qh, kh, dimension_numbers=(((1,), (1,)), ((), ())),
                preferred_element_type=jnp.float32) * scale
            s = jnp.where(keep == 0, NEG_INF, s)          # finite masked_fill

            m_prev = m_sc[h]                              # (tq, 1)
            m_new = jnp.maximum(m_prev, jnp.max(s, axis=-1, keepdims=True))
            alpha = jnp.exp(m_prev - m_new)
            p = jnp.exp(s - m_new)                        # (tq, tkv) f32
            l_sc[h] = alpha * l_sc[h] + jnp.sum(p, axis=-1, keepdims=True)
            acc_sc[h] = alpha * acc_sc[h] + jnp.dot(
                p.astype(v.dtype), vh, preferred_element_type=jnp.float32)
            m_sc[h] = m_new

        @pl.when(kj == pl.num_programs(2) - 1)
        def _():
            out = xres_ref[0] + bo_ref[...]               # residual + bias (f32)
            for h in range(num_heads):
                lo = h * d_k
                inv_l = pl.reciprocal(l_sc[h], approx=False)
                head = (acc_sc[h] * inv_l).astype(wo_ref.dtype)   # (tq, d_k)
                out = out + jnp.dot(head, wo_ref[lo:lo + d_k, :],
                                    preferred_element_type=jnp.float32)
            o_ref[0] = out

    return kernel


def attention_block(q, k, v, keep_mask, wo, bo, x_res, num_heads):
    B, S, D = q.shape
    d_k = D // num_heads
    tq = _seq_tile(S)
    tkv = _seq_tile(S)
    kernel = _make_attn_kernel(num_heads, D)
    return pl.pallas_call(
        kernel,
        out_shape=jax.ShapeDtypeStruct((B, S, D), jnp.float32),
        grid=(B, S // tq, S // tkv),
        in_specs=[
            pl.BlockSpec((1, tq, D), lambda b, i, j: (b, i, 0)),
            pl.BlockSpec((1, tkv, D), lambda b, i, j: (b, j, 0)),
            pl.BlockSpec((1, tkv, D), lambda b, i, j: (b, j, 0)),
            pl.BlockSpec((1, tq, tkv), lambda b, i, j: (b, i, j)),
            _invariant_spec((D, D)),
            _invariant_spec((1, D)),
            pl.BlockSpec((1, tq, D), lambda b, i, j: (b, i, 0)),
        ],
        out_specs=pl.BlockSpec((1, tq, D), lambda b, i, j: (b, i, 0)),
        scratch_shapes=[
            pltpu.VMEM((num_heads, tq, 1), jnp.float32),      # running max m
            pltpu.VMEM((num_heads, tq, 1), jnp.float32),      # running sum l
            pltpu.VMEM((num_heads, tq, d_k), jnp.float32),    # per-head acc
        ],
        compiler_params=_compiler_params(("parallel", "parallel", "arbitrary")),
    )(q, k, v, keep_mask, wo, bo, x_res)


# ---------------------------------------------------------------------------
# Kernel 3: fused pre-norm + FFN (+ residual, + optional final Encoder LN),
#           row-tiled, hidden dimension processed in lane-aligned chunks.
# ---------------------------------------------------------------------------
def _make_ffn_kernel(f_total, f_chunk, apply_final_ln):
    n_chunks = (f_total + f_chunk - 1) // f_chunk

    def kernel(x_ref, a_ref, g_ref, w1_ref, b1_ref, w2_ref, b2_ref,
               fa_ref, fb_ref, o_ref):
        x = x_ref[...]                                            # (tm, D) f32
        xn = _layernorm(x, a_ref[...], g_ref[...]).astype(w1_ref.dtype)
        acc = x + b2_ref[...]                                     # residual + b2
        for c in range(n_chunks):                                 # static unroll
            lo = c * f_chunk
            hi = min(lo + f_chunk, f_total)
            h = jnp.dot(xn, w1_ref[:, lo:hi],
                        preferred_element_type=jnp.float32) + b1_ref[:, lo:hi]
            h = jnp.maximum(h, 0.0).astype(w2_ref.dtype)
            acc = acc + jnp.dot(h, w2_ref[lo:hi, :],
                                preferred_element_type=jnp.float32)
        if apply_final_ln:
            acc = _layernorm(acc, fa_ref[...], fb_ref[...])
        o_ref[...] = acc

    return kernel


def ln_ffn_residual(x2d, alpha, beta, w1, b1, w2, b2, fin_a, fin_b,
                    apply_final_ln):
    N, D = x2d.shape
    F = w1.shape[1]
    fc = _ffn_chunk(F)
    tm = _row_tile(N, 4 * (3 * D + fc))
    kernel = _make_ffn_kernel(F, fc, apply_final_ln)
    return pl.pallas_call(
        kernel,
        out_shape=jax.ShapeDtypeStruct((N, D), jnp.float32),
        grid=(N // tm,),
        in_specs=[
            pl.BlockSpec((tm, D), lambda i: (i, 0)),
            _invariant_spec((1, D)), _invariant_spec((1, D)),
            _invariant_spec((D, F)), _invariant_spec((1, F)),
            _invariant_spec((F, D)), _invariant_spec((1, D)),
            _invariant_spec((1, D)), _invariant_spec((1, D)),
        ],
        out_specs=pl.BlockSpec((tm, D), lambda i: (i, 0)),
        compiler_params=_compiler_params(("parallel",)),
    )(x2d, alpha, beta, w1, b1, w2, b2, fin_a, fin_b)


# ---------------------------------------------------------------------------
# Kernel 4: standalone LayerNorm (only used for the degenerate 0-layer Encoder;
#           otherwise the final norm is fused into the last FFN kernel).
# ---------------------------------------------------------------------------
def _ln_only_kernel(x_ref, a_ref, g_ref, o_ref):
    o_ref[...] = _layernorm(x_ref[...], a_ref[...], g_ref[...])


def layer_norm(x2d, alpha, beta):
    N, D = x2d.shape
    tm = _row_tile(N, 8 * D)
    return pl.pallas_call(
        _ln_only_kernel,
        out_shape=jax.ShapeDtypeStruct((N, D), jnp.float32),
        grid=(N // tm,),
        in_specs=[pl.BlockSpec((tm, D), lambda i: (i, 0)),
                  _invariant_spec((1, D)), _invariant_spec((1, D))],
        out_specs=pl.BlockSpec((tm, D), lambda i: (i, 0)),
        compiler_params=_compiler_params(("parallel",)),
    )(x2d, alpha, beta)


# ---------------------------------------------------------------------------
# Parameter preparation (done ONCE, outside the per-forward path):
# pre-transpose nn.Linear weights to (in, out) and pre-cast them to bf16.
# ---------------------------------------------------------------------------
def prepare_params(raw, matmul_dtype=MXU_DTYPE):
    def w(t):
        return jnp.asarray(t).T.astype(matmul_dtype)

    def b(t):
        return jnp.asarray(t, jnp.float32).reshape(1, -1)

    layers = []
    for lp in raw["layers"]:
        layers.append(dict(
            ln1_a=b(lp["ln1_a"]), ln1_b=b(lp["ln1_b"]),
            wq=w(lp["w_q"]), bq=b(lp["b_q"]),
            wk=w(lp["w_k"]), bk=b(lp["b_k"]),
            wv=w(lp["w_v"]), bv=b(lp["b_v"]),
            wo=w(lp["w_o"]), bo=b(lp["b_o"]),
            ln2_a=b(lp["ln2_a"]), ln2_b=b(lp["ln2_b"]),
            w1=w(lp["w_1"]), b1=b(lp["b_1"]),
            w2=w(lp["w_2"]), b2=b(lp["b_2"]),
        ))
    return dict(layers=layers,
                norm_a=b(raw["norm_a"]), norm_b=b(raw["norm_b"]))


# ---------------------------------------------------------------------------
# Encoder forward (Pallas): loop over layers; the final LayerNorm is fused
# into the last layer's FFN kernel.
# ---------------------------------------------------------------------------
def encoder_forward(x, mask, prepared, *, num_heads):
    B, S, D = x.shape
    N = B * S
    # (B,1,S,S) keep/mask -> compact bf16 keep-mask (B,S,S), shared by every
    # layer and head; the finite -1e9 fill happens in-kernel.
    keep = (mask[:, 0, :, :] != 0).astype(jnp.bfloat16)

    layers = prepared["layers"]
    n_layers = len(layers)
    for li, lp in enumerate(layers):
        x2d = x.reshape(N, D)
        q, k, v = ln_qkv(x2d, lp["ln1_a"], lp["ln1_b"],
                         lp["wq"], lp["bq"], lp["wk"], lp["bk"],
                         lp["wv"], lp["bv"])                       # bf16 (N, D)
        x = attention_block(q.reshape(B, S, D), k.reshape(B, S, D),
                            v.reshape(B, S, D), keep,
                            lp["wo"], lp["bo"], x, num_heads)      # f32 (B,S,D)
        x = ln_ffn_residual(x.reshape(N, D), lp["ln2_a"], lp["ln2_b"],
                            lp["w1"], lp["b1"], lp["w2"], lp["b2"],
                            prepared["norm_a"], prepared["norm_b"],
                            apply_final_ln=(li == n_layers - 1)
                            ).reshape(B, S, D)
    if n_layers == 0:
        x = layer_norm(x.reshape(N, D),
                       prepared["norm_a"], prepared["norm_b"]).reshape(B, S, D)
    return x


# ---------------------------------------------------------------------------
# Pure-JAX reference (mirrors the PyTorch modules with raw nn.Linear layout).
# Matmul inputs are cast to MXU_DTYPE to emulate the kernel's bf16 MXU policy
# (f32 accumulation), so the comparison tests kernel correctness rather than
# the dtype policy itself.
# ---------------------------------------------------------------------------
def reference_encoder(x, mask, raw, num_heads, eps=EPS):
    B, S, D = x.shape
    d_k = D // num_heads
    cast = lambda t: t.astype(MXU_DTYPE)

    def mm(a, b):
        return jnp.dot(cast(a), cast(b), preferred_element_type=jnp.float32)

    def ln(t, a, bta):
        mean = t.mean(-1, keepdims=True)
        std = jnp.std(t, axis=-1, keepdims=True, ddof=1)   # torch unbiased std
        return a * (t - mean) / (std + eps) + bta

    def mha(xn, lp):
        def lin(t, w, bb):
            return mm(t.reshape(-1, D), w.T).reshape(B, S, -1) + bb

        def split(t):
            return t.reshape(B, S, num_heads, d_k).transpose(0, 2, 1, 3)

        q = split(lin(xn, lp["w_q"], lp["b_q"]))
        k = split(lin(xn, lp["w_k"], lp["b_k"]))
        v = split(lin(xn, lp["w_v"], lp["b_v"]))
        scores = jnp.einsum("bhqd,bhkd->bhqk", cast(q), cast(k),
                            preferred_element_type=jnp.float32) / math.sqrt(d_k)
        scores = jnp.where(mask == 0, NEG_INF, scores)
        p = jax.nn.softmax(scores, axis=-1)
        o = jnp.einsum("bhqk,bhkd->bhqd", cast(p), cast(v),
                       preferred_element_type=jnp.float32)
        o = o.transpose(0, 2, 1, 3).reshape(B, S, D)
        return mm(o.reshape(-1, D), lp["w_o"].T).reshape(B, S, D) + lp["b_o"]

    for lp in raw["layers"]:
        x = x + mha(ln(x, lp["ln1_a"], lp["ln1_b"]), lp)
        xn = ln(x, lp["ln2_a"], lp["ln2_b"])
        hid = jnp.maximum(
            mm(xn.reshape(-1, D), lp["w_1"].T).reshape(B, S, -1) + lp["b_1"], 0.0)
        x = x + mm(hid.reshape(B * S, -1), lp["w_2"].T).reshape(B, S, D) + lp["b_2"]
    return ln(x, raw["norm_a"], raw["norm_b"])


# ---------------------------------------------------------------------------
if __name__ == "__main__":
    B, S, D, H, F, L = 2, 8, 32, 4, 64, 2   # batch, seq, d_model, heads, d_ff, layers
    assert D % H == 0

    key = jax.random.PRNGKey(0)
    keys = iter(jax.random.split(key, 64))

    def uni(shape, fan_in):
        s = 1.0 / math.sqrt(fan_in)
        return jax.random.uniform(next(keys), shape, jnp.float32, -s, s)

    def ln_params():
        a = 1.0 + 0.1 * jax.random.normal(next(keys), (D,), jnp.float32)
        b = 0.1 * jax.random.normal(next(keys), (D,), jnp.float32)
        return a, b

    raw_layers = []
    for _ in range(L):
        ln1_a, ln1_b = ln_params()
        ln2_a, ln2_b = ln_params()
        raw_layers.append(dict(
            ln1_a=ln1_a, ln1_b=ln1_b,
            w_q=uni((D, D), D), b_q=uni((D,), D),
            w_k=uni((D, D), D), b_k=uni((D,), D),
            w_v=uni((D, D), D), b_v=uni((D,), D),
            w_o=uni((D, D), D), b_o=uni((D,), D),
            ln2_a=ln2_a, ln2_b=ln2_b,
            w_1=uni((F, D), D), b_1=uni((F,), D),
            w_2=uni((D, F), F), b_2=uni((D,), F),
        ))
    norm_a, norm_b = ln_params()
    raw_params = dict(layers=raw_layers, norm_a=norm_a, norm_b=norm_b)

    x = jax.random.normal(next(keys), (B, S, D), jnp.float32)
    # causal-style (B,1,S,S) mask: 1 = keep, 0 = masked.
    mask = jnp.tril(jnp.ones((S, S), jnp.int32))[None, None].repeat(B, axis=0)

    prepared = prepare_params(raw_params)

    encoder_fn = jax.jit(encoder_forward, static_argnames=("num_heads",))
    try:
        out = jax.block_until_ready(encoder_fn(x, mask, prepared, num_heads=H))
    except Exception:
        # This jax build may reject single-buffered (pl.Buffered(1)) weight
        # blocks; fall back to default double buffering and retry.
        _WEIGHT_SINGLE_BUFFER[0] = False
        encoder_fn = jax.jit(encoder_forward, static_argnames=("num_heads",))
        out = jax.block_until_ready(encoder_fn(x, mask, prepared, num_heads=H))

    ref = reference_encoder(x, mask, raw_params, H)
    err = float(jnp.max(jnp.abs(out - ref)))
    assert out.shape == ref.shape
    # bf16 MXU policy (emulated in the reference) + flash-vs-direct softmax
    # accumulation-order differences -> loose but meaningful tolerance.
    assert jnp.allclose(out, ref, atol=5e-2, rtol=5e-2), f"max abs err = {err}"

    print("KERNEL_OK")
</pallas_src>

<mosaic_0001>
module attributes {stable_mosaic.version = 11 : i64} {
  func.func @_ln_qkv_kernel(%arg0: i32, %arg1: memref<16x32xf32, #tpu.memory_space<vmem>>, %arg2: memref<1x32xf32, #tpu.memory_space<vmem>>, %arg3: memref<1x32xf32, #tpu.memory_space<vmem>>, %arg4: memref<32x32xbf16, #tpu.memory_space<vmem>>, %arg5: memref<1x32xf32, #tpu.memory_space<vmem>>, %arg6: memref<32x32xbf16, #tpu.memory_space<vmem>>, %arg7: memref<1x32xf32, #tpu.memory_space<vmem>>, %arg8: memref<32x32xbf16, #tpu.memory_space<vmem>>, %arg9: memref<1x32xf32, #tpu.memory_space<vmem>>, %arg10: memref<16x32xbf16, #tpu.memory_space<vmem>>, %arg11: memref<16x32xbf16, #tpu.memory_space<vmem>>, %arg12: memref<16x32xbf16, #tpu.memory_space<vmem>>) attributes {dimension_semantics = [#tpu.dimension_semantics<parallel>], iteration_bounds = array<i64: 1>, scalar_prefetch = 0 : i64, scratch_operands = 0 : i64, tpu.core_type = #tpu.core_type<tc>, window_params = [{transform_indices = @transform_0, window_bounds = array<i64: 16, 32>}, {pipeline_mode = #tpu.pipeline_mode<synchronous>, transform_indices = @transform_1, window_bounds = array<i64: 1, 32>}, {pipeline_mode = #tpu.pipeline_mode<synchronous>, transform_indices = @transform_2, window_bounds = array<i64: 1, 32>}, {pipeline_mode = #tpu.pipeline_mode<synchronous>, transform_indices = @transform_3, window_bounds = array<i64: 32, 32>}, {pipeline_mode = #tpu.pipeline_mode<synchronous>, transform_indices = @transform_4, window_bounds = array<i64: 1, 32>}, {pipeline_mode = #tpu.pipeline_mode<synchronous>, transform_indices = @transform_5, window_bounds = array<i64: 32, 32>}, {pipeline_mode = #tpu.pipeline_mode<synchronous>, transform_indices = @transform_6, window_bounds = array<i64: 1, 32>}, {pipeline_mode = #tpu.pipeline_mode<synchronous>, transform_indices = @transform_7, window_bounds = array<i64: 32, 32>}, {pipeline_mode = #tpu.pipeline_mode<synchronous>, transform_indices = @transform_8, window_bounds = array<i64: 1, 32>}, {transform_indices = @transform_9, window_bounds = array<i64: 16, 32>}, {transform_indices = @transform_10, window_bounds = array<i64: 16, 32>}, {transform_indices = @transform_11, window_bounds = array<i64: 16, 32>}]} {
    %c0 = arith.constant 0 : index
    %c0_0 = arith.constant 0 : index
    %0 = vector.load %arg1[%c0, %c0_0] : memref<16x32xf32, #tpu.memory_space<vmem>>, vector<16x32xf32>
    %c0_1 = arith.constant 0 : index
    %c0_2 = arith.constant 0 : index
    %1 = vector.load %arg2[%c0_1, %c0_2] : memref<1x32xf32, #tpu.memory_space<vmem>>, vector<1x32xf32>
    %c0_3 = arith.constant 0 : index
    %c0_4 = arith.constant 0 : index
    %2 = vector.load %arg3[%c0_3, %c0_4] : memref<1x32xf32, #tpu.memory_space<vmem>>, vector<1x32xf32>
    %cst = arith.constant dense<0.000000e+00> : vector<16xf32>
    %3 = vector.multi_reduction <add>, %0, %cst [1] : vector<16x32xf32> to vector<16xf32>
    %4 = vector.shape_cast %3 : vector<16xf32> to vector<16x1xf32>
    %cst_5 = arith.constant 3.200000e+01 : f32
    %5 = vector.broadcast %cst_5 : f32 to vector<16x1xf32>
    %6 = arith.divf %4, %5 : vector<16x1xf32>
    %7 = vector.broadcast %6 : vector<16x1xf32> to vector<16x32xf32>
    %8 = arith.subf %0, %7 : vector<16x32xf32>
    %9 = arith.mulf %8, %8 : vector<16x32xf32>
    %cst_6 = arith.constant dense<0.000000e+00> : vector<16xf32>
    %10 = vector.multi_reduction <add>, %9, %cst_6 [1] : vector<16x32xf32> to vector<16xf32>
    %11 = vector.shape_cast %10 : vector<16xf32> to vector<16x1xf32>
    %cst_7 = arith.constant 0.0322580636 : f32
    %12 = vector.broadcast %cst_7 : f32 to vector<16x1xf32>
    %13 = arith.mulf %11, %12 : vector<16x1xf32>
    %14 = math.sqrt %13 : vector<16x1xf32>
    %cst_8 = arith.constant 9.99999997E-7 : f32
    %15 = vector.broadcast %cst_8 : f32 to vector<16x1xf32>
    %16 = arith.addf %14, %15 : vector<16x1xf32>
    %17 = vector.broadcast %16 : vector<16x1xf32> to vector<16x32xf32>
    %18 = arith.divf %8, %17 : vector<16x32xf32>
    %19 = vector.broadcast %1 : vector<1x32xf32> to vector<16x32xf32>
    %20 = arith.mulf %19, %18 : vector<16x32xf32>
    %21 = vector.broadcast %2 : vector<1x32xf32> to vector<16x32xf32>
    %22 = arith.addf %20, %21 : vector<16x32xf32>
    %23 = arith.truncf %22 : vector<16x32xf32> to vector<16x32xbf16>
    %c0_9 = arith.constant 0 : index
    %c0_10 = arith.constant 0 : index
    %24 = vector.load %arg4[%c0_9, %c0_10] : memref<32x32xbf16, #tpu.memory_space<vmem>>, vector<32x32xbf16>
    %cst_11 = arith.constant dense<0.000000e+00> : vector<16x32xf32>
    %25 = tpu.matmul %23, %24, %cst_11 {dimension_numbers = #tpu.dot_dimension_numbers<[1], [0], [0], [1], [0, 0, 1, 1], [], []>} : vector<16x32xbf16>, vector<32x32xbf16>, vector<16x32xf32> -> vector<16x32xf32>
    %c0_12 = arith.constant 0 : index
    %c0_13 = arith.constant 0 : index
    %26 = vector.load %arg5[%c0_12, %c0_13] : memref<1x32xf32, #tpu.memory_space<vmem>>, vector<1x32xf32>
    %27 = vector.broadcast %26 : vector<1x32xf32> to vector<16x32xf32>
    %28 = arith.addf %25, %27 : vector<16x32xf32>
    %29 = arith.truncf %28 : vector<16x32xf32> to vector<16x32xbf16>
    %c0_14 = arith.constant 0 : index
    %c0_15 = arith.constant 0 : index
    %30 = vector.load %arg10[%c0_14, %c0_15] : memref<16x32xbf16, #tpu.memory_space<vmem>>, vector<16x32xbf16>
    tpu.vector_store %arg10[%c0_14, %c0_15], %29 {strides = array<i32>} : memref<16x32xbf16, #tpu.memory_space<vmem>>, vector<16x32xbf16>,
    %c0_16 = arith.constant 0 : index
    %c0_17 = arith.constant 0 : index
    %31 = vector.load %arg6[%c0_16, %c0_17] : memref<32x32xbf16, #tpu.memory_space<vmem>>, vector<32x32xbf16>
    %cst_18 = arith.constant dense<0.000000e+00> : vector<16x32xf32>
    %32 = tpu.matmul %23, %31, %cst_18 {dimension_numbers = #tpu.dot_dimension_numbers<[1], [0], [0], [1], [0, 0, 1, 1], [], []>} : vector<16x32xbf16>, vector<32x32xbf16>, vector<16x32xf32> -> vector<16x32xf32>
    %c0_19 = arith.constant 0 : index
    %c0_20 = arith.constant 0 : index
    %33 = vector.load %arg7[%c0_19, %c0_20] : memref<1x32xf32, #tpu.memory_space<vmem>>, vector<1x32xf32>
    %34 = vector.broadcast %33 : vector<1x32xf32> to vector<16x32xf32>
    %35 = arith.addf %32, %34 : vector<16x32xf32>
    %36 = arith.truncf %35 : vector<16x32xf32> to vector<16x32xbf16>
    %c0_21 = arith.constant 0 : index
    %c0_22 = arith.constant 0 : index
    %37 = vector.load %arg11[%c0_21, %c0_22] : memref<16x32xbf16, #tpu.memory_space<vmem>>, vector<16x32xbf16>
    tpu.vector_store %arg11[%c0_21, %c0_22], %36 {strides = array<i32>} : memref<16x32xbf16, #tpu.memory_space<vmem>>, vector<16x32xbf16>,
    %c0_23 = arith.constant 0 : index
    %c0_24 = arith.constant 0 : index
    %38 = vector.load %arg8[%c0_23, %c0_24] : memref<32x32xbf16, #tpu.memory_space<vmem>>, vector<32x32xbf16>
    %cst_25 = arith.constant dense<0.000000e+00> : vector<16x32xf32>
    %39 = tpu.matmul %23, %38, %cst_25 {dimension_numbers = #tpu.dot_dimension_numbers<[1], [0], [0], [1], [0, 0, 1, 1], [], []>} : vector<16x32xbf16>, vector<32x32xbf16>, vector<16x32xf32> -> vector<16x32xf32>
    %c0_26 = arith.constant 0 : index
    %c0_27 = arith.constant 0 : index
    %40 = vector.load %arg9[%c0_26, %c0_27] : memref<1x32xf32, #tpu.memory_space<vmem>>, vector<1x32xf32>
    %41 = vector.broadcast %40 : vector<1x32xf32> to vector<16x32xf32>
    %42 = arith.addf %39, %41 : vector<16x32xf32>
    %43 = arith.truncf %42 : vector<16x32xf32> to vector<16x32xbf16>
    %c0_28 = arith.constant 0 : index
    %c0_29 = arith.constant 0 : index
    %44 = vector.load %arg12[%c0_28, %c0_29] : memref<16x32xbf16, #tpu.memory_space<vmem>>, vector<16x32xbf16>
    tpu.vector_store %arg12[%c0_28, %c0_29], %43 {strides = array<i32>} : memref<16x32xbf16, #tpu.memory_space<vmem>>, vector<16x32xbf16>,
    return
  }
  func.func @transform_0(%arg0: i32) -> (i32, i32) {
    %c0_i32 = arith.constant 0 : i32
    %c0_i32_0 = arith.constant 0 : i32
    return %arg0, %c0_i32 : i32, i32
  }
  func.func @transform_1(%arg0: i32) -> (i32, i32) {
    %c0_i32 = arith.constant 0 : i32
    %c0_i32_0 = arith.constant 0 : i32
    %c0_i32_1 = arith.constant 0 : i32
    return %c0_i32, %c0_i32_0 : i32, i32
  }
  func.func @transform_2(%arg0: i32) -> (i32, i32) {
    %c0_i32 = arith.constant 0 : i32
    %c0_i32_0 = arith.constant 0 : i32
    %c0_i32_1 = arith.constant 0 : i32
    return %c0_i32, %c0_i32_0 : i32, i32
  }
  func.func @transform_3(%arg0: i32) -> (i32, i32) {
    %c0_i32 = arith.constant 0 : i32
    %c0_i32_0 = arith.constant 0 : i32
    %c0_i32_1 = arith.constant 0 : i32
    return %c0_i32, %c0_i32_0 : i32, i32
  }
  func.func @transform_4(%arg0: i32) -> (i32, i32) {
    %c0_i32 = arith.constant 0 : i32
    %c0_i32_0 = arith.constant 0 : i32
    %c0_i32_1 = arith.constant 0 : i32
    return %c0_i32, %c0_i32_0 : i32, i32
  }
  func.func @transform_5(%arg0: i32) -> (i32, i32) {
    %c0_i32 = arith.constant 0 : i32
    %c0_i32_0 = arith.constant 0 : i32
    %c0_i32_1 = arith.constant 0 : i32
    return %c0_i32, %c0_i32_0 : i32, i32
  }
  func.func @transform_6(%arg0: i32) -> (i32, i32) {
    %c0_i32 = arith.constant 0 : i32
    %c0_i32_0 = arith.constant 0 : i32
    %c0_i32_1 = arith.constant 0 : i32
    return %c0_i32, %c0_i32_0 : i32, i32
  }
  func.func @transform_7(%arg0: i32) -> (i32, i32) {
    %c0_i32 = arith.constant 0 : i32
    %c0_i32_0 = arith.constant 0 : i32
    %c0_i32_1 = arith.constant 0 : i32
    return %c0_i32, %c0_i32_0 : i32, i32
  }
  func.func @transform_8(%arg0: i32) -> (i32, i32) {
    %c0_i32 = arith.constant 0 : i32
    %c0_i32_0 = arith.constant 0 : i32
    %c0_i32_1 = arith.constant 0 : i32
    return %c0_i32, %c0_i32_0 : i32, i32
  }
  func.func @transform_9(%arg0: i32) -> (i32, i32) {
    %c0_i32 = arith.constant 0 : i32
    %c0_i32_0 = arith.constant 0 : i32
    return %arg0, %c0_i32 : i32, i32
  }
  func.func @transform_10(%arg0: i32) -> (i32, i32) {
    %c0_i32 = arith.constant 0 : i32
    %c0_i32_0 = arith.constant 0 : i32
    return %arg0, %c0_i32 : i32, i32
  }
  func.func @transform_11(%arg0: i32) -> (i32, i32) {
    %c0_i32 = arith.constant 0 : i32
    %c0_i32_0 = arith.constant 0 : i32
    return %arg0, %c0_i32 : i32, i32
  }
}

module attributes {stable_mosaic.version = 11 : i64} {
  func.func @kernel(%arg0: i32, %arg1: i32, %arg2: i32, %arg3: memref<1x8x32xbf16, #tpu.memory_space<vmem>>, %arg4: memref<1x8x32xbf16, #tpu.memory_space<vmem>>, %arg5: memref<1x8x32xbf16, #tpu.memory_space<vmem>>, %arg6: memref<1x8x8xbf16, #tpu.memory_space<vmem>>, %arg7: memref<32x32xbf16, #tpu.memory_space<vmem>>, %arg8: memref<1x32xf32, #tpu.memory_space<vmem>>, %arg9: memref<1x8x32xf32, #tpu.memory_space<vmem>>, %arg10: memref<1x8x32xf32, #tpu.memory_space<vmem>>, %arg11: memref<4x8x1xf32, #tpu.memory_space<vmem>>, %arg12: memref<4x8x1xf32, #tpu.memory_space<vmem>>, %arg13: memref<4x8x8xf32, #tpu.memory_space<vmem>>) attributes {dimension_semantics = [#tpu.dimension_semantics<parallel>, #tpu.dimension_semantics<parallel>, #tpu.dimension_semantics<arbitrary>], iteration_bounds = array<i64: 2, 1, 1>, scalar_prefetch = 0 : i64, scratch_operands = 3 : i64, tpu.core_type = #tpu.core_type<tc>, window_params = [{transform_indices = @transform_0, window_bounds = array<i64: 1, 8, 32>}, {transform_indices = @transform_1, window_bounds = array<i64: 1, 8, 32>}, {transform_indices = @transform_2, window_bounds = array<i64: 1, 8, 32>}, {transform_indices = @transform_3, window_bounds = array<i64: 1, 8, 8>}, {pipeline_mode = #tpu.pipeline_mode<synchronous>, transform_indices = @transform_4, window_bounds = array<i64: 32, 32>}, {pipeline_mode = #tpu.pipeline_mode<synchronous>, transform_indices = @transform_5, window_bounds = array<i64: 1, 32>}, {transform_indices = @transform_6, window_bounds = array<i64: 1, 8, 32>}, {transform_indices = @transform_7, window_bounds = array<i64: 1, 8, 32>}]} {
    %c0_i32 = arith.constant 0 : i32
    %0 = arith.cmpi eq, %arg2, %c0_i32 : i32
    %1 = arith.extui %0 : i1 to i32
    %c0_i32_0 = arith.constant 0 : i32
    %2 = arith.cmpi ne, %1, %c0_i32_0 : i32
    scf.if %2 {
      %cst_110 = arith.constant -1.000000e+30 : f32
      %182 = vector.broadcast %cst_110 : f32 to vector<4x8x1xf32>
      %c0_111 = arith.constant 0 : index
      %c0_112 = arith.constant 0 : index
      %c0_113 = arith.constant 0 : index
      %183 = vector.load %arg11[%c0_111, %c0_112, %c0_113] : memref<4x8x1xf32, #tpu.memory_space<vmem>>, vector<4x8x1xf32>
      tpu.vector_store %arg11[%c0_111, %c0_112, %c0_113], %182 {strides = array<i32>} : memref<4x8x1xf32, #tpu.memory_space<vmem>>, vector<4x8x1xf32>,
      %cst_114 = arith.constant 0.000000e+00 : f32
      %184 = vector.broadcast %cst_114 : f32 to vector<4x8x1xf32>
      %c0_115 = arith.constant 0 : index
      %c0_116 = arith.constant 0 : index
      %c0_117 = arith.constant 0 : index
      %185 = vector.load %arg12[%c0_115, %c0_116, %c0_117] : memref<4x8x1xf32, #tpu.memory_space<vmem>>, vector<4x8x1xf32>
      tpu.vector_store %arg12[%c0_115, %c0_116, %c0_117], %184 {strides = array<i32>} : memref<4x8x1xf32, #tpu.memory_space<vmem>>, vector<4x8x1xf32>,
      %cst_118 = arith.constant 0.000000e+00 : f32
      %186 = vector.broadcast %cst_118 : f32 to vector<4x8x8xf32>
      %c0_119 = arith.constant 0 : index
      %c0_120 = arith.constant 0 : index
      %c0_121 = arith.constant 0 : index
      %187 = vector.load %arg13[%c0_119, %c0_120, %c0_121] : memref<4x8x8xf32, #tpu.memory_space<vmem>>, vector<4x8x8xf32>
      tpu.vector_store %arg13[%c0_119, %c0_120, %c0_121], %186 {strides = array<i32>} : memref<4x8x8xf32, #tpu.memory_space<vmem>>, vector<4x8x8xf32>,
    } else {
    }
    %c0 = arith.constant 0 : index
    %c0_1 = arith.constant 0 : index
    %c0_2 = arith.constant 0 : index
    %3 = vector.load %arg3[%c0, %c0_1, %c0_2] : memref<1x8x32xbf16, #tpu.memory_space<vmem>>, vector<1x8x32xbf16>
    %4 = vector.shape_cast %3 : vector<1x8x32xbf16> to vector<8x32xbf16>
    %c0_3 = arith.constant 0 : index
    %c0_4 = arith.constant 0 : index
    %c0_5 = arith.constant 0 : index
    %5 = vector.load %arg4[%c0_3, %c0_4, %c0_5] : memref<1x8x32xbf16, #tpu.memory_space<vmem>>, vector<1x8x32xbf16>
    %6 = vector.shape_cast %5 : vector<1x8x32xbf16> to vector<8x32xbf16>
    %c0_6 = arith.constant 0 : index
    %c0_7 = arith.constant 0 : index
    %c0_8 = arith.constant 0 : index
    %7 = vector.load %arg5[%c0_6, %c0_7, %c0_8] : memref<1x8x32xbf16, #tpu.memory_space<vmem>>, vector<1x8x32xbf16>
    %8 = vector.shape_cast %7 : vector<1x8x32xbf16> to vector<8x32xbf16>
    %c0_9 = arith.constant 0 : index
    %c0_10 = arith.constant 0 : index
    %c0_11 = arith.constant 0 : index
    %9 = vector.load %arg6[%c0_9, %c0_10, %c0_11] : memref<1x8x8xbf16, #tpu.memory_space<vmem>>, vector<1x8x8xbf16>
    %10 = vector.shape_cast %9 : vector<1x8x8xbf16> to vector<8x8xbf16>
    %11 = vector.extract_strided_slice %4 {offsets = [0, 0], sizes = [8, 8], strides = [1, 1]} : vector<8x32xbf16> to vector<8x8xbf16>
    %12 = vector.extract_strided_slice %6 {offsets = [0, 0], sizes = [8, 8], strides = [1, 1]} : vector<8x32xbf16> to vector<8x8xbf16>
    %13 = vector.extract_strided_slice %8 {offsets = [0, 0], sizes = [8, 8], strides = [1, 1]} : vector<8x32xbf16> to vector<8x8xbf16>
    %cst = arith.constant dense<0.000000e+00> : vector<8x8xf32>
    %14 = tpu.matmul %11, %12, %cst {dimension_numbers = #tpu.dot_dimension_numbers<[1], [1], [0], [0], [0, 0, 1, 0], [], []>} : vector<8x8xbf16>, vector<8x8xbf16>, vector<8x8xf32> -> vector<8x8xf32>
    %cst_12 = arith.constant 0.353553385 : f32
    %15 = vector.broadcast %cst_12 : f32 to vector<8x8xf32>
    %16 = arith.mulf %14, %15 : vector<8x8xf32>
    %cst_13 = arith.constant 0.000000e+00 : bf16
    %17 = vector.broadcast %cst_13 : bf16 to vector<8x8xbf16>
    %18 = arith.cmpf oeq, %10, %17 : vector<8x8xbf16>
    %cst_14 = arith.constant -1.000000e+09 : f32
    %19 = vector.broadcast %cst_14 : f32 to vector<8x8xf32>
    %20 = arith.select %18, %19, %16 : vector<8x8xi1>, vector<8x8xf32>
    %c0_15 = arith.constant 0 : index
    %c0_16 = arith.constant 0 : index
    %c0_17 = arith.constant 0 : index
    %21 = vector.load %arg11[%c0_15, %c0_16, %c0_17] : memref<4x8x1xf32, #tpu.memory_space<vmem>>, vector<1x8x1xf32>
    %22 = vector.shape_cast %21 : vector<1x8x1xf32> to vector<8x1xf32>
    %cst_18 = arith.constant dense<0xFF800000> : vector<8xf32>
    %23 = vector.multi_reduction <maximumf>, %20, %cst_18 [1] : vector<8x8xf32> to vector<8xf32>
    %24 = vector.shape_cast %23 : vector<8xf32> to vector<8x1xf32>
    %25 = arith.maximumf %22, %24 : vector<8x1xf32>
    %26 = arith.subf %22, %25 : vector<8x1xf32>
    %27 = math.exp %26 : vector<8x1xf32>
    %28 = vector.broadcast %25 : vector<8x1xf32> to vector<8x8xf32>
    %29 = arith.subf %20, %28 : vector<8x8xf32>
    %30 = math.exp %29 : vector<8x8xf32>
    %c0_19 = arith.constant 0 : index
    %c0_20 = arith.constant 0 : index
    %c0_21 = arith.constant 0 : index
    %31 = vector.load %arg12[%c0_19, %c0_20, %c0_21] : memref<4x8x1xf32, #tpu.memory_space<vmem>>, vector<1x8x1xf32>
    %32 = vector.shape_cast %31 : vector<1x8x1xf32> to vector<8x1xf32>
    %33 = arith.mulf %27, %32 : vector<8x1xf32>
    %cst_22 = arith.constant dense<0.000000e+00> : vector<8xf32>
    %34 = vector.multi_reduction <add>, %30, %cst_22 [1] : vector<8x8xf32> to vector<8xf32>
    %35 = vector.shape_cast %34 : vector<8xf32> to vector<8x1xf32>
    %36 = arith.addf %33, %35 : vector<8x1xf32>
    %c0_23 = arith.constant 0 : index
    %c0_24 = arith.constant 0 : index
    %c0_25 = arith.constant 0 : index
    %37 = vector.load %arg12[%c0_23, %c0_24, %c0_25] : memref<4x8x1xf32, #tpu.memory_space<vmem>>, vector<1x8x1xf32>
    %38 = vector.shape_cast %37 : vector<1x8x1xf32> to vector<8x1xf32>
    %39 = vector.shape_cast %36 : vector<8x1xf32> to vector<1x8x1xf32>
    tpu.vector_store %arg12[%c0_23, %c0_24, %c0_25], %39 {strides = array<i32>} : memref<4x8x1xf32, #tpu.memory_space<vmem>>, vector<1x8x1xf32>,
    %c0_26 = arith.constant 0 : index
    %c0_27 = arith.constant 0 : index
    %c0_28 = arith.constant 0 : index
    %40 = vector.load %arg13[%c0_26, %c0_27, %c0_28] : memref<4x8x8xf32, #tpu.memory_space<vmem>>, vector<1x8x8xf32>
    %41 = vector.shape_cast %40 : vector<1x8x8xf32> to vector<8x8xf32>
    %42 = vector.broadcast %27 : vector<8x1xf32> to vector<8x8xf32>
    %43 = arith.mulf %42, %41 : vector<8x8xf32>
    %44 = arith.truncf %30 : vector<8x8xf32> to vector<8x8xbf16>
    %cst_29 = arith.constant dense<0.000000e+00> : vector<8x8xf32>
    %45 = tpu.matmul %44, %13, %cst_29 {dimension_numbers = #tpu.dot_dimension_numbers<[1], [0], [0], [1], [0, 0, 1, 1], [], []>} : vector<8x8xbf16>, vector<8x8xbf16>, vector<8x8xf32> -> vector<8x8xf32>
    %46 = arith.addf %43, %45 : vector<8x8xf32>
    %c0_30 = arith.constant 0 : index
    %c0_31 = arith.constant 0 : index
    %c0_32 = arith.constant 0 : index
    %47 = vector.load %arg13[%c0_30, %c0_31, %c0_32] : memref<4x8x8xf32, #tpu.memory_space<vmem>>, vector<1x8x8xf32>
    %48 = vector.shape_cast %47 : vector<1x8x8xf32> to vector<8x8xf32>
    %49 = vector.shape_cast %46 : vector<8x8xf32> to vector<1x8x8xf32>
    tpu.vector_store %arg13[%c0_30, %c0_31, %c0_32], %49 {strides = array<i32>} : memref<4x8x8xf32, #tpu.memory_space<vmem>>, vector<1x8x8xf32>,
    %c0_33 = arith.constant 0 : index
    %c0_34 = arith.constant 0 : index
    %c0_35 = arith.constant 0 : index
    %50 = vector.load %arg11[%c0_33, %c0_34, %c0_35] : memref<4x8x1xf32, #tpu.memory_space<vmem>>, vector<1x8x1xf32>
    %51 = vector.shape_cast %50 : vector<1x8x1xf32> to vector<8x1xf32>
    %52 = vector.shape_cast %25 : vector<8x1xf32> to vector<1x8x1xf32>
    tpu.vector_store %arg11[%c0_33, %c0_34, %c0_35], %52 {strides = array<i32>} : memref<4x8x1xf32, #tpu.memory_space<vmem>>, vector<1x8x1xf32>,
    %53 = vector.extract_strided_slice %4 {offsets = [0, 8], sizes = [8, 8], strides = [1, 1]} : vector<8x32xbf16> to vector<8x8xbf16>
    %54 = vector.extract_strided_slice %6 {offsets = [0, 8], sizes = [8, 8], strides = [1, 1]} : vector<8x32xbf16> to vector<8x8xbf16>
    %55 = vector.extract_strided_slice %8 {offsets = [0, 8], sizes = [8, 8], strides = [1, 1]} : vector<8x32xbf16> to vector<8x8xbf16>
    %cst_36 = arith.constant dense<0.000000e+00> : vector<8x8xf32>
    %56 = tpu.matmul %53, %54, %cst_36 {dimension_numbers = #tpu.dot_dimension_numbers<[1], [1], [0], [0], [0, 0, 1, 0], [], []>} : vector<8x8xbf16>, vector<8x8xbf16>, vector<8x8xf32> -> vector<8x8xf32>
    %cst_37 = arith.constant 0.353553385 : f32
    %57 = vector.broadcast %cst_37 : f32 to vector<8x8xf32>
    %58 = arith.mulf %56, %57 : vector<8x8xf32>
    %cst_38 = arith.constant 0.000000e+00 : bf16
    %59 = vector.broadcast %cst_38 : bf16 to vector<8x8xbf16>
    %60 = arith.cmpf oeq, %10, %59 : vector<8x8xbf16>
    %cst_39 = arith.constant -1.000000e+09 : f32
    %61 = vector.broadcast %cst_39 : f32 to vector<8x8xf32>
    %62 = arith.select %60, %61, %58 : vector<8x8xi1>, vector<8x8xf32>
    %c1 = arith.constant 1 : index
    %c0_40 = arith.constant 0 : index
    %c0_41 = arith.constant 0 : index
    %63 = vector.load %arg11[%c1, %c0_40, %c0_41] : memref<4x8x1xf32, #tpu.memory_space<vmem>>, vector<1x8x1xf32>
    %64 = vector.shape_cast %63 : vector<1x8x1xf32> to vector<8x1xf32>
    %cst_42 = arith.constant dense<0xFF800000> : vector<8xf32>
    %65 = vector.multi_reduction <maximumf>, %62, %cst_42 [1] : vector<8x8xf32> to vector<8xf32>
    %66 = vector.shape_cast %65 : vector<8xf32> to vector<8x1xf32>
    %67 = arith.maximumf %64, %66 : vector<8x1xf32>
    %68 = arith.subf %64, %67 : vector<8x1xf32>
    %69 = math.exp %68 : vector<8x1xf32>
    %70 = vector.broadcast %67 : vector<8x1xf32> to vector<8x8xf32>
    %71 = arith.subf %62, %70 : vector<8x8xf32>
    %72 = math.exp %71 : vector<8x8xf32>
    %c1_43 = arith.constant 1 : index
    %c0_44 = arith.constant 0 : index
    %c0_45 = arith.constant 0 : index
    %73 = vector.load %arg12[%c1_43, %c0_44, %c0_45] : memref<4x8x1xf32, #tpu.memory_space<vmem>>, vector<1x8x1xf32>
    %74 = vector.shape_cast %73 : vector<1x8x1xf32> to vector<8x1xf32>
    %75 = arith.mulf %69, %74 : vector<8x1xf32>
    %cst_46 = arith.constant dense<0.000000e+00> : vector<8xf32>
    %76 = vector.multi_reduction <add>, %72, %cst_46 [1] : vector<8x8xf32> to vector<8xf32>
    %77 = vector.shape_cast %76 : vector<8xf32> to vector<8x1xf32>
    %78 = arith.addf %75, %77 : vector<8x1xf32>
    %c1_47 = arith.constant 1 : index
    %c0_48 = arith.constant 0 : index
    %c0_49 = arith.constant 0 : index
    %79 = vector.load %arg12[%c1_47, %c0_48, %c0_49] : memref<4x8x1xf32, #tpu.memory_space<vmem>>, vector<1x8x1xf32>
    %80 = vector.shape_cast %79 : vector<1x8x1xf32> to vector<8x1xf32>
    %81 = vector.shape_cast %78 : vector<8x1xf32> to vector<1x8x1xf32>
    tpu.vector_store %arg12[%c1_47, %c0_48, %c0_49], %81 {strides = array<i32>} : memref<4x8x1xf32, #tpu.memory_space<vmem>>, vector<1x8x1xf32>,
    %c1_50 = arith.constant 1 : index
    %c0_51 = arith.constant 0 : index
    %c0_52 = arith.constant 0 : index
    %82 = vector.load %arg13[%c1_50, %c0_51, %c0_52] : memref<4x8x8xf32, #tpu.memory_space<vmem>>, vector<1x8x8xf32>
    %83 = vector.shape_cast %82 : vector<1x8x8xf32> to vector<8x8xf32>
    %84 = vector.broadcast %69 : vector<8x1xf32> to vector<8x8xf32>
    %85 = arith.mulf %84, %83 : vector<8x8xf32>
    %86 = arith.truncf %72 : vector<8x8xf32> to vector<8x8xbf16>
    %cst_53 = arith.constant dense<0.000000e+00> : vector<8x8xf32>
    %87 = tpu.matmul %86, %55, %cst_53 {dimension_numbers = #tpu.dot_dimension_numbers<[1], [0], [0], [1], [0, 0, 1, 1], [], []>} : vector<8x8xbf16>, vector<8x8xbf16>, vector<8x8xf32> -> vector<8x8xf32>
    %88 = arith.addf %85, %87 : vector<8x8xf32>
    %c1_54 = arith.constant 1 : index
    %c0_55 = arith.constant 0 : index
    %c0_56 = arith.constant 0 : index
    %89 = vector.load %arg13[%c1_54, %c0_55, %c0_56] : memref<4x8x8xf32, #tpu.memory_space<vmem>>, vector<1x8x8xf32>
    %90 = vector.shape_cast %89 : vector<1x8x8xf32> to vector<8x8xf32>
    %91 = vector.shape_cast %88 : vector<8x8xf32> to vector<1x8x8xf32>
    tpu.vector_store %arg13[%c1_54, %c0_55, %c0_56], %91 {strides = array<i32>} : memref<4x8x8xf32, #tpu.memory_space<vmem>>, vector<1x8x8xf32>,
    %c1_57 = arith.constant 1 : index
    %c0_58 = arith.constant 0 : index
    %c0_59 = arith.constant 0 : index
    %92 = vector.load %arg11[%c1_57, %c0_58, %c0_59] : memref<4x8x1xf32, #tpu.memory_space<vmem>>, vector<1x8x1xf32>
    %93 = vector.shape_cast %92 : vector<1x8x1xf32> to vector<8x1xf32>
    %94 = vector.shape_cast %67 : vector<8x1xf32> to vector<1x8x1xf32>
    tpu.vector_store %arg11[%c1_57, %c0_58, %c0_59], %94 {strides = array<i32>} : memref<4x8x1xf32, #tpu.memory_space<vmem>>, vector<1x8x1xf32>,
    %95 = vector.extract_strided_slice %4 {offsets = [0, 16], sizes = [8, 8], strides = [1, 1]} : vector<8x32xbf16> to vector<8x8xbf16>
    %96 = vector.extract_strided_slice %6 {offsets = [0, 16], sizes = [8, 8], strides = [1, 1]} : vector<8x32xbf16> to vector<8x8xbf16>
    %97 = vector.extract_strided_slice %8 {offsets = [0, 16], sizes = [8, 8], strides = [1, 1]} : vector<8x32xbf16> to vector<8x8xbf16>
    %cst_60 = arith.constant dense<0.000000e+00> : vector<8x8xf32>
    %98 = tpu.matmul %95, %96, %cst_60 {dimension_numbers = #tpu.dot_dimension_numbers<[1], [1], [0], [0], [0, 0, 1, 0], [], []>} : vector<8x8xbf16>, vector<8x8xbf16>, vector<8x8xf32> -> vector<8x8xf32>
    %cst_61 = arith.constant 0.353553385 : f32
    %99 = vector.broadcast %cst_61 : f32 to vector<8x8xf32>
    %100 = arith.mulf %98, %99 : vector<8x8xf32>
    %cst_62 = arith.constant 0.000000e+00 : bf16
    %101 = vector.broadcast %cst_62 : bf16 to vector<8x8xbf16>
    %102 = arith.cmpf oeq, %10, %101 : vector<8x8xbf16>
    %cst_63 = arith.constant -1.000000e+09 : f32
    %103 = vector.broadcast %cst_63 : f32 to vector<8x8xf32>
    %104 = arith.select %102, %103, %100 : vector<8x8xi1>, vector<8x8xf32>
    %c2 = arith.constant 2 : index
    %c0_64 = arith.constant 0 : index
    %c0_65 = arith.constant 0 : index
    %105 = vector.load %arg11[%c2, %c0_64, %c0_65] : memref<4x8x1xf32, #tpu.memory_space<vmem>>, vector<1x8x1xf32>
    %106 = vector.shape_cast %105 : vector<1x8x1xf32> to vector<8x1xf32>
    %cst_66 = arith.constant dense<0xFF800000> : vector<8xf32>
    %107 = vector.multi_reduction <maximumf>, %104, %cst_66 [1] : vector<8x8xf32> to vector<8xf32>
    %108 = vector.shape_cast %107 : vector<8xf32> to vector<8x1xf32>
    %109 = arith.maximumf %106, %108 : vector<8x1xf32>
    %110 = arith.subf %106, %109 : vector<8x1xf32>
    %111 = math.exp %110 : vector<8x1xf32>
    %112 = vector.broadcast %109 : vector<8x1xf32> to vector<8x8xf32>
    %113 = arith.subf %104, %112 : vector<8x8xf32>
    %114 = math.exp %113 : vector<8x8xf32>
    %c2_67 = arith.constant 2 : index
    %c0_68 = arith.constant 0 : index
    %c0_69 = arith.constant 0 : index
    %115 = vector.load %arg12[%c2_67, %c0_68, %c0_69] : memref<4x8x1xf32, #tpu.memory_space<vmem>>, vector<1x8x1xf32>
    %116 = vector.shape_cast %115 : vector<1x8x1xf32> to vector<8x1xf32>
    %117 = arith.mulf %111, %116 : vector<8x1xf32>
    %cst_70 = arith.constant dense<0.000000e+00> : vector<8xf32>
    %118 = vector.multi_reduction <add>, %114, %cst_70 [1] : vector<8x8xf32> to vector<8xf32>
    %119 = vector.shape_cast %118 : vector<8xf32> to vector<8x1xf32>
    %120 = arith.addf %117, %119 : vector<8x1xf32>
    %c2_71 = arith.constant 2 : index
    %c0_72 = arith.constant 0 : index
    %c0_73 = arith.constant 0 : index
    %121 = vector.load %arg12[%c2_71, %c0_72, %c0_73] : memref<4x8x1xf32, #tpu.memory_space<vmem>>, vector<1x8x1xf32>
    %122 = vector.shape_cast %121 : vector<1x8x1xf32> to vector<8x1xf32>
    %123 = vector.shape_cast %120 : vector<8x1xf32> to vector<1x8x1xf32>
    tpu.vector_store %arg12[%c2_71, %c0_72, %c0_73], %123 {strides = array<i32>} : memref<4x8x1xf32, #tpu.memory_space<vmem>>, vector<1x8x1xf32>,
    %c2_74 = arith.constant 2 : index
    %c0_75 = arith.constant 0 : index
    %c0_76 = arith.constant 0 : index
    %124 = vector.load %arg13[%c2_74, %c0_75, %c0_76] : memref<4x8x8xf32, #tpu.memory_space<vmem>>, vector<1x8x8xf32>
    %125 = vector.shape_cast %124 : vector<1x8x8xf32> to vector<8x8xf32>
    %126 = vector.broadcast %111 : vector<8x1xf32> to vector<8x8xf32>
    %127 = arith.mulf %126, %125 : vector<8x8xf32>
    %128 = arith.truncf %114 : vector<8x8xf32> to vector<8x8xbf16>
    %cst_77 = arith.constant dense<0.000000e+00> : vector<8x8xf32>
    %129 = tpu.matmul %128, %97, %cst_77 {dimension_numbers = #tpu.dot_dimension_numbers<[1], [0], [0], [1], [0, 0, 1, 1], [], []>} : vector<8x8xbf16>, vector<8x8xbf16>, vector<8x8xf32> -> vector<8x8xf32>
    %130 = arith.addf %127, %129 : vector<8x8xf32>
    %c2_78 = arith.constant 2 : index
    %c0_79 = arith.constant 0 : index
    %c0_80 = arith.constant 0 : index
    %131 = vector.load %arg13[%c2_78, %c0_79, %c0_80] : memref<4x8x8xf32, #tpu.memory_space<vmem>>, vector<1x8x8xf32>
    %132 = vector.shape_cast %131 : vector<1x8x8xf32> to vector<8x8xf32>
    %133 = vector.shape_cast %130 : vector<8x8xf32> to vector<1x8x8xf32>
    tpu.vector_store %arg13[%c2_78, %c0_79, %c0_80], %133 {strides = array<i32>} : memref<4x8x8xf32, #tpu.memory_space<vmem>>, vector<1x8x8xf32>,
    %c2_81 = arith.constant 2 : index
    %c0_82 = arith.constant 0 : index
    %c0_83 = arith.constant 0 : index
    %134 = vector.load %arg11[%c2_81, %c0_82, %c0_83] : memref<4x8x1xf32, #tpu.memory_space<vmem>>, vector<1x8x1xf32>
    %135 = vector.shape_cast %134 : vector<1x8x1xf32> to vector<8x1xf32>
    %136 = vector.shape_cast %109 : vector<8x1xf32> to vector<1x8x1xf32>
    tpu.vector_store %arg11[%c2_81, %c0_82, %c0_83], %136 {strides = array<i32>} : memref<4x8x1xf32, #tpu.memory_space<vmem>>, vector<1x8x1xf32>,
    %137 = vector.extract_strided_slice %4 {offsets = [0, 24], sizes = [8, 8], strides = [1, 1]} : vector<8x32xbf16> to vector<8x8xbf16>
    %138 = vector.extract_strided_slice %6 {offsets = [0, 24], sizes = [8, 8], strides = [1, 1]} : vector<8x32xbf16> to vector<8x8xbf16>
    %139 = vector.extract_strided_slice %8 {offsets = [0, 24], sizes = [8, 8], strides = [1, 1]} : vector<8x32xbf16> to vector<8x8xbf16>
    %cst_84 = arith.constant dense<0.000000e+00> : vector<8x8xf32>
    %140 = tpu.matmul %137, %138, %cst_84 {dimension_numbers = #tpu.dot_dimension_numbers<[1], [1], [0], [0], [0, 0, 1, 0], [], []>} : vector<8x8xbf16>, vector<8x8xbf16>, vector<8x8xf32> -> vector<8x8xf32>
    %cst_85 = arith.constant 0.353553385 : f32
    %141 = vector.broadcast %cst_85 : f32 to vector<8x8xf32>
    %142 = arith.mulf %140, %141 : vector<8x8xf32>
    %cst_86 = arith.constant 0.000000e+00 : bf16
    %143 = vector.broadcast %cst_86 : bf16 to vector<8x8xbf16>
    %144 = arith.cmpf oeq, %10, %143 : vector<8x8xbf16>
    %cst_87 = arith.constant -1.000000e+09 : f32
    %145 = vector.broadcast %cst_87 : f32 to vector<8x8xf32>
    %146 = arith.select %144, %145, %142 : vector<8x8xi1>, vector<8x8xf32>
    %c3 = arith.constant 3 : index
    %c0_88 = arith.constant 0 : index
    %c0_89 = arith.constant 0 : index
    %147 = vector.load %arg11[%c3, %c0_88, %c0_89] : memref<4x8x1xf32, #tpu.memory_space<vmem>>, vector<1x8x1xf32>
    %148 = vector.shape_cast %147 : vector<1x8x1xf32> to vector<8x1xf32>
    %cst_90 = arith.constant dense<0xFF800000> : vector<8xf32>
    %149 = vector.multi_reduction <maximumf>, %146, %cst_90 [1] : vector<8x8xf32> to vector<8xf32>
    %150 = vector.shape_cast %149 : vector<8xf32> to vector<8x1xf32>
    %151 = arith.maximumf %148, %150 : vector<8x1xf32>
    %152 = arith.subf %148, %151 : vector<8x1xf32>
    %153 = math.exp %152 : vector<8x1xf32>
    %154 = vector.broadcast %151 : vector<8x1xf32> to vector<8x8xf32>
    %155 = arith.subf %146, %154 : vector<8x8xf32>
    %156 = math.exp %155 : vector<8x8xf32>
    %c3_91 = arith.constant 3 : index
    %c0_92 = arith.constant 0 : index
    %c0_93 = arith.constant 0 : index
    %157 = vector.load %arg12[%c3_91, %c0_92, %c0_93] : memref<4x8x1xf32, #tpu.memory_space<vmem>>, vector<1x8x1xf32>
    %158 = vector.shape_cast %157 : vector<1x8x1xf32> to vector<8x1xf32>
    %159 = arith.mulf %153, %158 : vector<8x1xf32>
    %cst_94 = arith.constant dense<0.000000e+00> : vector<8xf32>
    %160 = vector.multi_reduction <add>, %156, %cst_94 [1] : vector<8x8xf32> to vector<8xf32>
    %161 = vector.shape_cast %160 : vector<8xf32> to vector<8x1xf32>
    %162 = arith.addf %159, %161 : vector<8x1xf32>
    %c3_95 = arith.constant 3 : index
    %c0_96 = arith.constant 0 : index
    %c0_97 = arith.constant 0 : index
    %163 = vector.load %arg12[%c3_95, %c0_96, %c0_97] : memref<4x8x1xf32, #tpu.memory_space<vmem>>, vector<1x8x1xf32>
    %164 = vector.shape_cast %163 : vector<1x8x1xf32> to vector<8x1xf32>
    %165 = vector.shape_cast %162 : vector<8x1xf32> to vector<1x8x1xf32>
    tpu.vector_store %arg12[%c3_95, %c0_96, %c0_97], %165 {strides = array<i32>} : memref<4x8x1xf32, #tpu.memory_space<vmem>>, vector<1x8x1xf32>,
    %c3_98 = arith.constant 3 : index
    %c0_99 = arith.constant 0 : index
    %c0_100 = arith.constant 0 : index
    %166 = vector.load %arg13[%c3_98, %c0_99, %c0_100] : memref<4x8x8xf32, #tpu.memory_space<vmem>>, vector<1x8x8xf32>
    %167 = vector.shape_cast %166 : vector<1x8x8xf32> to vector<8x8xf32>
    %168 = vector.broadcast %153 : vector<8x1xf32> to vector<8x8xf32>
    %169 = arith.mulf %168, %167 : vector<8x8xf32>
    %170 = arith.truncf %156 : vector<8x8xf32> to vector<8x8xbf16>
    %cst_101 = arith.constant dense<0.000000e+00> : vector<8x8xf32>
    %171 = tpu.matmul %170, %139, %cst_101 {dimension_numbers = #tpu.dot_dimension_numbers<[1], [0], [0], [1], [0, 0, 1, 1], [], []>} : vector<8x8xbf16>, vector<8x8xbf16>, vector<8x8xf32> -> vector<8x8xf32>
    %172 = arith.addf %169, %171 : vector<8x8xf32>
    %c3_102 = arith.constant 3 : index
    %c0_103 = arith.constant 0 : index
    %c0_104 = arith.constant 0 : index
    %173 = vector.load %arg13[%c3_102, %c0_103, %c0_104] : memref<4x8x8xf32, #tpu.memory_space<vmem>>, vector<1x8x8xf32>
    %174 = vector.shape_cast %173 : vector<1x8x8xf32> to vector<8x8xf32>
    %175 = vector.shape_cast %172 : vector<8x8xf32> to vector<1x8x8xf32>
    tpu.vector_store %arg13[%c3_102, %c0_103, %c0_104], %175 {strides = array<i32>} : memref<4x8x8xf32, #tpu.memory_space<vmem>>, vector<1x8x8xf32>,
    %c3_105 = arith.constant 3 : index
    %c0_106 = arith.constant 0 : index
    %c0_107 = arith.constant 0 : index
    %176 = vector.load %arg11[%c3_105, %c0_106, %c0_107] : memref<4x8x1xf32, #tpu.memory_space<vmem>>, vector<1x8x1xf32>
    %177 = vector.shape_cast %176 : vector<1x8x1xf32> to vector<8x1xf32>
    %178 = vector.shape_cast %151 : vector<8x1xf32> to vector<1x8x1xf32>
    tpu.vector_store %arg11[%c3_105, %c0_106, %c0_107], %178 {strides = array<i32>} : memref<4x8x1xf32, #tpu.memory_space<vmem>>, vector<1x8x1xf32>,
    %c0_i32_108 = arith.constant 0 : i32
    %179 = arith.cmpi eq, %arg2, %c0_i32_108 : i32
    %180 = arith.extui %179 : i1 to i32
    %c0_i32_109 = arith.constant 0 : i32
    %181 = arith.cmpi ne, %180, %c0_i32_109 : i32
    scf.if %181 {
      %c0_110 = arith.constant 0 : index
      %c0_111 = arith.constant 0 : index
      %c0_112 = arith.constant 0 : index
      %182 = vector.load %arg9[%c0_110, %c0_111, %c0_112] : memref<1x8x32xf32, #tpu.memory_space<vmem>>, vector<1x8x32xf32>
      %183 = vector.shape_cast %182 : vector<1x8x32xf32> to vector<8x32xf32>
      %c0_113 = arith.constant 0 : index
      %c0_114 = arith.constant 0 : index
      %184 = vector.load %arg8[%c0_113, %c0_114] : memref<1x32xf32, #tpu.memory_space<vmem>>, vector<1x32xf32>
      %185 = vector.broadcast %184 : vector<1x32xf32> to vector<8x32xf32>
      %186 = arith.addf %183, %185 : vector<8x32xf32>
      %c0_115 = arith.constant 0 : index
      %c0_116 = arith.constant 0 : index
      %c0_117 = arith.constant 0 : index
      %187 = vector.load %arg12[%c0_115, %c0_116, %c0_117] : memref<4x8x1xf32, #tpu.memory_space<vmem>>, vector<1x8x1xf32>
      %188 = vector.shape_cast %187 : vector<1x8x1xf32> to vector<8x1xf32>
      %189 = tpu.reciprocal %188 : vector<8x1xf32> -> vector<8x1xf32>
      %c0_118 = arith.constant 0 : index
      %c0_119 = arith.constant 0 : index
      %c0_120 = arith.constant 0 : index
      %190 = vector.load %arg13[%c0_118, %c0_119, %c0_120] : memref<4x8x8xf32, #tpu.memory_space<vmem>>, vector<1x8x8xf32>
      %191 = vector.shape_cast %190 : vector<1x8x8xf32> to vector<8x8xf32>
      %192 = vector.broadcast %189 : vector<8x1xf32> to vector<8x8xf32>
      %193 = arith.mulf %191, %192 : vector<8x8xf32>
      %194 = arith.truncf %193 : vector<8x8xf32> to vector<8x8xbf16>
      %c0_121 = arith.constant 0 : index
      %c0_122 = arith.constant 0 : index
      %195 = vector.load %arg7[%c0_121, %c0_122] : memref<32x32xbf16, #tpu.memory_space<vmem>>, vector<8x32xbf16>
      %cst_123 = arith.constant dense<0.000000e+00> : vector<8x32xf32>
      %196 = tpu.matmul %194, %195, %cst_123 {dimension_numbers = #tpu.dot_dimension_numbers<[1], [0], [0], [1], [0, 0, 1, 1], [], []>} : vector<8x8xbf16>, vector<8x32xbf16>, vector<8x32xf32> -> vector<8x32xf32>
      %197 = arith.addf %186, %196 : vector<8x32xf32>
      %c1_124 = arith.constant 1 : index
      %c0_125 = arith.constant 0 : index
      %c0_126 = arith.constant 0 : index
      %198 = vector.load %arg12[%c1_124, %c0_125, %c0_126] : memref<4x8x1xf32, #tpu.memory_space<vmem>>, vector<1x8x1xf32>
      %199 = vector.shape_cast %198 : vector<1x8x1xf32> to vector<8x1xf32>
      %200 = tpu.reciprocal %199 : vector<8x1xf32> -> vector<8x1xf32>
      %c1_127 = arith.constant 1 : index
      %c0_128 = arith.constant 0 : index
      %c0_129 = arith.constant 0 : index
      %201 = vector.load %arg13[%c1_127, %c0_128, %c0_129] : memref<4x8x8xf32, #tpu.memory_space<vmem>>, vector<1x8x8xf32>
      %202 = vector.shape_cast %201 : vector<1x8x8xf32> to vector<8x8xf32>
      %203 = vector.broadcast %200 : vector<8x1xf32> to vector<8x8xf32>
      %204 = arith.mulf %202, %203 : vector<8x8xf32>
      %205 = arith.truncf %204 : vector<8x8xf32> to vector<8x8xbf16>
      %c8 = arith.constant 8 : index
      %c0_130 = arith.constant 0 : index
      %206 = vector.load %arg7[%c8, %c0_130] : memref<32x32xbf16, #tpu.memory_space<vmem>>, vector<8x32xbf16>
      %cst_131 = arith.constant dense<0.000000e+00> : vector<8x32xf32>
      %207 = tpu.matmul %205, %206, %cst_131 {dimension_numbers = #tpu.dot_dimension_numbers<[1], [0], [0], [1], [0, 0, 1, 1], [], []>} : vector<8x8xbf16>, vector<8x32xbf16>, vector<8x32xf32> -> vector<8x32xf32>
      %208 = arith.addf %197, %207 : vector<8x32xf32>
      %c2_132 = arith.constant 2 : index
      %c0_133 = arith.constant 0 : index
      %c0_134 = arith.constant 0 : index
      %209 = vector.load %arg12[%c2_132, %c0_133, %c0_134] : memref<4x8x1xf32, #tpu.memory_space<vmem>>, vector<1x8x1xf32>
      %210 = vector.shape_cast %209 : vector<1x8x1xf32> to vector<8x1xf32>
      %211 = tpu.reciprocal %210 : vector<8x1xf32> -> vector<8x1xf32>
      %c2_135 = arith.constant 2 : index
      %c0_136 = arith.constant 0 : index
      %c0_137 = arith.constant 0 : index
      %212 = vector.load %arg13[%c2_135, %c0_136, %c0_137] : memref<4x8x8xf32, #tpu.memory_space<vmem>>, vector<1x8x8xf32>
      %213 = vector.shape_cast %212 : vector<1x8x8xf32> to vector<8x8xf32>
      %214 = vector.broadcast %211 : vector<8x1xf32> to vector<8x8xf32>
      %215 = arith.mulf %213, %214 : vector<8x8xf32>
      %216 = arith.truncf %215 : vector<8x8xf32> to vector<8x8xbf16>
      %c16 = arith.constant 16 : index
      %c0_138 = arith.constant 0 : index
      %217 = vector.load %arg7[%c16, %c0_138] : memref<32x32xbf16, #tpu.memory_space<vmem>>, vector<8x32xbf16>
      %cst_139 = arith.constant dense<0.000000e+00> : vector<8x32xf32>
      %218 = tpu.matmul %216, %217, %cst_139 {dimension_numbers = #tpu.dot_dimension_numbers<[1], [0], [0], [1], [0, 0, 1, 1], [], []>} : vector<8x8xbf16>, vector<8x32xbf16>, vector<8x32xf32> -> vector<8x32xf32>
      %219 = arith.addf %208, %218 : vector<8x32xf32>
      %c3_140 = arith.constant 3 : index
      %c0_141 = arith.constant 0 : index
      %c0_142 = arith.constant 0 : index
      %220 = vector.load %arg12[%c3_140, %c0_141, %c0_142] : memref<4x8x1xf32, #tpu.memory_space<vmem>>, vector<1x8x1xf32>
      %221 = vector.shape_cast %220 : vector<1x8x1xf32> to vector<8x1xf32>
      %222 = tpu.reciprocal %221 : vector<8x1xf32> -> vector<8x1xf32>
      %c3_143 = arith.constant 3 : index
      %c0_144 = arith.constant 0 : index
      %c0_145 = arith.constant 0 : index
      %223 = vector.load %arg13[%c3_143, %c0_144, %c0_145] : memref<4x8x8xf32, #tpu.memory_space<vmem>>, vector<1x8x8xf32>
      %224 = vector.shape_cast %223 : vector<1x8x8xf32> to vector<8x8xf32>
      %225 = vector.broadcast %222 : vector<8x1xf32> to vector<8x8xf32>
      %226 = arith.mulf %224, %225 : vector<8x8xf32>
      %227 = arith.truncf %226 : vector<8x8xf32> to vector<8x8xbf16>
      %c24 = arith.constant 24 : index
      %c0_146 = arith.constant 0 : index
      %228 = vector.load %arg7[%c24, %c0_146] : memref<32x32xbf16, #tpu.memory_space<vmem>>, vector<8x32xbf16>
      %cst_147 = arith.constant dense<0.000000e+00> : vector<8x32xf32>
      %229 = tpu.matmul %227, %228, %cst_147 {dimension_numbers = #tpu.dot_dimension_numbers<[1], [0], [0], [1], [0, 0, 1, 1], [], []>} : vector<8x8xbf16>, vector<8x32xbf16>, vector<8x32xf32> -> vector<8x32xf32>
      %230 = arith.addf %219, %229 : vector<8x32xf32>
      %c0_148 = arith.constant 0 : index
      %c0_149 = arith.constant 0 : index
      %c0_150 = arith.constant 0 : index
      %231 = vector.load %arg10[%c0_148, %c0_149, %c0_150] : memref<1x8x32xf32, #tpu.memory_space<vmem>>, vector<1x8x32xf32>
      %232 = vector.shape_cast %231 : vector<1x8x32xf32> to vector<8x32xf32>
      %233 = vector.shape_cast %230 : vector<8x32xf32> to vector<1x8x32xf32>
      tpu.vector_store %arg10[%c0_148, %c0_149, %c0_150], %233 {strides = array<i32>} : memref<1x8x32xf32, #tpu.memory_space<vmem>>, vector<1x8x32xf32>,
    } else {
    }
    return
  }
  func.func @transform_0(%arg0: i32, %arg1: i32, %arg2: i32) -> (i32, i32, i32) {
    %c0_i32 = arith.constant 0 : i32
    %c0_i32_0 = arith.constant 0 : i32
    return %arg0, %arg1, %c0_i32 : i32, i32, i32
  }
  func.func @transform_1(%arg0: i32, %arg1: i32, %arg2: i32) -> (i32, i32, i32) {
    %c0_i32 = arith.constant 0 : i32
    %c0_i32_0 = arith.constant 0 : i32
    return %arg0, %arg2, %c0_i32 : i32, i32, i32
  }
  func.func @transform_2(%arg0: i32, %arg1: i32, %arg2: i32) -> (i32, i32, i32) {
    %c0_i32 = arith.constant 0 : i32
    %c0_i32_0 = arith.constant 0 : i32
    return %arg0, %arg2, %c0_i32 : i32, i32, i32
  }
  func.func @transform_3(%arg0: i32, %arg1: i32, %arg2: i32) -> (i32, i32, i32) {
    %c0_i32 = arith.constant 0 : i32
    return %arg0, %arg1, %arg2 : i32, i32, i32
  }
  func.func @transform_4(%arg0: i32, %arg1: i32, %arg2: i32) -> (i32, i32) {
    %c0_i32 = arith.constant 0 : i32
    %c0_i32_0 = arith.constant 0 : i32
    %c0_i32_1 = arith.constant 0 : i32
    return %c0_i32, %c0_i32_0 : i32, i32
  }
  func.func @transform_5(%arg0: i32, %arg1: i32, %arg2: i32) -> (i32, i32) {
    %c0_i32 = arith.constant 0 : i32
    %c0_i32_0 = arith.constant 0 : i32
    %c0_i32_1 = arith.constant 0 : i32
    return %c0_i32, %c0_i32_0 : i32, i32
  }
  func.func @transform_6(%arg0: i32, %arg1: i32, %arg2: i32) -> (i32, i32, i32) {
    %c0_i32 = arith.constant 0 : i32
    %c0_i32_0 = arith.constant 0 : i32
    return %arg0, %arg1, %c0_i32 : i32, i32, i32
  }
  func.func @transform_7(%arg0: i32, %arg1: i32, %arg2: i32) -> (i32, i32, i32) {
    %c0_i32 = arith.constant 0 : i32
    %c0_i32_0 = arith.constant 0 : i32
    return %arg0, %arg1, %c0_i32 : i32, i32, i32
  }
}

module attributes {stable_mosaic.version = 11 : i64} {
  func.func @kernel(%arg0: i32, %arg1: memref<16x32xf32, #tpu.memory_space<vmem>>, %arg2: memref<1x32xf32, #tpu.memory_space<vmem>>, %arg3: memref<1x32xf32, #tpu.memory_space<vmem>>, %arg4: memref<32x64xbf16, #tpu.memory_space<vmem>>, %arg5: memref<1x64xf32, #tpu.memory_space<vmem>>, %arg6: memref<64x32xbf16, #tpu.memory_space<vmem>>, %arg7: memref<1x32xf32, #tpu.memory_space<vmem>>, %arg8: memref<1x32xf32, #tpu.memory_space<vmem>>, %arg9: memref<1x32xf32, #tpu.memory_space<vmem>>, %arg10: memref<16x32xf32, #tpu.memory_space<vmem>>) attributes {dimension_semantics = [#tpu.dimension_semantics<parallel>], iteration_bounds = array<i64: 1>, scalar_prefetch = 0 : i64, scratch_operands = 0 : i64, tpu.core_type = #tpu.core_type<tc>, window_params = [{transform_indices = @transform_0, window_bounds = array<i64: 16, 32>}, {pipeline_mode = #tpu.pipeline_mode<synchronous>, transform_indices = @transform_1, window_bounds = array<i64: 1, 32>}, {pipeline_mode = #tpu.pipeline_mode<synchronous>, transform_indices = @transform_2, window_bounds = array<i64: 1, 32>}, {pipeline_mode = #tpu.pipeline_mode<synchronous>, transform_indices = @transform_3, window_bounds = array<i64: 32, 64>}, {pipeline_mode = #tpu.pipeline_mode<synchronous>, transform_indices = @transform_4, window_bounds = array<i64: 1, 64>}, {pipeline_mode = #tpu.pipeline_mode<synchronous>, transform_indices = @transform_5, window_bounds = array<i64: 64, 32>}, {pipeline_mode = #tpu.pipeline_mode<synchronous>, transform_indices = @transform_6, window_bounds = array<i64: 1, 32>}, {pipeline_mode = #tpu.pipeline_mode<synchronous>, transform_indices = @transform_7, window_bounds = array<i64: 1, 32>}, {pipeline_mode = #tpu.pipeline_mode<synchronous>, transform_indices = @transform_8, window_bounds = array<i64: 1, 32>}, {transform_indices = @transform_9, window_bounds = array<i64: 16, 32>}]} {
    %c0 = arith.constant 0 : index
    %c0_0 = arith.constant 0 : index
    %0 = vector.load %arg1[%c0, %c0_0] : memref<16x32xf32, #tpu.memory_space<vmem>>, vector<16x32xf32>
    %c0_1 = arith.constant 0 : index
    %c0_2 = arith.constant 0 : index
    %1 = vector.load %arg2[%c0_1, %c0_2] : memref<1x32xf32, #tpu.memory_space<vmem>>, vector<1x32xf32>
    %c0_3 = arith.constant 0 : index
    %c0_4 = arith.constant 0 : index
    %2 = vector.load %arg3[%c0_3, %c0_4] : memref<1x32xf32, #tpu.memory_space<vmem>>, vector<1x32xf32>
    %cst = arith.constant dense<0.000000e+00> : vector<16xf32>
    %3 = vector.multi_reduction <add>, %0, %cst [1] : vector<16x32xf32> to vector<16xf32>
    %4 = vector.shape_cast %3 : vector<16xf32> to vector<16x1xf32>
    %cst_5 = arith.constant 3.200000e+01 : f32
    %5 = vector.broadcast %cst_5 : f32 to vector<16x1xf32>
    %6 = arith.divf %4, %5 : vector<16x1xf32>
    %7 = vector.broadcast %6 : vector<16x1xf32> to vector<16x32xf32>
    %8 = arith.subf %0, %7 : vector<16x32xf32>
    %9 = arith.mulf %8, %8 : vector<16x32xf32>
    %cst_6 = arith.constant dense<0.000000e+00> : vector<16xf32>
    %10 = vector.multi_reduction <add>, %9, %cst_6 [1] : vector<16x32xf32> to vector<16xf32>
    %11 = vector.shape_cast %10 : vector<16xf32> to vector<16x1xf32>
    %cst_7 = arith.constant 0.0322580636 : f32
    %12 = vector.broadcast %cst_7 : f32 to vector<16x1xf32>
    %13 = arith.mulf %11, %12 : vector<16x1xf32>
    %14 = math.sqrt %13 : vector<16x1xf32>
    %cst_8 = arith.constant 9.99999997E-7 : f32
    %15 = vector.broadcast %cst_8 : f32 to vector<16x1xf32>
    %16 = arith.addf %14, %15 : vector<16x1xf32>
    %17 = vector.broadcast %16 : vector<16x1xf32> to vector<16x32xf32>
    %18 = arith.divf %8, %17 : vector<16x32xf32>
    %19 = vector.broadcast %1 : vector<1x32xf32> to vector<16x32xf32>
    %20 = arith.mulf %19, %18 : vector<16x32xf32>
    %21 = vector.broadcast %2 : vector<1x32xf32> to vector<16x32xf32>
    %22 = arith.addf %20, %21 : vector<16x32xf32>
    %23 = arith.truncf %22 : vector<16x32xf32> to vector<16x32xbf16>
    %c0_9 = arith.constant 0 : index
    %c0_10 = arith.constant 0 : index
    %24 = vector.load %arg7[%c0_9, %c0_10] : memref<1x32xf32, #tpu.memory_space<vmem>>, vector<1x32xf32>
    %25 = vector.broadcast %24 : vector<1x32xf32> to vector<16x32xf32>
    %26 = arith.addf %0, %25 : vector<16x32xf32>
    %c0_11 = arith.constant 0 : index
    %c0_12 = arith.constant 0 : index
    %27 = vector.load %arg4[%c0_11, %c0_12] : memref<32x64xbf16, #tpu.memory_space<vmem>>, vector<32x64xbf16>
    %cst_13 = arith.constant dense<0.000000e+00> : vector<16x64xf32>
    %28 = tpu.matmul %23, %27, %cst_13 {dimension_numbers = #tpu.dot_dimension_numbers<[1], [0], [0], [1], [0, 0, 1, 1], [], []>} : vector<16x32xbf16>, vector<32x64xbf16>, vector<16x64xf32> -> vector<16x64xf32>
    %c0_14 = arith.constant 0 : index
    %c0_15 = arith.constant 0 : index
    %29 = vector.load %arg5[%c0_14, %c0_15] : memref<1x64xf32, #tpu.memory_space<vmem>>, vector<1x64xf32>
    %30 = vector.broadcast %29 : vector<1x64xf32> to vector<16x64xf32>
    %31 = arith.addf %28, %30 : vector<16x64xf32>
    %cst_16 = arith.constant 0.000000e+00 : f32
    %32 = vector.broadcast %cst_16 : f32 to vector<16x64xf32>
    %33 = arith.maximumf %31, %32 : vector<16x64xf32>
    %34 = arith.truncf %33 : vector<16x64xf32> to vector<16x64xbf16>
    %c0_17 = arith.constant 0 : index
    %c0_18 = arith.constant 0 : index
    %35 = vector.load %arg6[%c0_17, %c0_18] : memref<64x32xbf16, #tpu.memory_space<vmem>>, vector<64x32xbf16>
    %cst_19 = arith.constant dense<0.000000e+00> : vector<16x32xf32>
    %36 = tpu.matmul %34, %35, %cst_19 {dimension_numbers = #tpu.dot_dimension_numbers<[1], [0], [0], [1], [0, 0, 1, 1], [], []>} : vector<16x64xbf16>, vector<64x32xbf16>, vector<16x32xf32> -> vector<16x32xf32>
    %37 = arith.addf %26, %36 : vector<16x32xf32>
    %c0_20 = arith.constant 0 : index
    %c0_21 = arith.constant 0 : index
    %38 = vector.load %arg10[%c0_20, %c0_21] : memref<16x32xf32, #tpu.memory_space<vmem>>, vector<16x32xf32>
    tpu.vector_store %arg10[%c0_20, %c0_21], %37 {strides = array<i32>} : memref<16x32xf32, #tpu.memory_space<vmem>>, vector<16x32xf32>,
    return
  }
  func.func @transform_0(%arg0: i32) -> (i32, i32) {
    %c0_i32 = arith.constant 0 : i32
    %c0_i32_0 = arith.constant 0 : i32
    return %arg0, %c0_i32 : i32, i32
  }
  func.func @transform_1(%arg0: i32) -> (i32, i32) {
    %c0_i32 = arith.constant 0 : i32
    %c0_i32_0 = arith.constant 0 : i32
    %c0_i32_1 = arith.constant 0 : i32
    return %c0_i32, %c0_i32_0 : i32, i32
  }
  func.func @transform_2(%arg0: i32) -> (i32, i32) {
    %c0_i32 = arith.constant 0 : i32
    %c0_i32_0 = arith.constant 0 : i32
    %c0_i32_1 = arith.constant 0 : i32
    return %c0_i32, %c0_i32_0 : i32, i32
  }
  func.func @transform_3(%arg0: i32) -> (i32, i32) {
    %c0_i32 = arith.constant 0 : i32
    %c0_i32_0 = arith.constant 0 : i32
    %c0_i32_1 = arith.constant 0 : i32
    return %c0_i32, %c0_i32_0 : i32, i32
  }
  func.func @transform_4(%arg0: i32) -> (i32, i32) {
    %c0_i32 = arith.constant 0 : i32
    %c0_i32_0 = arith.constant 0 : i32
    %c0_i32_1 = arith.constant 0 : i32
    return %c0_i32, %c0_i32_0 : i32, i32
  }
  func.func @transform_5(%arg0: i32) -> (i32, i32) {
    %c0_i32 = arith.constant 0 : i32
    %c0_i32_0 = arith.constant 0 : i32
    %c0_i32_1 = arith.constant 0 : i32
    return %c0_i32, %c0_i32_0 : i32, i32
  }
  func.func @transform_6(%arg0: i32) -> (i32, i32) {
    %c0_i32 = arith.constant 0 : i32
    %c0_i32_0 = arith.constant 0 : i32
    %c0_i32_1 = arith.constant 0 : i32
    return %c0_i32, %c0_i32_0 : i32, i32
  }
  func.func @transform_7(%arg0: i32) -> (i32, i32) {
    %c0_i32 = arith.constant 0 : i32
    %c0_i32_0 = arith.constant 0 : i32
    %c0_i32_1 = arith.constant 0 : i32
    return %c0_i32, %c0_i32_0 : i32, i32
  }
  func.func @transform_8(%arg0: i32) -> (i32, i32) {
    %c0_i32 = arith.constant 0 : i32
    %c0_i32_0 = arith.constant 0 : i32
    %c0_i32_1 = arith.constant 0 : i32
    return %c0_i32, %c0_i32_0 : i32, i32
  }
  func.func @transform_9(%arg0: i32) -> (i32, i32) {
    %c0_i32 = arith.constant 0 : i32
    %c0_i32_0 = arith.constant 0 : i32
    return %arg0, %c0_i32 : i32, i32
  }
}

module attributes {stable_mosaic.version = 11 : i64} {
  func.func @_ln_qkv_kernel(%arg0: i32, %arg1: memref<16x32xf32, #tpu.memory_space<vmem>>, %arg2: memref<1x32xf32, #tpu.memory_space<vmem>>, %arg3: memref<1x32xf32, #tpu.memory_space<vmem>>, %arg4: memref<32x32xbf16, #tpu.memory_space<vmem>>, %arg5: memref<1x32xf32, #tpu.memory_space<vmem>>, %arg6: memref<32x32xbf16, #tpu.memory_space<vmem>>, %arg7: memref<1x32xf32, #tpu.memory_space<vmem>>, %arg8: memref<32x32xbf16, #tpu.memory_space<vmem>>, %arg9: memref<1x32xf32, #tpu.memory_space<vmem>>, %arg10: memref<16x32xbf16, #tpu.memory_space<vmem>>, %arg11: memref<16x32xbf16, #tpu.memory_space<vmem>>, %arg12: memref<16x32xbf16, #tpu.memory_space<vmem>>) attributes {dimension_semantics = [#tpu.dimension_semantics<parallel>], iteration_bounds = array<i64: 1>, scalar_prefetch = 0 : i64, scratch_operands = 0 : i64, tpu.core_type = #tpu.core_type<tc>, window_params = [{transform_indices = @transform_0, window_bounds = array<i64: 16, 32>}, {pipeline_mode = #tpu.pipeline_mode<synchronous>, transform_indices = @transform_1, window_bounds = array<i64: 1, 32>}, {pipeline_mode = #tpu.pipeline_mode<synchronous>, transform_indices = @transform_2, window_bounds = array<i64: 1, 32>}, {pipeline_mode = #tpu.pipeline_mode<synchronous>, transform_indices = @transform_3, window_bounds = array<i64: 32, 32>}, {pipeline_mode = #tpu.pipeline_mode<synchronous>, transform_indices = @transform_4, window_bounds = array<i64: 1, 32>}, {pipeline_mode = #tpu.pipeline_mode<synchronous>, transform_indices = @transform_5, window_bounds = array<i64: 32, 32>}, {pipeline_mode = #tpu.pipeline_mode<synchronous>, transform_indices = @transform_6, window_bounds = array<i64: 1, 32>}, {pipeline_mode = #tpu.pipeline_mode<synchronous>, transform_indices = @transform_7, window_bounds = array<i64: 32, 32>}, {pipeline_mode = #tpu.pipeline_mode<synchronous>, transform_indices = @transform_8, window_bounds = array<i64: 1, 32>}, {transform_indices = @transform_9, window_bounds = array<i64: 16, 32>}, {transform_indices = @transform_10, window_bounds = array<i64: 16, 32>}, {transform_indices = @transform_11, window_bounds = array<i64: 16, 32>}]} {
    %c0 = arith.constant 0 : index
    %c0_0 = arith.constant 0 : index
    %0 = vector.load %arg1[%c0, %c0_0] : memref<16x32xf32, #tpu.memory_space<vmem>>, vector<16x32xf32>
    %c0_1 = arith.constant 0 : index
    %c0_2 = arith.constant 0 : index
    %1 = vector.load %arg2[%c0_1, %c0_2] : memref<1x32xf32, #tpu.memory_space<vmem>>, vector<1x32xf32>
    %c0_3 = arith.constant 0 : index
    %c0_4 = arith.constant 0 : index
    %2 = vector.load %arg3[%c0_3, %c0_4] : memref<1x32xf32, #tpu.memory_space<vmem>>, vector<1x32xf32>
    %cst = arith.constant dense<0.000000e+00> : vector<16xf32>
    %3 = vector.multi_reduction <add>, %0, %cst [1] : vector<16x32xf32> to vector<16xf32>
    %4 = vector.shape_cast %3 : vector<16xf32> to vector<16x1xf32>
    %cst_5 = arith.constant 3.200000e+01 : f32
    %5 = vector.broadcast %cst_5 : f32 to vector<16x1xf32>
    %6 = arith.divf %4, %5 : vector<16x1xf32>
    %7 = vector.broadcast %6 : vector<16x1xf32> to vector<16x32xf32>
    %8 = arith.subf %0, %7 : vector<16x32xf32>
    %9 = arith.mulf %8, %8 : vector<16x32xf32>
    %cst_6 = arith.constant dense<0.000000e+00> : vector<16xf32>
    %10 = vector.multi_reduction <add>, %9, %cst_6 [1] : vector<16x32xf32> to vector<16xf32>
    %11 = vector.shape_cast %10 : vector<16xf32> to vector<16x1xf32>
    %cst_7 = arith.constant 0.0322580636 : f32
    %12 = vector.broadcast %cst_7 : f32 to vector<16x1xf32>
    %13 = arith.mulf %11, %12 : vector<16x1xf32>
    %14 = math.sqrt %13 : vector<16x1xf32>
    %cst_8 = arith.constant 9.99999997E-7 : f32
    %15 = vector.broadcast %cst_8 : f32 to vector<16x1xf32>
    %16 = arith.addf %14, %15 : vector<16x1xf32>
    %17 = vector.broadcast %16 : vector<16x1xf32> to vector<16x32xf32>
    %18 = arith.divf %8, %17 : vector<16x32xf32>
    %19 = vector.broadcast %1 : vector<1x32xf32> to vector<16x32xf32>
    %20 = arith.mulf %19, %18 : vector<16x32xf32>
    %21 = vector.broadcast %2 : vector<1x32xf32> to vector<16x32xf32>
    %22 = arith.addf %20, %21 : vector<16x32xf32>
    %23 = arith.truncf %22 : vector<16x32xf32> to vector<16x32xbf16>
    %c0_9 = arith.constant 0 : index
    %c0_10 = arith.constant 0 : index
    %24 = vector.load %arg4[%c0_9, %c0_10] : memref<32x32xbf16, #tpu.memory_space<vmem>>, vector<32x32xbf16>
    %cst_11 = arith.constant dense<0.000000e+00> : vector<16x32xf32>
    %25 = tpu.matmul %23, %24, %cst_11 {dimension_numbers = #tpu.dot_dimension_numbers<[1], [0], [0], [1], [0, 0, 1, 1], [], []>} : vector<16x32xbf16>, vector<32x32xbf16>, vector<16x32xf32> -> vector<16x32xf32>
    %c0_12 = arith.constant 0 : index
    %c0_13 = arith.constant 0 : index
    %26 = vector.load %arg5[%c0_12, %c0_13] : memref<1x32xf32, #tpu.memory_space<vmem>>, vector<1x32xf32>
    %27 = vector.broadcast %26 : vector<1x32xf32> to vector<16x32xf32>
    %28 = arith.addf %25, %27 : vector<16x32xf32>
    %29 = arith.truncf %28 : vector<16x32xf32> to vector<16x32xbf16>
    %c0_14 = arith.constant 0 : index
    %c0_15 = arith.constant 0 : index
    %30 = vector.load %arg10[%c0_14, %c0_15] : memref<16x32xbf16, #tpu.memory_space<vmem>>, vector<16x32xbf16>
    tpu.vector_store %arg10[%c0_14, %c0_15], %29 {strides = array<i32>} : memref<16x32xbf16, #tpu.memory_space<vmem>>, vector<16x32xbf16>,
    %c0_16 = arith.constant 0 : index
    %c0_17 = arith.constant 0 : index
    %31 = vector.load %arg6[%c0_16, %c0_17] : memref<32x32xbf16, #tpu.memory_space<vmem>>, vector<32x32xbf16>
    %cst_18 = arith.constant dense<0.000000e+00> : vector<16x32xf32>
    %32 = tpu.matmul %23, %31, %cst_18 {dimension_numbers = #tpu.dot_dimension_numbers<[1], [0], [0], [1], [0, 0, 1, 1], [], []>} : vector<16x32xbf16>, vector<32x32xbf16>, vector<16x32xf32> -> vector<16x32xf32>
    %c0_19 = arith.constant 0 : index
    %c0_20 = arith.constant 0 : index
    %33 = vector.load %arg7[%c0_19, %c0_20] : memref<1x32xf32, #tpu.memory_space<vmem>>, vector<1x32xf32>
    %34 = vector.broadcast %33 : vector<1x32xf32> to vector<16x32xf32>
    %35 = arith.addf %32, %34 : vector<16x32xf32>
    %36 = arith.truncf %35 : vector<16x32xf32> to vector<16x32xbf16>
    %c0_21 = arith.constant 0 : index
    %c0_22 = arith.constant 0 : index
    %37 = vector.load %arg11[%c0_21, %c0_22] : memref<16x32xbf16, #tpu.memory_space<vmem>>, vector<16x32xbf16>
    tpu.vector_store %arg11[%c0_21, %c0_22], %36 {strides = array<i32>} : memref<16x32xbf16, #tpu.memory_space<vmem>>, vector<16x32xbf16>,
    %c0_23 = arith.constant 0 : index
    %c0_24 = arith.constant 0 : index
    %38 = vector.load %arg8[%c0_23, %c0_24] : memref<32x32xbf16, #tpu.memory_space<vmem>>, vector<32x32xbf16>
    %cst_25 = arith.constant dense<0.000000e+00> : vector<16x32xf32>
    %39 = tpu.matmul %23, %38, %cst_25 {dimension_numbers = #tpu.dot_dimension_numbers<[1], [0], [0], [1], [0, 0, 1, 1], [], []>} : vector<16x32xbf16>, vector<32x32xbf16>, vector<16x32xf32> -> vector<16x32xf32>
    %c0_26 = arith.constant 0 : index
    %c0_27 = arith.constant 0 : index
    %40 = vector.load %arg9[%c0_26, %c0_27] : memref<1x32xf32, #tpu.memory_space<vmem>>, vector<1x32xf32>
    %41 = vector.broadcast %40 : vector<1x32xf32> to vector<16x32xf32>
    %42 = arith.addf %39, %41 : vector<16x32xf32>
    %43 = arith.truncf %42 : vector<16x32xf32> to vector<16x32xbf16>
    %c0_28 = arith.constant 0 : index
    %c0_29 = arith.constant 0 : index
    %44 = vector.load %arg12[%c0_28, %c0_29] : memref<16x32xbf16, #tpu.memory_space<vmem>>, vector<16x32xbf16>
    tpu.vector_store %arg12[%c0_28, %c0_29], %43 {strides = array<i32>} : memref<16x32xbf16, #tpu.memory_space<vmem>>, vector<16x32xbf16>,
    return
  }
  func.func @transform_0(%arg0: i32) -> (i32, i32) {
    %c0_i32 = arith.constant 0 : i32
    %c0_i32_0 = arith.constant 0 : i32
    return %arg0, %c0_i32 : i32, i32
  }
  func.func @transform_1(%arg0: i32) -> (i32, i32) {
    %c0_i32 = arith.constant 0 : i32
    %c0_i32_0 = arith.constant 0 : i32
    %c0_i32_1 = arith.constant 0 : i32
    return %c0_i32, %c0_i32_0 : i32, i32
  }
  func.func @transform_2(%arg0: i32) -> (i32, i32) {
    %c0_i32 = arith.constant 0 : i32
    %c0_i32_0 = arith.constant 0 : i32
    %c0_i32_1 = arith.constant 0 : i32
    return %c0_i32, %c0_i32_0 : i32, i32
  }
  func.func @transform_3(%arg0: i32) -> (i32, i32) {
    %c0_i32 = arith.constant 0 : i32
    %c0_i32_0 = arith.constant 0 : i32
    %c0_i32_1 = arith.constant 0 : i32
    return %c0_i32, %c0_i32_0 : i32, i32
  }
  func.func @transform_4(%arg0: i32) -> (i32, i32) {
    %c0_i32 = arith.constant 0 : i32
    %c0_i32_0 = arith.constant 0 : i32
    %c0_i32_1 = arith.constant 0 : i32
    return %c0_i32, %c0_i32_0 : i32, i32
  }
  func.func @transform_5(%arg0: i32) -> (i32, i32) {
    %c0_i32 = arith.constant 0 : i32
    %c0_i32_0 = arith.constant 0 : i32
    %c0_i32_1 = arith.constant 0 : i32
    return %c0_i32, %c0_i32_0 : i32, i32
  }
  func.func @transform_6(%arg0: i32) -> (i32, i32) {
    %c0_i32 = arith.constant 0 : i32
    %c0_i32_0 = arith.constant 0 : i32
    %c0_i32_1 = arith.constant 0 : i32
    return %c0_i32, %c0_i32_0 : i32, i32
  }
  func.func @transform_7(%arg0: i32) -> (i32, i32) {
    %c0_i32 = arith.constant 0 : i32
    %c0_i32_0 = arith.constant 0 : i32
    %c0_i32_1 = arith.constant 0 : i32
    return %c0_i32, %c0_i32_0 : i32, i32
  }
  func.func @transform_8(%arg0: i32) -> (i32, i32) {
    %c0_i32 = arith.constant 0 : i32
    %c0_i32_0 = arith.constant 0 : i32
    %c0_i32_1 = arith.constant 0 : i32
    return %c0_i32, %c0_i32_0 : i32, i32
  }
  func.func @transform_9(%arg0: i32) -> (i32, i32) {
    %c0_i32 = arith.constant 0 : i32
    %c0_i32_0 = arith.constant 0 : i32
    return %arg0, %c0_i32 : i32, i32
  }
  func.func @transform_10(%arg0: i32) -> (i32, i32) {
    %c0_i32 = arith.constant 0 : i32
    %c0_i32_0 = arith.constant 0 : i32
    return %arg0, %c0_i32 : i32, i32
  }
  func.func @transform_11(%arg0: i32) -> (i32, i32) {
    %c0_i32 = arith.constant 0 : i32
    %c0_i32_0 = arith.constant 0 : i32
    return %arg0, %c0_i32 : i32, i32
  }
}

module attributes {stable_mosaic.version = 11 : i64} {
  func.func @kernel(%arg0: i32, %arg1: i32, %arg2: i32, %arg3: memref<1x8x32xbf16, #tpu.memory_space<vmem>>, %arg4: memref<1x8x32xbf16, #tpu.memory_space<vmem>>, %arg5: memref<1x8x32xbf16, #tpu.memory_space<vmem>>, %arg6: memref<1x8x8xbf16, #tpu.memory_space<vmem>>, %arg7: memref<32x32xbf16, #tpu.memory_space<vmem>>, %arg8: memref<1x32xf32, #tpu.memory_space<vmem>>, %arg9: memref<1x8x32xf32, #tpu.memory_space<vmem>>, %arg10: memref<1x8x32xf32, #tpu.memory_space<vmem>>, %arg11: memref<4x8x1xf32, #tpu.memory_space<vmem>>, %arg12: memref<4x8x1xf32, #tpu.memory_space<vmem>>, %arg13: memref<4x8x8xf32, #tpu.memory_space<vmem>>) attributes {dimension_semantics = [#tpu.dimension_semantics<parallel>, #tpu.dimension_semantics<parallel>, #tpu.dimension_semantics<arbitrary>], iteration_bounds = array<i64: 2, 1, 1>, scalar_prefetch = 0 : i64, scratch_operands = 3 : i64, tpu.core_type = #tpu.core_type<tc>, window_params = [{transform_indices = @transform_0, window_bounds = array<i64: 1, 8, 32>}, {transform_indices = @transform_1, window_bounds = array<i64: 1, 8, 32>}, {transform_indices = @transform_2, window_bounds = array<i64: 1, 8, 32>}, {transform_indices = @transform_3, window_bounds = array<i64: 1, 8, 8>}, {pipeline_mode = #tpu.pipeline_mode<synchronous>, transform_indices = @transform_4, window_bounds = array<i64: 32, 32>}, {pipeline_mode = #tpu.pipeline_mode<synchronous>, transform_indices = @transform_5, window_bounds = array<i64: 1, 32>}, {transform_indices = @transform_6, window_bounds = array<i64: 1, 8, 32>}, {transform_indices = @transform_7, window_bounds = array<i64: 1, 8, 32>}]} {
    %c0_i32 = arith.constant 0 : i32
    %0 = arith.cmpi eq, %arg2, %c0_i32 : i32
    %1 = arith.extui %0 : i1 to i32
    %c0_i32_0 = arith.constant 0 : i32
    %2 = arith.cmpi ne, %1, %c0_i32_0 : i32
    scf.if %2 {
      %cst_110 = arith.constant -1.000000e+30 : f32
      %182 = vector.broadcast %cst_110 : f32 to vector<4x8x1xf32>
      %c0_111 = arith.constant 0 : index
      %c0_112 = arith.constant 0 : index
      %c0_113 = arith.constant 0 : index
      %183 = vector.load %arg11[%c0_111, %c0_112, %c0_113] : memref<4x8x1xf32, #tpu.memory_space<vmem>>, vector<4x8x1xf32>
      tpu.vector_store %arg11[%c0_111, %c0_112, %c0_113], %182 {strides = array<i32>} : memref<4x8x1xf32, #tpu.memory_space<vmem>>, vector<4x8x1xf32>,
      %cst_114 = arith.constant 0.000000e+00 : f32
      %184 = vector.broadcast %cst_114 : f32 to vector<4x8x1xf32>
      %c0_115 = arith.constant 0 : index
      %c0_116 = arith.constant 0 : index
      %c0_117 = arith.constant 0 : index
      %185 = vector.load %arg12[%c0_115, %c0_116, %c0_117] : memref<4x8x1xf32, #tpu.memory_space<vmem>>, vector<4x8x1xf32>
      tpu.vector_store %arg12[%c0_115, %c0_116, %c0_117], %184 {strides = array<i32>} : memref<4x8x1xf32, #tpu.memory_space<vmem>>, vector<4x8x1xf32>,
      %cst_118 = arith.constant 0.000000e+00 : f32
      %186 = vector.broadcast %cst_118 : f32 to vector<4x8x8xf32>
      %c0_119 = arith.constant 0 : index
      %c0_120 = arith.constant 0 : index
      %c0_121 = arith.constant 0 : index
      %187 = vector.load %arg13[%c0_119, %c0_120, %c0_121] : memref<4x8x8xf32, #tpu.memory_space<vmem>>, vector<4x8x8xf32>
      tpu.vector_store %arg13[%c0_119, %c0_120, %c0_121], %186 {strides = array<i32>} : memref<4x8x8xf32, #tpu.memory_space<vmem>>, vector<4x8x8xf32>,
    } else {
    }
    %c0 = arith.constant 0 : index
    %c0_1 = arith.constant 0 : index
    %c0_2 = arith.constant 0 : index
    %3 = vector.load %arg3[%c0, %c0_1, %c0_2] : memref<1x8x32xbf16, #tpu.memory_space<vmem>>, vector<1x8x32xbf16>
    %4 = vector.shape_cast %3 : vector<1x8x32xbf16> to vector<8x32xbf16>
    %c0_3 = arith.constant 0 : index
    %c0_4 = arith.constant 0 : index
    %c0_5 = arith.constant 0 : index
    %5 = vector.load %arg4[%c0_3, %c0_4, %c0_5] : memref<1x8x32xbf16, #tpu.memory_space<vmem>>, vector<1x8x32xbf16>
    %6 = vector.shape_cast %5 : vector<1x8x32xbf16> to vector<8x32xbf16>
    %c0_6 = arith.constant 0 : index
    %c0_7 = arith.constant 0 : index
    %c0_8 = arith.constant 0 : index
    %7 = vector.load %arg5[%c0_6, %c0_7, %c0_8] : memref<1x8x32xbf16, #tpu.memory_space<vmem>>, vector<1x8x32xbf16>
    %8 = vector.shape_cast %7 : vector<1x8x32xbf16> to vector<8x32xbf16>
    %c0_9 = arith.constant 0 : index
    %c0_10 = arith.constant 0 : index
    %c0_11 = arith.constant 0 : index
    %9 = vector.load %arg6[%c0_9, %c0_10, %c0_11] : memref<1x8x8xbf16, #tpu.memory_space<vmem>>, vector<1x8x8xbf16>
    %10 = vector.shape_cast %9 : vector<1x8x8xbf16> to vector<8x8xbf16>
    %11 = vector.extract_strided_slice %4 {offsets = [0, 0], sizes = [8, 8], strides = [1, 1]} : vector<8x32xbf16> to vector<8x8xbf16>
    %12 = vector.extract_strided_slice %6 {offsets = [0, 0], sizes = [8, 8], strides = [1, 1]} : vector<8x32xbf16> to vector<8x8xbf16>
    %13 = vector.extract_strided_slice %8 {offsets = [0, 0], sizes = [8, 8], strides = [1, 1]} : vector<8x32xbf16> to vector<8x8xbf16>
    %cst = arith.constant dense<0.000000e+00> : vector<8x8xf32>
    %14 = tpu.matmul %11, %12, %cst {dimension_numbers = #tpu.dot_dimension_numbers<[1], [1], [0], [0], [0, 0, 1, 0], [], []>} : vector<8x8xbf16>, vector<8x8xbf16>, vector<8x8xf32> -> vector<8x8xf32>
    %cst_12 = arith.constant 0.353553385 : f32
    %15 = vector.broadcast %cst_12 : f32 to vector<8x8xf32>
    %16 = arith.mulf %14, %15 : vector<8x8xf32>
    %cst_13 = arith.constant 0.000000e+00 : bf16
    %17 = vector.broadcast %cst_13 : bf16 to vector<8x8xbf16>
    %18 = arith.cmpf oeq, %10, %17 : vector<8x8xbf16>
    %cst_14 = arith.constant -1.000000e+09 : f32
    %19 = vector.broadcast %cst_14 : f32 to vector<8x8xf32>
    %20 = arith.select %18, %19, %16 : vector<8x8xi1>, vector<8x8xf32>
    %c0_15 = arith.constant 0 : index
    %c0_16 = arith.constant 0 : index
    %c0_17 = arith.constant 0 : index
    %21 = vector.load %arg11[%c0_15, %c0_16, %c0_17] : memref<4x8x1xf32, #tpu.memory_space<vmem>>, vector<1x8x1xf32>
    %22 = vector.shape_cast %21 : vector<1x8x1xf32> to vector<8x1xf32>
    %cst_18 = arith.constant dense<0xFF800000> : vector<8xf32>
    %23 = vector.multi_reduction <maximumf>, %20, %cst_18 [1] : vector<8x8xf32> to vector<8xf32>
    %24 = vector.shape_cast %23 : vector<8xf32> to vector<8x1xf32>
    %25 = arith.maximumf %22, %24 : vector<8x1xf32>
    %26 = arith.subf %22, %25 : vector<8x1xf32>
    %27 = math.exp %26 : vector<8x1xf32>
    %28 = vector.broadcast %25 : vector<8x1xf32> to vector<8x8xf32>
    %29 = arith.subf %20, %28 : vector<8x8xf32>
    %30 = math.exp %29 : vector<8x8xf32>
    %c0_19 = arith.constant 0 : index
    %c0_20 = arith.constant 0 : index
    %c0_21 = arith.constant 0 : index
    %31 = vector.load %arg12[%c0_19, %c0_20, %c0_21] : memref<4x8x1xf32, #tpu.memory_space<vmem>>, vector<1x8x1xf32>
    %32 = vector.shape_cast %31 : vector<1x8x1xf32> to vector<8x1xf32>
    %33 = arith.mulf %27, %32 : vector<8x1xf32>
    %cst_22 = arith.constant dense<0.000000e+00> : vector<8xf32>
    %34 = vector.multi_reduction <add>, %30, %cst_22 [1] : vector<8x8xf32> to vector<8xf32>
    %35 = vector.shape_cast %34 : vector<8xf32> to vector<8x1xf32>
    %36 = arith.addf %33, %35 : vector<8x1xf32>
    %c0_23 = arith.constant 0 : index
    %c0_24 = arith.constant 0 : index
    %c0_25 = arith.constant 0 : index
    %37 = vector.load %arg12[%c0_23, %c0_24, %c0_25] : memref<4x8x1xf32, #tpu.memory_space<vmem>>, vector<1x8x1xf32>
    %38 = vector.shape_cast %37 : vector<1x8x1xf32> to vector<8x1xf32>
    %39 = vector.shape_cast %36 : vector<8x1xf32> to vector<1x8x1xf32>
    tpu.vector_store %arg12[%c0_23, %c0_24, %c0_25], %39 {strides = array<i32>} : memref<4x8x1xf32, #tpu.memory_space<vmem>>, vector<1x8x1xf32>,
    %c0_26 = arith.constant 0 : index
    %c0_27 = arith.constant 0 : index
    %c0_28 = arith.constant 0 : index
    %40 = vector.load %arg13[%c0_26, %c0_27, %c0_28] : memref<4x8x8xf32, #tpu.memory_space<vmem>>, vector<1x8x8xf32>
    %41 = vector.shape_cast %40 : vector<1x8x8xf32> to vector<8x8xf32>
    %42 = vector.broadcast %27 : vector<8x1xf32> to vector<8x8xf32>
    %43 = arith.mulf %42, %41 : vector<8x8xf32>
    %44 = arith.truncf %30 : vector<8x8xf32> to vector<8x8xbf16>
    %cst_29 = arith.constant dense<0.000000e+00> : vector<8x8xf32>
    %45 = tpu.matmul %44, %13, %cst_29 {dimension_numbers = #tpu.dot_dimension_numbers<[1], [0], [0], [1], [0, 0, 1, 1], [], []>} : vector<8x8xbf16>, vector<8x8xbf16>, vector<8x8xf32> -> vector<8x8xf32>
    %46 = arith.addf %43, %45 : vector<8x8xf32>
    %c0_30 = arith.constant 0 : index
    %c0_31 = arith.constant 0 : index
    %c0_32 = arith.constant 0 : index
    %47 = vector.load %arg13[%c0_30, %c0_31, %c0_32] : memref<4x8x8xf32, #tpu.memory_space<vmem>>, vector<1x8x8xf32>
    %48 = vector.shape_cast %47 : vector<1x8x8xf32> to vector<8x8xf32>
    %49 = vector.shape_cast %46 : vector<8x8xf32> to vector<1x8x8xf32>
    tpu.vector_store %arg13[%c0_30, %c0_31, %c0_32], %49 {strides = array<i32>} : memref<4x8x8xf32, #tpu.memory_space<vmem>>, vector<1x8x8xf32>,
    %c0_33 = arith.constant 0 : index
    %c0_34 = arith.constant 0 : index
    %c0_35 = arith.constant 0 : index
    %50 = vector.load %arg11[%c0_33, %c0_34, %c0_35] : memref<4x8x1xf32, #tpu.memory_space<vmem>>, vector<1x8x1xf32>
    %51 = vector.shape_cast %50 : vector<1x8x1xf32> to vector<8x1xf32>
    %52 = vector.shape_cast %25 : vector<8x1xf32> to vector<1x8x1xf32>
    tpu.vector_store %arg11[%c0_33, %c0_34, %c0_35], %52 {strides = array<i32>} : memref<4x8x1xf32, #tpu.memory_space<vmem>>, vector<1x8x1xf32>,
    %53 = vector.extract_strided_slice %4 {offsets = [0, 8], sizes = [8, 8], strides = [1, 1]} : vector<8x32xbf16> to vector<8x8xbf16>
    %54 = vector.extract_strided_slice %6 {offsets = [0, 8], sizes = [8, 8], strides = [1, 1]} : vector<8x32xbf16> to vector<8x8xbf16>
    %55 = vector.extract_strided_slice %8 {offsets = [0, 8], sizes = [8, 8], strides = [1, 1]} : vector<8x32xbf16> to vector<8x8xbf16>
    %cst_36 = arith.constant dense<0.000000e+00> : vector<8x8xf32>
    %56 = tpu.matmul %53, %54, %cst_36 {dimension_numbers = #tpu.dot_dimension_numbers<[1], [1], [0], [0], [0, 0, 1, 0], [], []>} : vector<8x8xbf16>, vector<8x8xbf16>, vector<8x8xf32> -> vector<8x8xf32>
    %cst_37 = arith.constant 0.353553385 : f32
    %57 = vector.broadcast %cst_37 : f32 to vector<8x8xf32>
    %58 = arith.mulf %56, %57 : vector<8x8xf32>
    %cst_38 = arith.constant 0.000000e+00 : bf16
    %59 = vector.broadcast %cst_38 : bf16 to vector<8x8xbf16>
    %60 = arith.cmpf oeq, %10, %59 : vector<8x8xbf16>
    %cst_39 = arith.constant -1.000000e+09 : f32
    %61 = vector.broadcast %cst_39 : f32 to vector<8x8xf32>
    %62 = arith.select %60, %61, %58 : vector<8x8xi1>, vector<8x8xf32>
    %c1 = arith.constant 1 : index
    %c0_40 = arith.constant 0 : index
    %c0_41 = arith.constant 0 : index
    %63 = vector.load %arg11[%c1, %c0_40, %c0_41] : memref<4x8x1xf32, #tpu.memory_space<vmem>>, vector<1x8x1xf32>
    %64 = vector.shape_cast %63 : vector<1x8x1xf32> to vector<8x1xf32>
    %cst_42 = arith.constant dense<0xFF800000> : vector<8xf32>
    %65 = vector.multi_reduction <maximumf>, %62, %cst_42 [1] : vector<8x8xf32> to vector<8xf32>
    %66 = vector.shape_cast %65 : vector<8xf32> to vector<8x1xf32>
    %67 = arith.maximumf %64, %66 : vector<8x1xf32>
    %68 = arith.subf %64, %67 : vector<8x1xf32>
    %69 = math.exp %68 : vector<8x1xf32>
    %70 = vector.broadcast %67 : vector<8x1xf32> to vector<8x8xf32>
    %71 = arith.subf %62, %70 : vector<8x8xf32>
    %72 = math.exp %71 : vector<8x8xf32>
    %c1_43 = arith.constant 1 : index
    %c0_44 = arith.constant 0 : index
    %c0_45 = arith.constant 0 : index
    %73 = vector.load %arg12[%c1_43, %c0_44, %c0_45] : memref<4x8x1xf32, #tpu.memory_space<vmem>>, vector<1x8x1xf32>
    %74 = vector.shape_cast %73 : vector<1x8x1xf32> to vector<8x1xf32>
    %75 = arith.mulf %69, %74 : vector<8x1xf32>
    %cst_46 = arith.constant dense<0.000000e+00> : vector<8xf32>
    %76 = vector.multi_reduction <add>, %72, %cst_46 [1] : vector<8x8xf32> to vector<8xf32>
    %77 = vector.shape_cast %76 : vector<8xf32> to vector<8x1xf32>
    %78 = arith.addf %75, %77 : vector<8x1xf32>
    %c1_47 = arith.constant 1 : index
    %c0_48 = arith.constant 0 : index
    %c0_49 = arith.constant 0 : index
    %79 = vector.load %arg12[%c1_47, %c0_48, %c0_49] : memref<4x8x1xf32, #tpu.memory_space<vmem>>, vector<1x8x1xf32>
    %80 = vector.shape_cast %79 : vector<1x8x1xf32> to vector<8x1xf32>
    %81 = vector.shape_cast %78 : vector<8x1xf32> to vector<1x8x1xf32>
    tpu.vector_store %arg12[%c1_47, %c0_48, %c0_49], %81 {strides = array<i32>} : memref<4x8x1xf32, #tpu.memory_space<vmem>>, vector<1x8x1xf32>,
    %c1_50 = arith.constant 1 : index
    %c0_51 = arith.constant 0 : index
    %c0_52 = arith.constant 0 : index
    %82 = vector.load %arg13[%c1_50, %c0_51, %c0_52] : memref<4x8x8xf32, #tpu.memory_space<vmem>>, vector<1x8x8xf32>
    %83 = vector.shape_cast %82 : vector<1x8x8xf32> to vector<8x8xf32>
    %84 = vector.broadcast %69 : vector<8x1xf32> to vector<8x8xf32>
    %85 = arith.mulf %84, %83 : vector<8x8xf32>
    %86 = arith.truncf %72 : vector<8x8xf32> to vector<8x8xbf16>
    %cst_53 = arith.constant dense<0.000000e+00> : vector<8x8xf32>
    %87 = tpu.matmul %86, %55, %cst_53 {dimension_numbers = #tpu.dot_dimension_numbers<[1], [0], [0], [1], [0, 0, 1, 1], [], []>} : vector<8x8xbf16>, vector<8x8xbf16>, vector<8x8xf32> -> vector<8x8xf32>
    %88 = arith.addf %85, %87 : vector<8x8xf32>
    %c1_54 = arith.constant 1 : index
    %c0_55 = arith.constant 0 : index
    %c0_56 = arith.constant 0 : index
    %89 = vector.load %arg13[%c1_54, %c0_55, %c0_56] : memref<4x8x8xf32, #tpu.memory_space<vmem>>, vector<1x8x8xf32>
    %90 = vector.shape_cast %89 : vector<1x8x8xf32> to vector<8x8xf32>
    %91 = vector.shape_cast %88 : vector<8x8xf32> to vector<1x8x8xf32>
    tpu.vector_store %arg13[%c1_54, %c0_55, %c0_56], %91 {strides = array<i32>} : memref<4x8x8xf32, #tpu.memory_space<vmem>>, vector<1x8x8xf32>,
    %c1_57 = arith.constant 1 : index
    %c0_58 = arith.constant 0 : index
    %c0_59 = arith.constant 0 : index
    %92 = vector.load %arg11[%c1_57, %c0_58, %c0_59] : memref<4x8x1xf32, #tpu.memory_space<vmem>>, vector<1x8x1xf32>
    %93 = vector.shape_cast %92 : vector<1x8x1xf32> to vector<8x1xf32>
    %94 = vector.shape_cast %67 : vector<8x1xf32> to vector<1x8x1xf32>
    tpu.vector_store %arg11[%c1_57, %c0_58, %c0_59], %94 {strides = array<i32>} : memref<4x8x1xf32, #tpu.memory_space<vmem>>, vector<1x8x1xf32>,
    %95 = vector.extract_strided_slice %4 {offsets = [0, 16], sizes = [8, 8], strides = [1, 1]} : vector<8x32xbf16> to vector<8x8xbf16>
    %96 = vector.extract_strided_slice %6 {offsets = [0, 16], sizes = [8, 8], strides = [1, 1]} : vector<8x32xbf16> to vector<8x8xbf16>
    %97 = vector.extract_strided_slice %8 {offsets = [0, 16], sizes = [8, 8], strides = [1, 1]} : vector<8x32xbf16> to vector<8x8xbf16>
    %cst_60 = arith.constant dense<0.000000e+00> : vector<8x8xf32>
    %98 = tpu.matmul %95, %96, %cst_60 {dimension_numbers = #tpu.dot_dimension_numbers<[1], [1], [0], [0], [0, 0, 1, 0], [], []>} : vector<8x8xbf16>, vector<8x8xbf16>, vector<8x8xf32> -> vector<8x8xf32>
    %cst_61 = arith.constant 0.353553385 : f32
    %99 = vector.broadcast %cst_61 : f32 to vector<8x8xf32>
    %100 = arith.mulf %98, %99 : vector<8x8xf32>
    %cst_62 = arith.constant 0.000000e+00 : bf16
    %101 = vector.broadcast %cst_62 : bf16 to vector<8x8xbf16>
    %102 = arith.cmpf oeq, %10, %101 : vector<8x8xbf16>
    %cst_63 = arith.constant -1.000000e+09 : f32
    %103 = vector.broadcast %cst_63 : f32 to vector<8x8xf32>
    %104 = arith.select %102, %103, %100 : vector<8x8xi1>, vector<8x8xf32>
    %c2 = arith.constant 2 : index
    %c0_64 = arith.constant 0 : index
    %c0_65 = arith.constant 0 : index
    %105 = vector.load %arg11[%c2, %c0_64, %c0_65] : memref<4x8x1xf32, #tpu.memory_space<vmem>>, vector<1x8x1xf32>
    %106 = vector.shape_cast %105 : vector<1x8x1xf32> to vector<8x1xf32>
    %cst_66 = arith.constant dense<0xFF800000> : vector<8xf32>
    %107 = vector.multi_reduction <maximumf>, %104, %cst_66 [1] : vector<8x8xf32> to vector<8xf32>
    %108 = vector.shape_cast %107 : vector<8xf32> to vector<8x1xf32>
    %109 = arith.maximumf %106, %108 : vector<8x1xf32>
    %110 = arith.subf %106, %109 : vector<8x1xf32>
    %111 = math.exp %110 : vector<8x1xf32>
    %112 = vector.broadcast %109 : vector<8x1xf32> to vector<8x8xf32>
    %113 = arith.subf %104, %112 : vector<8x8xf32>
    %114 = math.exp %113 : vector<8x8xf32>
    %c2_67 = arith.constant 2 : index
    %c0_68 = arith.constant 0 : index
    %c0_69 = arith.constant 0 : index
    %115 = vector.load %arg12[%c2_67, %c0_68, %c0_69] : memref<4x8x1xf32, #tpu.memory_space<vmem>>, vector<1x8x1xf32>
    %116 = vector.shape_cast %115 : vector<1x8x1xf32> to vector<8x1xf32>
    %117 = arith.mulf %111, %116 : vector<8x1xf32>
    %cst_70 = arith.constant dense<0.000000e+00> : vector<8xf32>
    %118 = vector.multi_reduction <add>, %114, %cst_70 [1] : vector<8x8xf32> to vector<8xf32>
    %119 = vector.shape_cast %118 : vector<8xf32> to vector<8x1xf32>
    %120 = arith.addf %117, %119 : vector<8x1xf32>
    %c2_71 = arith.constant 2 : index
    %c0_72 = arith.constant 0 : index
    %c0_73 = arith.constant 0 : index
    %121 = vector.load %arg12[%c2_71, %c0_72, %c0_73] : memref<4x8x1xf32, #tpu.memory_space<vmem>>, vector<1x8x1xf32>
    %122 = vector.shape_cast %121 : vector<1x8x1xf32> to vector<8x1xf32>
    %123 = vector.shape_cast %120 : vector<8x1xf32> to vector<1x8x1xf32>
    tpu.vector_store %arg12[%c2_71, %c0_72, %c0_73], %123 {strides = array<i32>} : memref<4x8x1xf32, #tpu.memory_space<vmem>>, vector<1x8x1xf32>,
    %c2_74 = arith.constant 2 : index
    %c0_75 = arith.constant 0 : index
    %c0_76 = arith.constant 0 : index
    %124 = vector.load %arg13[%c2_74, %c0_75, %c0_76] : memref<4x8x8xf32, #tpu.memory_space<vmem>>, vector<1x8x8xf32>
    %125 = vector.shape_cast %124 : vector<1x8x8xf32> to vector<8x8xf32>
    %126 = vector.broadcast %111 : vector<8x1xf32> to vector<8x8xf32>
    %127 = arith.mulf %126, %125 : vector<8x8xf32>
    %128 = arith.truncf %114 : vector<8x8xf32> to vector<8x8xbf16>
    %cst_77 = arith.constant dense<0.000000e+00> : vector<8x8xf32>
    %129 = tpu.matmul %128, %97, %cst_77 {dimension_numbers = #tpu.dot_dimension_numbers<[1], [0], [0], [1], [0, 0, 1, 1], [], []>} : vector<8x8xbf16>, vector<8x8xbf16>, vector<8x8xf32> -> vector<8x8xf32>
    %130 = arith.addf %127, %129 : vector<8x8xf32>
    %c2_78 = arith.constant 2 : index
    %c0_79 = arith.constant 0 : index
    %c0_80 = arith.constant 0 : index
    %131 = vector.load %arg13[%c2_78, %c0_79, %c0_80] : memref<4x8x8xf32, #tpu.memory_space<vmem>>, vector<1x8x8xf32>
    %132 = vector.shape_cast %131 : vector<1x8x8xf32> to vector<8x8xf32>
    %133 = vector.shape_cast %130 : vector<8x8xf32> to vector<1x8x8xf32>
    tpu.vector_store %arg13[%c2_78, %c0_79, %c0_80], %133 {strides = array<i32>} : memref<4x8x8xf32, #tpu.memory_space<vmem>>, vector<1x8x8xf32>,
    %c2_81 = arith.constant 2 : index
    %c0_82 = arith.constant 0 : index
    %c0_83 = arith.constant 0 : index
    %134 = vector.load %arg11[%c2_81, %c0_82, %c0_83] : memref<4x8x1xf32, #tpu.memory_space<vmem>>, vector<1x8x1xf32>
    %135 = vector.shape_cast %134 : vector<1x8x1xf32> to vector<8x1xf32>
    %136 = vector.shape_cast %109 : vector<8x1xf32> to vector<1x8x1xf32>
    tpu.vector_store %arg11[%c2_81, %c0_82, %c0_83], %136 {strides = array<i32>} : memref<4x8x1xf32, #tpu.memory_space<vmem>>, vector<1x8x1xf32>,
    %137 = vector.extract_strided_slice %4 {offsets = [0, 24], sizes = [8, 8], strides = [1, 1]} : vector<8x32xbf16> to vector<8x8xbf16>
    %138 = vector.extract_strided_slice %6 {offsets = [0, 24], sizes = [8, 8], strides = [1, 1]} : vector<8x32xbf16> to vector<8x8xbf16>
    %139 = vector.extract_strided_slice %8 {offsets = [0, 24], sizes = [8, 8], strides = [1, 1]} : vector<8x32xbf16> to vector<8x8xbf16>
    %cst_84 = arith.constant dense<0.000000e+00> : vector<8x8xf32>
    %140 = tpu.matmul %137, %138, %cst_84 {dimension_numbers = #tpu.dot_dimension_numbers<[1], [1], [0], [0], [0, 0, 1, 0], [], []>} : vector<8x8xbf16>, vector<8x8xbf16>, vector<8x8xf32> -> vector<8x8xf32>
    %cst_85 = arith.constant 0.353553385 : f32
    %141 = vector.broadcast %cst_85 : f32 to vector<8x8xf32>
    %142 = arith.mulf %140, %141 : vector<8x8xf32>
    %cst_86 = arith.constant 0.000000e+00 : bf16
    %143 = vector.broadcast %cst_86 : bf16 to vector<8x8xbf16>
    %144 = arith.cmpf oeq, %10, %143 : vector<8x8xbf16>
    %cst_87 = arith.constant -1.000000e+09 : f32
    %145 = vector.broadcast %cst_87 : f32 to vector<8x8xf32>
    %146 = arith.select %144, %145, %142 : vector<8x8xi1>, vector<8x8xf32>
    %c3 = arith.constant 3 : index
    %c0_88 = arith.constant 0 : index
    %c0_89 = arith.constant 0 : index
    %147 = vector.load %arg11[%c3, %c0_88, %c0_89] : memref<4x8x1xf32, #tpu.memory_space<vmem>>, vector<1x8x1xf32>
    %148 = vector.shape_cast %147 : vector<1x8x1xf32> to vector<8x1xf32>
    %cst_90 = arith.constant dense<0xFF800000> : vector<8xf32>
    %149 = vector.multi_reduction <maximumf>, %146, %cst_90 [1] : vector<8x8xf32> to vector<8xf32>
    %150 = vector.shape_cast %149 : vector<8xf32> to vector<8x1xf32>
    %151 = arith.maximumf %148, %150 : vector<8x1xf32>
    %152 = arith.subf %148, %151 : vector<8x1xf32>
    %153 = math.exp %152 : vector<8x1xf32>
    %154 = vector.broadcast %151 : vector<8x1xf32> to vector<8x8xf32>
    %155 = arith.subf %146, %154 : vector<8x8xf32>
    %156 = math.exp %155 : vector<8x8xf32>
    %c3_91 = arith.constant 3 : index
    %c0_92 = arith.constant 0 : index
    %c0_93 = arith.constant 0 : index
    %157 = vector.load %arg12[%c3_91, %c0_92, %c0_93] : memref<4x8x1xf32, #tpu.memory_space<vmem>>, vector<1x8x1xf32>
    %158 = vector.shape_cast %157 : vector<1x8x1xf32> to vector<8x1xf32>
    %159 = arith.mulf %153, %158 : vector<8x1xf32>
    %cst_94 = arith.constant dense<0.000000e+00> : vector<8xf32>
    %160 = vector.multi_reduction <add>, %156, %cst_94 [1] : vector<8x8xf32> to vector<8xf32>
    %161 = vector.shape_cast %160 : vector<8xf32> to vector<8x1xf32>
    %162 = arith.addf %159, %161 : vector<8x1xf32>
    %c3_95 = arith.constant 3 : index
    %c0_96 = arith.constant 0 : index
    %c0_97 = arith.constant 0 : index
    %163 = vector.load %arg12[%c3_95, %c0_96, %c0_97] : memref<4x8x1xf32, #tpu.memory_space<vmem>>, vector<1x8x1xf32>
    %164 = vector.shape_cast %163 : vector<1x8x1xf32> to vector<8x1xf32>
    %165 = vector.shape_cast %162 : vector<8x1xf32> to vector<1x8x1xf32>
    tpu.vector_store %arg12[%c3_95, %c0_96, %c0_97], %165 {strides = array<i32>} : memref<4x8x1xf32, #tpu.memory_space<vmem>>, vector<1x8x1xf32>,
    %c3_98 = arith.constant 3 : index
    %c0_99 = arith.constant 0 : index
    %c0_100 = arith.constant 0 : index
    %166 = vector.load %arg13[%c3_98, %c0_99, %c0_100] : memref<4x8x8xf32, #tpu.memory_space<vmem>>, vector<1x8x8xf32>
    %167 = vector.shape_cast %166 : vector<1x8x8xf32> to vector<8x8xf32>
    %168 = vector.broadcast %153 : vector<8x1xf32> to vector<8x8xf32>
    %169 = arith.mulf %168, %167 : vector<8x8xf32>
    %170 = arith.truncf %156 : vector<8x8xf32> to vector<8x8xbf16>
    %cst_101 = arith.constant dense<0.000000e+00> : vector<8x8xf32>
    %171 = tpu.matmul %170, %139, %cst_101 {dimension_numbers = #tpu.dot_dimension_numbers<[1], [0], [0], [1], [0, 0, 1, 1], [], []>} : vector<8x8xbf16>, vector<8x8xbf16>, vector<8x8xf32> -> vector<8x8xf32>
    %172 = arith.addf %169, %171 : vector<8x8xf32>
    %c3_102 = arith.constant 3 : index
    %c0_103 = arith.constant 0 : index
    %c0_104 = arith.constant 0 : index
    %173 = vector.load %arg13[%c3_102, %c0_103, %c0_104] : memref<4x8x8xf32, #tpu.memory_space<vmem>>, vector<1x8x8xf32>
    %174 = vector.shape_cast %173 : vector<1x8x8xf32> to vector<8x8xf32>
    %175 = vector.shape_cast %172 : vector<8x8xf32> to vector<1x8x8xf32>
    tpu.vector_store %arg13[%c3_102, %c0_103, %c0_104], %175 {strides = array<i32>} : memref<4x8x8xf32, #tpu.memory_space<vmem>>, vector<1x8x8xf32>,
    %c3_105 = arith.constant 3 : index
    %c0_106 = arith.constant 0 : index
    %c0_107 = arith.constant 0 : index
    %176 = vector.load %arg11[%c3_105, %c0_106, %c0_107] : memref<4x8x1xf32, #tpu.memory_space<vmem>>, vector<1x8x1xf32>
    %177 = vector.shape_cast %176 : vector<1x8x1xf32> to vector<8x1xf32>
    %178 = vector.shape_cast %151 : vector<8x1xf32> to vector<1x8x1xf32>
    tpu.vector_store %arg11[%c3_105, %c0_106, %c0_107], %178 {strides = array<i32>} : memref<4x8x1xf32, #tpu.memory_space<vmem>>, vector<1x8x1xf32>,
    %c0_i32_108 = arith.constant 0 : i32
    %179 = arith.cmpi eq, %arg2, %c0_i32_108 : i32
    %180 = arith.extui %179 : i1 to i32
    %c0_i32_109 = arith.constant 0 : i32
    %181 = arith.cmpi ne, %180, %c0_i32_109 : i32
    scf.if %181 {
      %c0_110 = arith.constant 0 : index
      %c0_111 = arith.constant 0 : index
      %c0_112 = arith.constant 0 : index
      %182 = vector.load %arg9[%c0_110, %c0_111, %c0_112] : memref<1x8x32xf32, #tpu.memory_space<vmem>>, vector<1x8x32xf32>
      %183 = vector.shape_cast %182 : vector<1x8x32xf32> to vector<8x32xf32>
      %c0_113 = arith.constant 0 : index
      %c0_114 = arith.constant 0 : index
      %184 = vector.load %arg8[%c0_113, %c0_114] : memref<1x32xf32, #tpu.memory_space<vmem>>, vector<1x32xf32>
      %185 = vector.broadcast %184 : vector<1x32xf32> to vector<8x32xf32>
      %186 = arith.addf %183, %185 : vector<8x32xf32>
      %c0_115 = arith.constant 0 : index
      %c0_116 = arith.constant 0 : index
      %c0_117 = arith.constant 0 : index
      %187 = vector.load %arg12[%c0_115, %c0_116, %c0_117] : memref<4x8x1xf32, #tpu.memory_space<vmem>>, vector<1x8x1xf32>
      %188 = vector.shape_cast %187 : vector<1x8x1xf32> to vector<8x1xf32>
      %189 = tpu.reciprocal %188 : vector<8x1xf32> -> vector<8x1xf32>
      %c0_118 = arith.constant 0 : index
      %c0_119 = arith.constant 0 : index
      %c0_120 = arith.constant 0 : index
      %190 = vector.load %arg13[%c0_118, %c0_119, %c0_120] : memref<4x8x8xf32, #tpu.memory_space<vmem>>, vector<1x8x8xf32>
      %191 = vector.shape_cast %190 : vector<1x8x8xf32> to vector<8x8xf32>
      %192 = vector.broadcast %189 : vector<8x1xf32> to vector<8x8xf32>
      %193 = arith.mulf %191, %192 : vector<8x8xf32>
      %194 = arith.truncf %193 : vector<8x8xf32> to vector<8x8xbf16>
      %c0_121 = arith.constant 0 : index
      %c0_122 = arith.constant 0 : index
      %195 = vector.load %arg7[%c0_121, %c0_122] : memref<32x32xbf16, #tpu.memory_space<vmem>>, vector<8x32xbf16>
      %cst_123 = arith.constant dense<0.000000e+00> : vector<8x32xf32>
      %196 = tpu.matmul %194, %195, %cst_123 {dimension_numbers = #tpu.dot_dimension_numbers<[1], [0], [0], [1], [0, 0, 1, 1], [], []>} : vector<8x8xbf16>, vector<8x32xbf16>, vector<8x32xf32> -> vector<8x32xf32>
      %197 = arith.addf %186, %196 : vector<8x32xf32>
      %c1_124 = arith.constant 1 : index
      %c0_125 = arith.constant 0 : index
      %c0_126 = arith.constant 0 : index
      %198 = vector.load %arg12[%c1_124, %c0_125, %c0_126] : memref<4x8x1xf32, #tpu.memory_space<vmem>>, vector<1x8x1xf32>
      %199 = vector.shape_cast %198 : vector<1x8x1xf32> to vector<8x1xf32>
      %200 = tpu.reciprocal %199 : vector<8x1xf32> -> vector<8x1xf32>
      %c1_127 = arith.constant 1 : index
      %c0_128 = arith.constant 0 : index
      %c0_129 = arith.constant 0 : index
      %201 = vector.load %arg13[%c1_127, %c0_128, %c0_129] : memref<4x8x8xf32, #tpu.memory_space<vmem>>, vector<1x8x8xf32>
      %202 = vector.shape_cast %201 : vector<1x8x8xf32> to vector<8x8xf32>
      %203 = vector.broadcast %200 : vector<8x1xf32> to vector<8x8xf32>
      %204 = arith.mulf %202, %203 : vector<8x8xf32>
      %205 = arith.truncf %204 : vector<8x8xf32> to vector<8x8xbf16>
      %c8 = arith.constant 8 : index
      %c0_130 = arith.constant 0 : index
      %206 = vector.load %arg7[%c8, %c0_130] : memref<32x32xbf16, #tpu.memory_space<vmem>>, vector<8x32xbf16>
      %cst_131 = arith.constant dense<0.000000e+00> : vector<8x32xf32>
      %207 = tpu.matmul %205, %206, %cst_131 {dimension_numbers = #tpu.dot_dimension_numbers<[1], [0], [0], [1], [0, 0, 1, 1], [], []>} : vector<8x8xbf16>, vector<8x32xbf16>, vector<8x32xf32> -> vector<8x32xf32>
      %208 = arith.addf %197, %207 : vector<8x32xf32>
      %c2_132 = arith.constant 2 : index
      %c0_133 = arith.constant 0 : index
      %c0_134 = arith.constant 0 : index
      %209 = vector.load %arg12[%c2_132, %c0_133, %c0_134] : memref<4x8x1xf32, #tpu.memory_space<vmem>>, vector<1x8x1xf32>
      %210 = vector.shape_cast %209 : vector<1x8x1xf32> to vector<8x1xf32>
      %211 = tpu.reciprocal %210 : vector<8x1xf32> -> vector<8x1xf32>
      %c2_135 = arith.constant 2 : index
      %c0_136 = arith.constant 0 : index
      %c0_137 = arith.constant 0 : index
      %212 = vector.load %arg13[%c2_135, %c0_136, %c0_137] : memref<4x8x8xf32, #tpu.memory_space<vmem>>, vector<1x8x8xf32>
      %213 = vector.shape_cast %212 : vector<1x8x8xf32> to vector<8x8xf32>
      %214 = vector.broadcast %211 : vector<8x1xf32> to vector<8x8xf32>
      %215 = arith.mulf %213, %214 : vector<8x8xf32>
      %216 = arith.truncf %215 : vector<8x8xf32> to vector<8x8xbf16>
      %c16 = arith.constant 16 : index
      %c0_138 = arith.constant 0 : index
      %217 = vector.load %arg7[%c16, %c0_138] : memref<32x32xbf16, #tpu.memory_space<vmem>>, vector<8x32xbf16>
      %cst_139 = arith.constant dense<0.000000e+00> : vector<8x32xf32>
      %218 = tpu.matmul %216, %217, %cst_139 {dimension_numbers = #tpu.dot_dimension_numbers<[1], [0], [0], [1], [0, 0, 1, 1], [], []>} : vector<8x8xbf16>, vector<8x32xbf16>, vector<8x32xf32> -> vector<8x32xf32>
      %219 = arith.addf %208, %218 : vector<8x32xf32>
      %c3_140 = arith.constant 3 : index
      %c0_141 = arith.constant 0 : index
      %c0_142 = arith.constant 0 : index
      %220 = vector.load %arg12[%c3_140, %c0_141, %c0_142] : memref<4x8x1xf32, #tpu.memory_space<vmem>>, vector<1x8x1xf32>
      %221 = vector.shape_cast %220 : vector<1x8x1xf32> to vector<8x1xf32>
      %222 = tpu.reciprocal %221 : vector<8x1xf32> -> vector<8x1xf32>
      %c3_143 = arith.constant 3 : index
      %c0_144 = arith.constant 0 : index
      %c0_145 = arith.constant 0 : index
      %223 = vector.load %arg13[%c3_143, %c0_144, %c0_145] : memref<4x8x8xf32, #tpu.memory_space<vmem>>, vector<1x8x8xf32>
      %224 = vector.shape_cast %223 : vector<1x8x8xf32> to vector<8x8xf32>
      %225 = vector.broadcast %222 : vector<8x1xf32> to vector<8x8xf32>
      %226 = arith.mulf %224, %225 : vector<8x8xf32>
      %227 = arith.truncf %226 : vector<8x8xf32> to vector<8x8xbf16>
      %c24 = arith.constant 24 : index
      %c0_146 = arith.constant 0 : index
      %228 = vector.load %arg7[%c24, %c0_146] : memref<32x32xbf16, #tpu.memory_space<vmem>>, vector<8x32xbf16>
      %cst_147 = arith.constant dense<0.000000e+00> : vector<8x32xf32>
      %229 = tpu.matmul %227, %228, %cst_147 {dimension_numbers = #tpu.dot_dimension_numbers<[1], [0], [0], [1], [0, 0, 1, 1], [], []>} : vector<8x8xbf16>, vector<8x32xbf16>, vector<8x32xf32> -> vector<8x32xf32>
      %230 = arith.addf %219, %229 : vector<8x32xf32>
      %c0_148 = arith.constant 0 : index
      %c0_149 = arith.constant 0 : index
      %c0_150 = arith.constant 0 : index
      %231 = vector.load %arg10[%c0_148, %c0_149, %c0_150] : memref<1x8x32xf32, #tpu.memory_space<vmem>>, vector<1x8x32xf32>
      %232 = vector.shape_cast %231 : vector<1x8x32xf32> to vector<8x32xf32>
      %233 = vector.shape_cast %230 : vector<8x32xf32> to vector<1x8x32xf32>
      tpu.vector_store %arg10[%c0_148, %c0_149, %c0_150], %233 {strides = array<i32>} : memref<1x8x32xf32, #tpu.memory_space<vmem>>, vector<1x8x32xf32>,
    } else {
    }
    return
  }
  func.func @transform_0(%arg0: i32, %arg1: i32, %arg2: i32) -> (i32, i32, i32) {
    %c0_i32 = arith.constant 0 : i32
    %c0_i32_0 = arith.constant 0 : i32
    return %arg0, %arg1, %c0_i32 : i32, i32, i32
  }
  func.func @transform_1(%arg0: i32, %arg1: i32, %arg2: i32) -> (i32, i32, i32) {
    %c0_i32 = arith.constant 0 : i32
    %c0_i32_0 = arith.constant 0 : i32
    return %arg0, %arg2, %c0_i32 : i32, i32, i32
  }
  func.func @transform_2(%arg0: i32, %arg1: i32, %arg2: i32) -> (i32, i32, i32) {
    %c0_i32 = arith.constant 0 : i32
    %c0_i32_0 = arith.constant 0 : i32
    return %arg0, %arg2, %c0_i32 : i32, i32, i32
  }
  func.func @transform_3(%arg0: i32, %arg1: i32, %arg2: i32) -> (i32, i32, i32) {
    %c0_i32 = arith.constant 0 : i32
    return %arg0, %arg1, %arg2 : i32, i32, i32
  }
  func.func @transform_4(%arg0: i32, %arg1: i32, %arg2: i32) -> (i32, i32) {
    %c0_i32 = arith.constant 0 : i32
    %c0_i32_0 = arith.constant 0 : i32
    %c0_i32_1 = arith.constant 0 : i32
    return %c0_i32, %c0_i32_0 : i32, i32
  }
  func.func @transform_5(%arg0: i32, %arg1: i32, %arg2: i32) -> (i32, i32) {
    %c0_i32 = arith.constant 0 : i32
    %c0_i32_0 = arith.constant 0 : i32
    %c0_i32_1 = arith.constant 0 : i32
    return %c0_i32, %c0_i32_0 : i32, i32
  }
  func.func @transform_6(%arg0: i32, %arg1: i32, %arg2: i32) -> (i32, i32, i32) {
    %c0_i32 = arith.constant 0 : i32
    %c0_i32_0 = arith.constant 0 : i32
    return %arg0, %arg1, %c0_i32 : i32, i32, i32
  }
  func.func @transform_7(%arg0: i32, %arg1: i32, %arg2: i32) -> (i32, i32, i32) {
    %c0_i32 = arith.constant 0 : i32
    %c0_i32_0 = arith.constant 0 : i32
    return %arg0, %arg1, %c0_i32 : i32, i32, i32
  }
}

module attributes {stable_mosaic.version = 11 : i64} {
  func.func @kernel(%arg0: i32, %arg1: memref<16x32xf32, #tpu.memory_space<vmem>>, %arg2: memref<1x32xf32, #tpu.memory_space<vmem>>, %arg3: memref<1x32xf32, #tpu.memory_space<vmem>>, %arg4: memref<32x64xbf16, #tpu.memory_space<vmem>>, %arg5: memref<1x64xf32, #tpu.memory_space<vmem>>, %arg6: memref<64x32xbf16, #tpu.memory_space<vmem>>, %arg7: memref<1x32xf32, #tpu.memory_space<vmem>>, %arg8: memref<1x32xf32, #tpu.memory_space<vmem>>, %arg9: memref<1x32xf32, #tpu.memory_space<vmem>>, %arg10: memref<16x32xf32, #tpu.memory_space<vmem>>) attributes {dimension_semantics = [#tpu.dimension_semantics<parallel>], iteration_bounds = array<i64: 1>, scalar_prefetch = 0 : i64, scratch_operands = 0 : i64, tpu.core_type = #tpu.core_type<tc>, window_params = [{transform_indices = @transform_0, window_bounds = array<i64: 16, 32>}, {pipeline_mode = #tpu.pipeline_mode<synchronous>, transform_indices = @transform_1, window_bounds = array<i64: 1, 32>}, {pipeline_mode = #tpu.pipeline_mode<synchronous>, transform_indices = @transform_2, window_bounds = array<i64: 1, 32>}, {pipeline_mode = #tpu.pipeline_mode<synchronous>, transform_indices = @transform_3, window_bounds = array<i64: 32, 64>}, {pipeline_mode = #tpu.pipeline_mode<synchronous>, transform_indices = @transform_4, window_bounds = array<i64: 1, 64>}, {pipeline_mode = #tpu.pipeline_mode<synchronous>, transform_indices = @transform_5, window_bounds = array<i64: 64, 32>}, {pipeline_mode = #tpu.pipeline_mode<synchronous>, transform_indices = @transform_6, window_bounds = array<i64: 1, 32>}, {pipeline_mode = #tpu.pipeline_mode<synchronous>, transform_indices = @transform_7, window_bounds = array<i64: 1, 32>}, {pipeline_mode = #tpu.pipeline_mode<synchronous>, transform_indices = @transform_8, window_bounds = array<i64: 1, 32>}, {transform_indices = @transform_9, window_bounds = array<i64: 16, 32>}]} {
    %c0 = arith.constant 0 : index
    %c0_0 = arith.constant 0 : index
    %0 = vector.load %arg1[%c0, %c0_0] : memref<16x32xf32, #tpu.memory_space<vmem>>, vector<16x32xf32>
    %c0_1 = arith.constant 0 : index
    %c0_2 = arith.constant 0 : index
    %1 = vector.load %arg2[%c0_1, %c0_2] : memref<1x32xf32, #tpu.memory_space<vmem>>, vector<1x32xf32>
    %c0_3 = arith.constant 0 : index
    %c0_4 = arith.constant 0 : index
    %2 = vector.load %arg3[%c0_3, %c0_4] : memref<1x32xf32, #tpu.memory_space<vmem>>, vector<1x32xf32>
    %cst = arith.constant dense<0.000000e+00> : vector<16xf32>
    %3 = vector.multi_reduction <add>, %0, %cst [1] : vector<16x32xf32> to vector<16xf32>
    %4 = vector.shape_cast %3 : vector<16xf32> to vector<16x1xf32>
    %cst_5 = arith.constant 3.200000e+01 : f32
    %5 = vector.broadcast %cst_5 : f32 to vector<16x1xf32>
    %6 = arith.divf %4, %5 : vector<16x1xf32>
    %7 = vector.broadcast %6 : vector<16x1xf32> to vector<16x32xf32>
    %8 = arith.subf %0, %7 : vector<16x32xf32>
    %9 = arith.mulf %8, %8 : vector<16x32xf32>
    %cst_6 = arith.constant dense<0.000000e+00> : vector<16xf32>
    %10 = vector.multi_reduction <add>, %9, %cst_6 [1] : vector<16x32xf32> to vector<16xf32>
    %11 = vector.shape_cast %10 : vector<16xf32> to vector<16x1xf32>
    %cst_7 = arith.constant 0.0322580636 : f32
    %12 = vector.broadcast %cst_7 : f32 to vector<16x1xf32>
    %13 = arith.mulf %11, %12 : vector<16x1xf32>
    %14 = math.sqrt %13 : vector<16x1xf32>
    %cst_8 = arith.constant 9.99999997E-7 : f32
    %15 = vector.broadcast %cst_8 : f32 to vector<16x1xf32>
    %16 = arith.addf %14, %15 : vector<16x1xf32>
    %17 = vector.broadcast %16 : vector<16x1xf32> to vector<16x32xf32>
    %18 = arith.divf %8, %17 : vector<16x32xf32>
    %19 = vector.broadcast %1 : vector<1x32xf32> to vector<16x32xf32>
    %20 = arith.mulf %19, %18 : vector<16x32xf32>
    %21 = vector.broadcast %2 : vector<1x32xf32> to vector<16x32xf32>
    %22 = arith.addf %20, %21 : vector<16x32xf32>
    %23 = arith.truncf %22 : vector<16x32xf32> to vector<16x32xbf16>
    %c0_9 = arith.constant 0 : index
    %c0_10 = arith.constant 0 : index
    %24 = vector.load %arg7[%c0_9, %c0_10] : memref<1x32xf32, #tpu.memory_space<vmem>>, vector<1x32xf32>
    %25 = vector.broadcast %24 : vector<1x32xf32> to vector<16x32xf32>
    %26 = arith.addf %0, %25 : vector<16x32xf32>
    %c0_11 = arith.constant 0 : index
    %c0_12 = arith.constant 0 : index
    %27 = vector.load %arg4[%c0_11, %c0_12] : memref<32x64xbf16, #tpu.memory_space<vmem>>, vector<32x64xbf16>
    %cst_13 = arith.constant dense<0.000000e+00> : vector<16x64xf32>
    %28 = tpu.matmul %23, %27, %cst_13 {dimension_numbers = #tpu.dot_dimension_numbers<[1], [0], [0], [1], [0, 0, 1, 1], [], []>} : vector<16x32xbf16>, vector<32x64xbf16>, vector<16x64xf32> -> vector<16x64xf32>
    %c0_14 = arith.constant 0 : index
    %c0_15 = arith.constant 0 : index
    %29 = vector.load %arg5[%c0_14, %c0_15] : memref<1x64xf32, #tpu.memory_space<vmem>>, vector<1x64xf32>
    %30 = vector.broadcast %29 : vector<1x64xf32> to vector<16x64xf32>
    %31 = arith.addf %28, %30 : vector<16x64xf32>
    %cst_16 = arith.constant 0.000000e+00 : f32
    %32 = vector.broadcast %cst_16 : f32 to vector<16x64xf32>
    %33 = arith.maximumf %31, %32 : vector<16x64xf32>
    %34 = arith.truncf %33 : vector<16x64xf32> to vector<16x64xbf16>
    %c0_17 = arith.constant 0 : index
    %c0_18 = arith.constant 0 : index
    %35 = vector.load %arg6[%c0_17, %c0_18] : memref<64x32xbf16, #tpu.memory_space<vmem>>, vector<64x32xbf16>
    %cst_19 = arith.constant dense<0.000000e+00> : vector<16x32xf32>
    %36 = tpu.matmul %34, %35, %cst_19 {dimension_numbers = #tpu.dot_dimension_numbers<[1], [0], [0], [1], [0, 0, 1, 1], [], []>} : vector<16x64xbf16>, vector<64x32xbf16>, vector<16x32xf32> -> vector<16x32xf32>
    %37 = arith.addf %26, %36 : vector<16x32xf32>
    %c0_20 = arith.constant 0 : index
    %c0_21 = arith.constant 0 : index
    %38 = vector.load %arg8[%c0_20, %c0_21] : memref<1x32xf32, #tpu.memory_space<vmem>>, vector<1x32xf32>
    %c0_22 = arith.constant 0 : index
    %c0_23 = arith.constant 0 : index
    %39 = vector.load %arg9[%c0_22, %c0_23] : memref<1x32xf32, #tpu.memory_space<vmem>>, vector<1x32xf32>
    %cst_24 = arith.constant dense<0.000000e+00> : vector<16xf32>
    %40 = vector.multi_reduction <add>, %37, %cst_24 [1] : vector<16x32xf32> to vector<16xf32>
    %41 = vector.shape_cast %40 : vector<16xf32> to vector<16x1xf32>
    %cst_25 = arith.constant 3.200000e+01 : f32
    %42 = vector.broadcast %cst_25 : f32 to vector<16x1xf32>
    %43 = arith.divf %41, %42 : vector<16x1xf32>
    %44 = vector.broadcast %43 : vector<16x1xf32> to vector<16x32xf32>
    %45 = arith.subf %37, %44 : vector<16x32xf32>
    %46 = arith.mulf %45, %45 : vector<16x32xf32>
    %cst_26 = arith.constant dense<0.000000e+00> : vector<16xf32>
    %47 = vector.multi_reduction <add>, %46, %cst_26 [1] : vector<16x32xf32> to vector<16xf32>
    %48 = vector.shape_cast %47 : vector<16xf32> to vector<16x1xf32>
    %cst_27 = arith.constant 0.0322580636 : f32
    %49 = vector.broadcast %cst_27 : f32 to vector<16x1xf32>
    %50 = arith.mulf %48, %49 : vector<16x1xf32>
    %51 = math.sqrt %50 : vector<16x1xf32>
    %cst_28 = arith.constant 9.99999997E-7 : f32
    %52 = vector.broadcast %cst_28 : f32 to vector<16x1xf32>
    %53 = arith.addf %51, %52 : vector<16x1xf32>
    %54 = vector.broadcast %53 : vector<16x1xf32> to vector<16x32xf32>
    %55 = arith.divf %45, %54 : vector<16x32xf32>
    %56 = vector.broadcast %38 : vector<1x32xf32> to vector<16x32xf32>
    %57 = arith.mulf %56, %55 : vector<16x32xf32>
    %58 = vector.broadcast %39 : vector<1x32xf32> to vector<16x32xf32>
    %59 = arith.addf %57, %58 : vector<16x32xf32>
    %c0_29 = arith.constant 0 : index
    %c0_30 = arith.constant 0 : index
    %60 = vector.load %arg10[%c0_29, %c0_30] : memref<16x32xf32, #tpu.memory_space<vmem>>, vector<16x32xf32>
    tpu.vector_store %arg10[%c0_29, %c0_30], %59 {strides = array<i32>} : memref<16x32xf32, #tpu.memory_space<vmem>>, vector<16x32xf32>,
    return
  }
  func.func @transform_0(%arg0: i32) -> (i32, i32) {
    %c0_i32 = arith.constant 0 : i32
    %c0_i32_0 = arith.constant 0 : i32
    return %arg0, %c0_i32 : i32, i32
  }
  func.func @transform_1(%arg0: i32) -> (i32, i32) {
    %c0_i32 = arith.constant 0 : i32
    %c0_i32_0 = arith.constant 0 : i32
    %c0_i32_1 = arith.constant 0 : i32
    return %c0_i32, %c0_i32_0 : i32, i32
  }
  func.func @transform_2(%arg0: i32) -> (i32, i32) {
    %c0_i32 = arith.constant 0 : i32
    %c0_i32_0 = arith.constant 0 : i32
    %c0_i32_1 = arith.constant 0 : i32
    return %c0_i32, %c0_i32_0 : i32, i32
  }
  func.func @transform_3(%arg0: i32) -> (i32, i32) {
    %c0_i32 = arith.constant 0 : i32
    %c0_i32_0 = arith.constant 0 : i32
    %c0_i32_1 = arith.constant 0 : i32
    return %c0_i32, %c0_i32_0 : i32, i32
  }
  func.func @transform_4(%arg0: i32) -> (i32, i32) {
    %c0_i32 = arith.constant 0 : i32
    %c0_i32_0 = arith.constant 0 : i32
    %c0_i32_1 = arith.constant 0 : i32
    return %c0_i32, %c0_i32_0 : i32, i32
  }
  func.func @transform_5(%arg0: i32) -> (i32, i32) {
    %c0_i32 = arith.constant 0 : i32
    %c0_i32_0 = arith.constant 0 : i32
    %c0_i32_1 = arith.constant 0 : i32
    return %c0_i32, %c0_i32_0 : i32, i32
  }
  func.func @transform_6(%arg0: i32) -> (i32, i32) {
    %c0_i32 = arith.constant 0 : i32
    %c0_i32_0 = arith.constant 0 : i32
    %c0_i32_1 = arith.constant 0 : i32
    return %c0_i32, %c0_i32_0 : i32, i32
  }
  func.func @transform_7(%arg0: i32) -> (i32, i32) {
    %c0_i32 = arith.constant 0 : i32
    %c0_i32_0 = arith.constant 0 : i32
    %c0_i32_1 = arith.constant 0 : i32
    return %c0_i32, %c0_i32_0 : i32, i32
  }
  func.func @transform_8(%arg0: i32) -> (i32, i32) {
    %c0_i32 = arith.constant 0 : i32
    %c0_i32_0 = arith.constant 0 : i32
    %c0_i32_1 = arith.constant 0 : i32
    return %c0_i32, %c0_i32_0 : i32, i32
  }
  func.func @transform_9(%arg0: i32) -> (i32, i32) {
    %c0_i32 = arith.constant 0 : i32
    %c0_i32_0 = arith.constant 0 : i32
    return %arg0, %c0_i32 : i32, i32
  }
}

</mosaic_0001>

<bundles_post_ra>
// kernel: encoder_forward.6
= control target key start
LH: loop header
LB: loop body
LE: loop exit
PB: predicated region body
PF: predicated region fallthrough
CT: control target
= control target key end

     0   :  { %17 = vsyncpa [#allocation3], 0  ;;  %s708_s0 = inlined_call_operand.vmem [shape: f32[16,32], index: 0, kind: input, shape index: {}]   ;;  %s709_s1 = inlined_call_operand.hbm [shape: f32[1,32], index: 1, kind: input, shape index: {}]   ;;  %s710_s2 = inlined_call_operand.hbm [shape: f32[1,32], index: 2, kind: input, shape index: {}]   ;;  %s711_s3 = inlined_call_operand.vmem [shape: bf16[32,32], index: 3, kind: input, shape index: {}]   ;;  %s712_s4 = inlined_call_operand.hbm [shape: f32[1,32], index: 4, kind: input, shape index: {}]   ;;  %s713_s5 = inlined_call_operand.hbm [shape: bf16[32,32], index: 5, kind: input, shape index: {}]   ;;  %s714_s6 = inlined_call_operand.hbm [shape: f32[1,32], index: 6, kind: input, shape index: {}]   ;;  %s715_s7 = inlined_call_operand.vmem [shape: bf16[32,32], index: 7, kind: input, shape index: {}]   ;;  %s716_s8 = inlined_call_operand.hbm [shape: f32[1,32], index: 8, kind: input, shape index: {}]   ;;  %s717_s9 = inlined_call_operand.vmem [shape: bf16[16,32], index: 9, kind: output, shape index: {0}]   ;;  %s718_s10 = inlined_call_operand.vmem [shape: bf16[16,32], index: 10, kind: output, shape index: {1}]   ;;  %s719_s11 = inlined_call_operand.vmem [shape: bf16[16,32], index: 11, kind: output, shape index: {2}]  }
   0x1   :  { %18 = vsyncpa [#allocation5], 0 }
   0x2   :  { %19 = vsyncpa [#allocation8], 0  ;;  %s39_s19 = sshll.u32 %s710_s2, 4  ;;  %s40_s19 = int_to_ptr.hbm [resolvable:$true] %s39_s19 }
   0x3   :  { %20 = vsyncpa [#allocation11], 0  ;;  %s562_s20 = smov [#allocation4]   ;;  %s62_s24 = sshll.u32 %s713_s5, 4  ;;  %s63_s24 = int_to_ptr.hbm [resolvable:$true] %s62_s24 }
   0x4   :  { %s41_s21 = sshll.u32 %s562_s20, 4  ;;  %s563_s25 = smov [#allocation7]   ;;  %s42_s21 = int_to_ptr.vmem [resolvable:$true] %s41_s21 }
   0x5   :  { %44 = dma.hbm_to_vmem [thread:$0]  %s40_s19, 16, %s42_s21, [#allocation5]  }
   0x6   :  { %s64_s26 = sshll.u32 %s563_s25, 4  ;;  %s564_s27 = smov 64   ;;  %s65_s26 = int_to_ptr.vmem [resolvable:$true] %s64_s26 }
   0x7   :  { %s565_s28 = smov 4   ;;  %s28_s2 = sshll.u32 %s709_s1, 4  ;;  %s29_s2 = int_to_ptr.hbm [resolvable:$true] %s28_s2 }
   0x8   :  { %70 = dma.hbm_to_vmem [thread:$0]  %s63_s24, 256, %s65_s26, [#allocation8], %s564_s27, %s564_s27, %s565_s28  }
   0x9   :  { %s566_s12 = smov [#allocation2]   ;;  %s52_s5 = sshll.u32 %s712_s4, 4  ;;  %s53_s5 = int_to_ptr.hbm [resolvable:$true] %s52_s5 }
   0xa   :  { %s30_s13 = sshll.u32 %s566_s12, 4  ;;  %s567_s16 = smov [#allocation6]   ;;  %s31_s13 = int_to_ptr.vmem [resolvable:$true] %s30_s13 }
   0xb   :  { %33 = dma.hbm_to_vmem [thread:$0]  %s29_s2, 16, %s31_s13, [#allocation3]  }
   0xc   :  { %s54_s17 = sshll.u32 %s567_s16, 4  ;;  %s76_s20 = sshll.u32 %s714_s6, 4  ;;  %s55_s17 = int_to_ptr.vmem [resolvable:$true] %s54_s17  ;;  %s77_s20 = int_to_ptr.hbm [resolvable:$true] %s76_s20 }
   0xd   :  { %57 = dma.hbm_to_vmem [thread:$0]  %s53_s5, 16, %s55_s17, [#allocation5]  }
   0xe   :  { %s89_s22 = sshll.u32 %s716_s8, 4  ;;  %s568_s23 = smov [#allocation9]   ;;  %s90_s22 = int_to_ptr.hbm [resolvable:$true] %s89_s22 }
   0xf   :  { %s78_s24 = sshll.u32 %s568_s23, 4  ;;  %s569_s4 = smov [#allocation10]   ;;  %s79_s24 = int_to_ptr.vmem [resolvable:$true] %s78_s24 }
  0x10   :  { %81 = dma.hbm_to_vmem [thread:$0]  %s77_s20, 16, %s79_s24, [#allocation8]  }
  0x11   :  { %s91_s25 = sshll.u32 %s569_s4, 4  ;;  %s92_s25 = int_to_ptr.vmem [resolvable:$true] %s91_s25 }
  0x12   :  { %94 = dma.hbm_to_vmem [thread:$0]  %s90_s22, 16, %s92_s25, [#allocation11]  }
  0x13   :  { %554 = dma.done.wait [#allocation3], 16  }
  0x14   :  { %555 = vsyncadd [#allocation3], 4294967280 }
  0x15   :  { %556 = dma.done.wait [#allocation5], 32  }
  0x16   :  { %557 = vsyncadd [#allocation5], 4294967264 }
  0x17   :  { %558 = dma.done.wait [#allocation8], 272  }
  0x18   :  { %559 = vsyncadd [#allocation8], 4294967024 }
  0x19   :  { %560 = dma.done.wait [#allocation11], 16  }
  0x1a   :  { %561 = vsyncadd [#allocation11], 4294967280  ;;  %vm124_vm0 = vcmask 261120   ;;  %v120_v0 = vld [vmem:[%s708_s0] sm:$0xff]  ;;  %v121_v2 = vld [vmem:[%s708_s0 + $0x8] sm:$0xff]  ;;  %v570_v4 = vmov 32.0  }
  0x1b   :  { %v125_v1 = vsel %vm124_vm0, %v120_v0, 0.0  ;;  %v128_v3 = vsel %vm124_vm0, %v121_v2, 0.0  ;;  %400 = vrcp.f32 %v570_v4  ;;  %v381_v21 = vld [vmem:[%s711_s3 + $0x8] sm:$0xff]  ;;  %v380_v25 = vld [vmem:[%s711_s3] sm:$0xff]  ;;  %vm258_vm14 = vcmask 257024  }
  0x1c   :  { %126 = vadd.xlane.f32.xlu0 %v125_v1  ;;  %v383_v22 = vld [vmem:[#allocation7 + $0x8] sm:$0xff]  ;;  %248 = vmatpush.bf16.msra.mxu0 %v381_v21  ;;  %v382_v26 = vld [vmem:[#allocation7] sm:$0xff] }
  0x1d   :  { %v385_v23 = vld [vmem:[%s715_s7 + $0x8] sm:$0xff]  ;;  %287 = vmatpush.bf16.msra.mxu1 %v383_v22  ;;  %v384_v28 = vld [vmem:[%s715_s7] sm:$0xff] }
  0x1e   :  { %325 = vmatpush.bf16.msra.mxu2 %v385_v23 }
  0x20   :  { %249 = vmatpush.bf16.msra.mxu0 %v380_v25 }
  0x21   :  { %v401_v5 = vpop.eup %400  ;;  %288 = vmatpush.bf16.msra.mxu1 %v382_v26  ;;  %v399_v26 = vld [vmem:[#allocation10] ss:$0 sm:$0xff] }
  0x22   :  { %v132_v6 = vmul.f32 32.0, %v401_v5  ;;  %vm136_vm1 = vweird.f32 %v401_v5  ;;  %326 = vmatpush.bf16.msra.mxu2 %v384_v28 }
  0x24   :  { %129 = vadd.xlane.f32.xlu0 %v128_v3  ;;  %v133_v7 = vsub.f32 1.0, %v132_v6 }
  0x26   :  { %v134_v8 = vmul.f32 %v401_v5, %v133_v7  ;;  %v395_v7 = vld [vmem:[#allocation2] ss:$0 sm:$0xff] }
  0x28   :  { %v135_v9 = vadd.f32 %v401_v5, %v134_v8 }
  0x2a   :  { %v137_v10 = vsel %vm136_vm1, %v401_v5, %v135_v9 }
  0x8f   :  { %v127_v11 = vpop.xlane.xlu0 %126 }
  0x90   :  { %v138_v12 = vmul.f32 %v137_v10, %v127_v11 }
  0x92   :  { %v657_v13 = vsub.f32 %v120_v0, %v138_v12 }
  0x94   :  { %v142_v14 = vmul.f32 %v657_v13, %v657_v13 }
  0x96   :  { %v144_v15 = vsel %vm124_vm0, %v142_v14, 0.0  ;;  %v396_v14 = vld [vmem:[#allocation4] ss:$0 sm:$0xff] }
  0x97   :  { %145 = vadd.xlane.f32.xlu1 %v144_v15  ;;  %v130_v16 = vpop.xlane.xlu0 %129 }
  0x98   :  { %v139_v17 = vmul.f32 %v137_v10, %v130_v16 }
  0x9a   :  { %v662_v18 = vsub.f32 %v121_v2, %v139_v17 }
  0x9c   :  { %v143_v19 = vmul.f32 %v662_v18, %v662_v18 }
  0x9e   :  { %v147_v20 = vsel %vm124_vm0, %v143_v19, 0.0 }
  0x9f   :  { %148 = vadd.xlane.f32.xlu1 %v147_v20  ;;  %v398_v20 = vld [vmem:[#allocation9] ss:$0 sm:$0xff] }
 0x10a   :  { %v146_v24 = vpop.xlane.xlu1 %145 }
 0x10b   :  { %v150_v27 = vmul.f32 0.032258064, %v146_v24 }
 0x10d   :  { %402 = vrsqrt.f32 %v150_v27  ;;  %vm159_vm2 = vcmp.eq.f32.partialorder %v150_v27, inf  ;;  %v162_v41 = vand.u32 2147483648, %v150_v27  ;;  %vm161_vm3 = vcmp.eq.f32.partialorder %v150_v27, 0.0 }
 0x112   :  { %v149_v29 = vpop.xlane.xlu1 %148 }
 0x113   :  { %v403_v30 = vpop.eup %402  ;;  %v151_v31 = vmul.f32 0.032258064, %v149_v29 }
 0x114   :  { %v153_v32 = vmul.f32 %v403_v30, %v150_v27 }
 0x115   :  { %404 = vrsqrt.f32 %v151_v31  ;;  %vm171_vm4 = vcmp.eq.f32.partialorder %v151_v31, inf  ;;  %v174_v49 = vand.u32 2147483648, %v151_v31  ;;  %vm173_vm5 = vcmp.eq.f32.partialorder %v151_v31, 0.0 }
 0x116   :  { %v154_v33 = vmul.f32 %v403_v30, %v153_v32 }
 0x118   :  { %v155_v34 = vmul.f32 0.5, %v154_v33 }
 0x11a   :  { %v156_v35 = vsub.f32 1.5, %v155_v34 }
 0x11b   :  { %v405_v36 = vpop.eup %404 }
 0x11c   :  { %v157_v37 = vmul.f32 %v403_v30, %v156_v35  ;;  %v165_v38 = vmul.f32 %v405_v36, %v151_v31 }
 0x11e   :  { %v158_v39 = vmul.f32 %v157_v37, %v150_v27  ;;  %v166_v40 = vmul.f32 %v405_v36, %v165_v38 }
 0x120   :  { %v160_v42 = vsel %vm159_vm2, %v150_v27, %v158_v39  ;;  %v167_v43 = vmul.f32 0.5, %v166_v40 }
 0x121   :  { %v163_v44 = vsel %vm161_vm3, %v162_v41, %v160_v42 }
 0x122   :  { %v168_v45 = vsub.f32 1.5, %v167_v43  ;;  %v176_v46 = vadd.f32 1e-06, %v163_v44 }
 0x124   :  { %v169_v47 = vmul.f32 %v405_v36, %v168_v45  ;;  %406 = vrcp.f32 %v176_v46  ;;  %v189_v57 = vand.u32 2147483648, %v176_v46  ;;  %vm183_vm7 = vweird.f32 %v176_v46 }
 0x125   :  { %v187_v59 = vand.u32 2147483647, %v176_v46 }
 0x126   :  { %v170_v48 = vmul.f32 %v169_v47, %v151_v31  ;;  %v190_v63 = vor.u32 1.1754944e-38, %v189_v57 }
 0x127   :  { %vm188_vm9 = vcmp.eq.f32.partialorder %v187_v59, 8.507059e+37 }
 0x128   :  { %v172_v50 = vsel %vm171_vm4, %v151_v31, %v170_v48 }
 0x129   :  { %v175_v51 = vsel %vm173_vm5, %v174_v49, %v172_v50 }
 0x12a   :  { %v407_v52 = vpop.eup %406  ;;  %v177_v53 = vadd.f32 1e-06, %v175_v51 }
 0x12b   :  { %v179_v54 = vmul.f32 %v407_v52, %v176_v46  ;;  %vm184_vm6 = vweird.f32 %v407_v52 }
 0x12c   :  { %408 = vrcp.f32 %v177_v53  ;;  %vm185_vm8 = vmor %vm183_vm7, %vm184_vm6  ;;  %v204_v2 = vand.u32 2147483648, %v177_v53  ;;  %v202_v4 = vand.u32 2147483647, %v177_v53  ;;  %vm198_vm11 = vweird.f32 %v177_v53 }
 0x12d   :  { %v180_v55 = vsub.f32 1.0, %v179_v54 }
 0x12e   :  { %v205_v8 = vor.u32 1.1754944e-38, %v204_v2  ;;  %vm203_vm13 = vcmp.eq.f32.partialorder %v202_v4, 8.507059e+37 }
 0x12f   :  { %v181_v56 = vmul.f32 %v407_v52, %v180_v55 }
 0x131   :  { %v182_v58 = vadd.f32 %v407_v52, %v181_v56 }
 0x132   :  { %v409_v60 = vpop.eup %408 }
 0x133   :  { %v186_v61 = vsel %vm185_vm8, %v407_v52, %v182_v58  ;;  %v194_v62 = vmul.f32 %v409_v60, %v177_v53  ;;  %vm199_vm10 = vweird.f32 %v409_v60 }
 0x134   :  { %v191_v1 = vsel %vm188_vm9, %v190_v63, %v186_v61  ;;  %vm200_vm12 = vmor %vm198_vm11, %vm199_vm10 }
 0x135   :  { %v195_v0 = vsub.f32 1.0, %v194_v62  ;;  %v192_v5 = vmul.f32 %v191_v1, %v657_v13  ;;  %v397_v13 = vld [vmem:[#allocation6] ss:$0 sm:$0xff] }
 0x137   :  { %v196_v3 = vmul.f32 %v409_v60, %v195_v0  ;;  %v211_v12 = vmul.f32 %v395_v7, %v192_v5 }
 0x139   :  { %v197_v6 = vadd.f32 %v409_v60, %v196_v3  ;;  %v216_v16 = vadd.f32 %v396_v14, %v211_v12 }
 0x13b   :  { %v201_v9 = vsel %vm200_vm12, %v409_v60, %v197_v6 }
 0x13c   :  { %v206_v10 = vsel %vm203_vm13, %v205_v8, %v201_v9 }
 0x13d   :  { %v207_v11 = vmul.f32 %v206_v10, %v662_v18 }
 0x13f   :  { %v212_v15 = vmul.f32 %v395_v7, %v207_v11 }
 0x141   :  { %v217_v17 = vadd.f32 %v396_v14, %v212_v15 }
 0x143   :  { %v218_v19 = vpack.c.bf16 %v217_v17, %v216_v16 }
 0x145   :  { %361 = vmatmul.msk.bf16.vlgmr.msra.gmra.mxu0 %vm124_vm0, %v218_v19  ;;  %370 = vmatmul.msk.bf16.vlgmr.msra.gmra.mxu1 %vm124_vm0, %v218_v19 }
 0x146   :  { %379 = vmatmul.msk.bf16.vlgmr.msra.gmra.mxu2 %vm124_vm0, %v218_v19 }
 0x1c2   :  { %v251_v21 = vpop.f32.mrf.mxu0  ;;  %v290_v22 = vpop.f32.mrf.mxu1 }
 0x1c3   :  { %v252_v23 = vadd.f32 %v397_v13, %v251_v21  ;;  %v291_v24 = vadd.f32 %v398_v20, %v290_v22 }
 0x1c5   :  { %v256_v18 = vpack.c.bf16 %v252_v23, %v252_v23  ;;  %v295_v25 = vpack.c.bf16 %v291_v24, %v291_v24 }
 0x1c7   :  { %259 = vst.msk [vmem:[%s717_s9] sm:$0xf] %vm258_vm14, %v256_v18 }
 0x1c8   :  { %297 = vst.msk [vmem:[%s718_s10] sm:$0xf] %vm258_vm14, %v295_v25 }
 0x1c9   :  { %v328_v27 = vpop.f32.mrf.mxu2 }
 0x1ca   :  { %v329_v28 = vadd.f32 %v399_v26, %v328_v27  ;;  %v253_v29 = vpop.f32.mrf.mxu0  ;;  %v292_v30 = vpop.f32.mrf.mxu1 }
 0x1cb   :  { %v254_v31 = vadd.f32 %v397_v13, %v253_v29  ;;  %v293_v32 = vadd.f32 %v398_v20, %v292_v30 }
 0x1cc   :  { %v333_v33 = vpack.c.bf16 %v329_v28, %v329_v28 }
 0x1cd   :  { %v257_v34 = vpack.c.bf16 %v254_v31, %v254_v31  ;;  %v296_v35 = vpack.c.bf16 %v293_v32, %v293_v32 }
 0x1ce   :  { %335 = vst.msk [vmem:[%s719_s11] sm:$0xf] %vm258_vm14, %v333_v33 }
 0x1cf   :  { %260 = vst.msk [vmem:[%s717_s9 + $0x4] sm:$0xf] %vm258_vm14, %v257_v34 }
 0x1d0   :  { %298 = vst.msk [vmem:[%s718_s10 + $0x4] sm:$0xf] %vm258_vm14, %v296_v35 }
 0x1d1   :  { %v330_v36 = vpop.f32.mrf.mxu2 }
 0x1d2   :  { %v331_v37 = vadd.f32 %v399_v26, %v330_v36 }
 0x1d4   :  { %v334_v38 = vpack.c.bf16 %v331_v37, %v331_v37 }
 0x1d6   :  { %336 = vst.msk [vmem:[%s719_s11 + $0x4] sm:$0xf] %vm258_vm14, %v334_v38 }
 0x1d7   :  { %349 = vsyncpa [#allocation3], 1 }
 0x1d8   :  { %350 = vsyncpa [#allocation5], 1 }
 0x1d9   :  { %351 = vsyncpa [#allocation8], 1 }
 0x1da   :  { %352 = vsyncpa [#allocation11], 1 }

// kernel: encoder_forward.7
= control target key start
LH: loop header
LB: loop body
LE: loop exit
PB: predicated region body
PF: predicated region fallthrough
CT: control target
= control target key end

     0   :  { %12 = vsyncpa [#allocation6], 0  ;;  %s1617_s0 = inlined_call_operand.vmem [shape: bf16[2,8,32], index: 0, kind: input, shape index: {}]   ;;  %s1618_s1 = inlined_call_operand.vmem [shape: bf16[2,8,32], index: 1, kind: input, shape index: {}]   ;;  %s1619_s2 = inlined_call_operand.vmem [shape: bf16[2,8,32], index: 2, kind: input, shape index: {}]   ;;  %s1620_s3 = inlined_call_operand.vmem [shape: bf16[2,8,8], index: 3, kind: input, shape index: {}]   ;;  %s1621_s4 = inlined_call_operand.hbm [shape: bf16[32,32], index: 4, kind: input, shape index: {}]   ;;  %s1622_s5 = inlined_call_operand.hbm [shape: f32[1,32], index: 5, kind: input, shape index: {}]   ;;  %s1623_s6 = inlined_call_operand.vmem [shape: f32[2,8,32], index: 6, kind: input, shape index: {}]   ;;  %s1624_s7 = inlined_call_operand.vmem [shape: f32[2,8,32], index: 7, kind: output, shape index: {}]  }
   0x1   :  { %13 = vsyncpa [#allocation8], 0  ;;  %s1429_s24 = smov 0   ;;  %s1431_s25 = smov 0  }
   0x2   :  { %s1433_s26 = smov 0  }
   0x3 LB: > { %s1177_s27 = sadd.s32 4294967295, %s1377_s26   ;;  %s38_s28 = sadd.s32 1, %s1373_s25  ;;  %s1377_s26 = sphi %s1433_s26, %s19_s26   ;;  %s1373_s25 = sphi %s1431_s25, %s1630_s25   ;;  %s1369_s24 = sphi %s1429_s24, %s1629_s24  }
   0x4   : > { %p40_p0 = scmp.ge.s32.totalorder %s38_s28, 2  ;;  %p1179_p1 = scmp.ge.s32.totalorder %s1377_s26, 1 }
   0x5   : > { %p255_p2 = scmp.lt.s32.totalorder %s1377_s26, 3  ;;  %p1454_p4 = scmp.eq.s32.totalorder %s1177_s27, 0 }
   0x6   : > { %s1632_s28 = smov (%p40_p0, %s38_s28), 0  ;;  %s266_s10 = sshll.u32 %s1621_s4, 4  ;;  %s267_s10 = int_to_ptr.hbm [resolvable:$true] %s266_s10 }
   0x7   : > { %p1450_p3 = pnand %p1179_p1, %p255_p2  ;;  %s1379_s11 = smov [#allocation5]  }
   0x8   : > { %s268_s12 = sshll.u32 %s1379_s11, 4  ;;  %s281_s15 = sshll.u32 %s1622_s5, 4  ;;  %s269_s12 = int_to_ptr.vmem [resolvable:$true] %s268_s12  ;;  %s282_s15 = int_to_ptr.hbm [resolvable:$true] %s281_s15 }
   0x9   : > { %p1214_p5 = pneg %p1450_p3  ;;  %s1380_s16 = smov 64  }
   0xa   : > { %s1381_s17 = smov 4   ;;  %s1382_s18 = smov [#allocation7]  }
   0xb   : > { %p1215_p6 = pnand %p1454_p4, %p1214_p5  ;;  %s283_s19 = sshll.u32 %s1382_s18, 4  ;;  %s284_s19 = int_to_ptr.vmem [resolvable:$true] %s283_s19 }
   0xc   : > { %349 = sbr.rel (%p1450_p3) target bundleno = 1190 (0x4a6), region = 48 }
   0xd   : > { %1217 = dma.hbm_to_vmem [thread:$0]  (!%p1215_p6), %s267_s10, 256, %s269_s12, [#allocation6], %s1380_s16, %s1380_s16, %s1381_s17  }
   0xe   : > { %1220 = dma.hbm_to_vmem [thread:$0]  (!%p1215_p6), %s282_s15, 16, %s284_s19, [#allocation8]  }
  0x11   : > { %1360 = dma.done.wait (%p1454_p4), [#allocation6], 256  }
  0x12   : > { %1362 = vsyncadd (%p1454_p4), [#allocation6], 4294967040 }
  0x13   : > { %1364 = dma.done.wait (%p1454_p4), [#allocation8], 16  }
  0x14   : > { %1366 = vsyncadd (%p1454_p4), [#allocation8], 4294967280  ;;  %p422_p7 = scmp.lt.s32.totalorder %s1369_s24, 1  ;;  %vm481_vm0 = vcmask 64512   ;;  %vm472_vm1 = vcmask 7168   ;;  %s1384_s11 = smov 104  }
  0x15   : > { %v1383_v3 = vmov -1e+30   ;;  %s1385_s12 = smov 112   ;;  %s1386_s13 = smov 120   ;;  %v1387_v16 = vmov 0   ;;  %v1388_v17 = vmov 0.0  }
  0x16   : > { %s1634_s24 = smov (!%p422_p7, %s1369_s24), 1  ;;  %473 = vst.msk [vmem:[#allocation2] sm:$0xff] %vm472_vm1, %v1383_v3  ;;  %1259 = vset.pattern.permute.xlu1 %v1387_v16  ;;  %1260 = vset.pattern.permute.xlu2 %v1387_v16  ;;  %vm549_vm3 = vcmask 1043456  }
  0x17   : > { %s1483_s20 = sshll.u32 %s1634_s24, 2  ;;  %474 = vst.msk [vmem:[#allocation2 + $0x8] sm:$0xff] %vm472_vm1, %v1383_v3  ;;  %1261 = vset.pattern.permute.xlu0 %v1387_v16  ;;  %s1190_s17 = sshll.u32 %s1634_s24, 3 }
  0x18   : > { %s435_s23 = scalar_lea.vmem %s1618_s1, %s1483_s20  ;;  %s428_s30 = scalar_lea.vmem %s1617_s0, %s1483_s20  ;;  %475 = vst.msk [vmem:[#allocation2 + $0x10] sm:$0xff] %vm472_vm1, %v1383_v3 }
  0x19   : > { %v487_v0 = vld [vmem:[%s435_s23] sm:$0xf]  ;;  %476 = vst.msk [vmem:[#allocation2 + $0x18] sm:$0xff] %vm472_vm1, %v1383_v3  ;;  %s452_s10 = scalar_lea.vmem %s1620_s3, %s1483_s20  ;;  %s442_s16 = scalar_lea.vmem %s1619_s2, %s1483_s20 }
  0x1a   : > { %v495_v1 = vsel %vm481_vm0, %v487_v0, 0  ;;  %v486_v2 = vld [vmem:[%s428_s30] sm:$0xf]  ;;  %v575_v6 = vunpack.c.l.b16 %v487_v0  ;;  %477 = vst.msk [vmem:[#allocation3] sm:$0xff] %vm472_vm1, %v1388_v17  ;;  %s459_s20 = scalar_lea.vmem %s1623_s6, %s1190_s17  ;;  %s466_s23 = scalar_lea.vmem %s1624_s7, %s1190_s17 }
  0x1b   : > { %504 = vmatpush.bf16.xpose.msra.mxu0 %v495_v1  ;;  %v489_v4 = vld [vmem:[%s452_s10] sm:$0xf]  ;;  %v570_v14 = vunpack.c.l.b16 %v486_v2  ;;  %478 = vst.msk [vmem:[#allocation3 + $0x8] sm:$0xff] %vm472_vm1, %v1388_v17 }
  0x1c   : > { %v511_v5 = vunpack.c.l.bf16 %v489_v4  ;;  %v576_v10 = vpack.c.b16 %v575_v6, %v575_v6  ;;  %479 = vst.msk [vmem:[#allocation3 + $0x10] sm:$0xff] %vm472_vm1, %v1388_v17  ;;  %v488_v26 = vld [vmem:[%s442_s16] sm:$0xf] }
  0x1d   : > { %v571_v15 = vpack.c.b16 %v570_v14, %v570_v14  ;;  %480 = vst.msk [vmem:[#allocation3 + $0x18] sm:$0xff] %vm472_vm1, %v1388_v17  ;;  %v1522_v18 = vld [vmem:[#allocation2] sm:$0xff]  ;;  %v551_v27 = vsel %vm549_vm3, %v488_v26, 0  ;;  %v635_v54 = vunpack.c.l.b16 %v488_v26 }
  0x1e   : > { %vm1503_vm2 = vcmp.eq.f32.partialorder %v511_v5, 0.0  ;;  %746 = vrot.lane.b32.xlu2 %v576_v10, %s1384_s11  ;;  %482 = vst.msk [vmem:[#allocation4] sm:$0xff] %vm481_vm0, %v1388_v17  ;;  %560 = vmatpush.bf16.msra.mxu1 %v551_v27  ;;  %v1562_v57 = vld [vmem:[#allocation2 + $0x8] sm:$0xff] }
  0x1f   : > { %483 = vst.msk [vmem:[#allocation4 + $0x8] sm:$0xff] %vm481_vm0, %v1388_v17  ;;  %v636_v56 = vpack.c.b16 %v635_v54, %v635_v54  ;;  %v687_v1 = vld [vmem:[#allocation2 + $0x10] sm:$0xff] }
  0x20   : > { %484 = vst.msk [vmem:[#allocation4 + $0x10] sm:$0xff] %vm481_vm0, %v1388_v17  ;;  %v770_v59 = vld [vmem:[#allocation2 + $0x18] sm:$0xff] }
  0x21   : > { %485 = vst.msk [vmem:[#allocation4 + $0x18] sm:$0xff] %vm481_vm0, %v1388_v17 }
  0x22   : > { %1192 = vmatmul.msk.bf16.vlgmr.msra.gmra.mxu0 %vm481_vm0, %v486_v2 }
  0x26   : > { %663 = vrot.lane.b32.xlu2 %v576_v10, %s1385_s12 }
  0x2e   : > { %661 = vrot.lane.b32.xlu2 %v571_v15, %s1385_s12 }
  0x78   : > { %v747_v24 = vpop.permute.xlu2 %746 }
  0x79   : > { %v752_v25 = vsel %vm481_vm0, %v747_v24, 0 }
  0x7a   : > { %761 = vmatpush.bf16.xpose.msrb.mxu0 %v752_v25 }
  0x80   : > { %v664_v28 = vpop.permute.xlu2 %663 }
  0x81   : > { %v669_v29 = vsel %vm481_vm0, %v664_v28, 0 }
  0x82   : > { %678 = vmatpush.bf16.xpose.msrb.mxu1 %v669_v29 }
  0x88   : > { %v662_v37 = vpop.permute.xlu2 %661 }
  0x9f   : > { %v506_v7 = vpop.f32.mrf.mxu0 }
  0xa0   : > { %v510_v9 = vmul.f32 0.35355338, %v506_v7 }
  0xa2   : > { %v513_v11 = vsel %vm1503_vm2, -1e+09, %v510_v9 }
  0xa3   : > { %v515_v12 = vsel %vm481_vm0, %v513_v11, -inf }
  0xa4   : > { %516 = vmax.xlane.f32.xlu0 %v515_v12 }
  0xa7   : > { %v508_v13 = vpop.f32.mrf.mxu0 }
  0xb8   : > { %577 = vrot.lane.b32.xlu0 %v576_v10, %s1386_s13 }
 0x117   : > { %v517_v19 = vpop.xlane.xlu0 %516 }
 0x118   : > { %v1525_v20 = vmax.f32 %v1522_v18, %v517_v19 }
 0x11a   : > { %v519_v21 = vsub.f32 %v1522_v18, %v1525_v20  ;;  %568 = vst.msk [vmem:[#allocation2] sm:$0xff] %vm472_vm1, %v1525_v20  ;;  %524 = vperm.xlu1 %1259, %v1525_v20  }
 0x11c   : > { %v520_v6 = vmul.f32 1.442695, %v519_v21 }
 0x122   : > { %572 = vrot.lane.b32.xlu1 %v571_v15, %s1386_s13 }
 0x12a   : > { %744 = vrot.lane.b32.xlu1 %v571_v15, %s1384_s11  ;;  %v578_v22 = vpop.permute.xlu0 %577 }
 0x12b   : > { %v583_v23 = vsel %vm481_vm0, %v578_v22, 0 }
 0x12c   : > { %592 = vmatpush.bf16.xpose.msra.mxu2 %v583_v23 }
 0x18c   : > { %v525_v30 = vpop.permute.xlu1 %524 }
 0x18d   : > { %v527_v31 = vsub.f32 %v513_v11, %v525_v30 }
 0x18f   : > { %v528_v32 = vmul.f32 1.442695, %v527_v31 }
 0x191   : > { %1263 = vpow2.f32 %v528_v32 }
 0x192   : > { %1265 = vpow2.f32 %v520_v6 }
 0x194   : > { %v573_v33 = vpop.permute.xlu1 %572 }
 0x195   : > { %1194 = vmatmul.msk.bf16.vlgmr.msra.gmra.mxu2 %vm481_vm0, %v573_v33 }
 0x197   : > { %v1264_v34 = vpop.eup %1263 }
 0x198   : > { %v545_v35 = vpack.c.bf16 %v1264_v34, %v1264_v34  ;;  %v532_v5 = vsel %vm481_vm0, %v1264_v34, 0.0  ;;  %v1266_v7 = vpop.eup %1265 }
 0x19a   : > { %1193 = vmatmul.msk.bf16.vlgmr.msra.gmra.mxu1 %vm481_vm0, %v545_v35 }
 0x19c   : > { %v745_v36 = vpop.permute.xlu1 %744 }
 0x19d   : > { %1198 = vmatmul.msk.bf16.vlgmr.msrb.gmra.mxu0 %vm481_vm0, %v745_v36 }
 0x1aa   : > { %1196 = vmatmul.msk.bf16.vlgmr.msrb.gmra.mxu1 %vm481_vm0, %v662_v37  ;;  %v530_v37 = vld [vmem:[#allocation3] sm:$0xff] }
 0x217   : > { %v1546_v38 = vpop.f32.mrf.mxu1 }
 0x218   : > { %v594_v39 = vpop.f32.mrf.mxu2 }
 0x219   : > { %v598_v40 = vmul.f32 0.35355338, %v594_v39  ;;  %v531_v39 = vmul.f32 %v1266_v7, %v530_v37 }
 0x21a   : > { %v763_v41 = vpop.f32.mrf.mxu0 }
 0x21b   : > { %v767_v42 = vmul.f32 0.35355338, %v763_v41  ;;  %v599_v43 = vsel %vm1503_vm2, -1e+09, %v598_v40 }
 0x21c   : > { %v602_v44 = vsel %vm481_vm0, %v599_v43, -inf }
 0x21d   : > { %603 = vmax.xlane.f32.xlu1 %v602_v44  ;;  %v1553_v45 = vsel %vm1503_vm2, -1e+09, %v767_v42 }
 0x21e   : > { %v771_v46 = vsel %vm481_vm0, %v1553_v45, -inf }
 0x21f   : > { %v564_v47 = vpop.f32.mrf.mxu1  ;;  %772 = vmax.xlane.f32.xlu2 %v771_v46 }
 0x220   : > { %v596_v48 = vpop.f32.mrf.mxu2 }
 0x222   : > { %v765_v49 = vpop.f32.mrf.mxu0 }
 0x227   : > { %v680_v50 = vpop.f32.mrf.mxu1 }
 0x228   : > { %v684_v51 = vmul.f32 0.35355338, %v680_v50 }
 0x22a   : > { %v685_v52 = vsel %vm1503_vm2, -1e+09, %v684_v51 }
 0x22b   : > { %v688_v53 = vsel %vm481_vm0, %v685_v52, -inf }
 0x22c   : > { %689 = vmax.xlane.f32.xlu0 %v688_v53 }
 0x22f   : > { %v682_v55 = vpop.f32.mrf.mxu1 }
 0x236   : > { %637 = vrot.lane.b32.xlu1 %v636_v56, %s1386_s13 }
 0x23e   : > { %803 = vrot.lane.b32.xlu1 %v636_v56, %s1384_s11 }
 0x290   : > { %v604_v58 = vpop.xlane.xlu1 %603 }
 0x291   : > { %v605_v60 = vmax.f32 %v1562_v57, %v604_v58  ;;  %v618_v58 = vld [vmem:[#allocation3 + $0x8] sm:$0xff] }
 0x292   : > { %v773_v61 = vpop.xlane.xlu2 %772 }
 0x293   : > { %v606_v62 = vsub.f32 %v1562_v57, %v605_v60  ;;  %660 = vst.msk [vmem:[#allocation2 + $0x8] sm:$0xff] %vm472_vm1, %v605_v60  ;;  %v774_v63 = vmax.f32 %v770_v59, %v773_v61  ;;  %611 = vperm.xlu2 %1260, %v605_v60  }
 0x295   : > { %v775_v0 = vsub.f32 %v770_v59, %v774_v63  ;;  %826 = vst.msk [vmem:[#allocation2 + $0x18] sm:$0xff] %vm472_vm1, %v774_v63  ;;  %780 = vperm.xlu0 %1261, %v774_v63   ;;  %v607_v34 = vmul.f32 1.442695, %v606_v62  ;;  %v704_v62 = vld [vmem:[#allocation3 + $0x10] sm:$0xff] }
 0x297   : > { %v776_v32 = vmul.f32 1.442695, %v775_v0 }
 0x29f   : > { %v690_v2 = vpop.xlane.xlu0 %689 }
 0x2a0   : > { %v691_v3 = vmax.f32 %v687_v1, %v690_v2 }
 0x2a2   : > { %v692_v4 = vsub.f32 %v687_v1, %v691_v3  ;;  %743 = vst.msk [vmem:[#allocation2 + $0x10] sm:$0xff] %vm472_vm1, %v691_v3  ;;  %697 = vperm.xlu2 %1260, %v691_v3  }
 0x2a4   : > { %v693_v35 = vmul.f32 1.442695, %v692_v4 }
 0x2a8   : > { %v638_v8 = vpop.permute.xlu1 %637 }
 0x2a9   : > { %v643_v9 = vsel %vm549_vm3, %v638_v8, 0 }
 0x2aa   : > { %720 = vrot.lane.b32.xlu2 %v636_v56, %s1385_s12  ;;  %652 = vmatpush.bf16.msra.mxu3 %v643_v9 }
 0x2b0   : > { %v804_v10 = vpop.permute.xlu1 %803 }
 0x2b1   : > { %v809_v12 = vsel %vm549_vm3, %v804_v10, 0 }
 0x2b2   : > { %818 = vmatpush.bf16.msrb.mxu2 %v809_v12 }
 0x2bf   : > { %533 = vadd.xlane.f32.xlu0 %v532_v5 }
 0x2d3   : > { %541 = vperm.xlu0 %1261, %v1266_v7   ;;  %v787_v7 = vld [vmem:[#allocation3 + $0x18] sm:$0xff] }
 0x2ed   : > { %v612_v11 = vpop.permute.xlu2 %611 }
 0x2ee   : > { %v614_v13 = vsub.f32 %v599_v43, %v612_v11 }
 0x2f0   : > { %v615_v14 = vmul.f32 1.442695, %v614_v13 }
 0x2f2   : > { %1267 = vpow2.f32 %v615_v14 }
 0x2f8   : > { %v1268_v15 = vpop.eup %1267 }
 0x2f9   : > { %v620_v16 = vsel %vm481_vm0, %v1268_v15, 0.0  ;;  %v633_v17 = vpack.c.bf16 %v1268_v15, %v1268_v15 }
 0x2fa   : > { %621 = vadd.xlane.f32.xlu1 %v620_v16 }
 0x2fb   : > { %1195 = vmatmul.msk.bf16.vlgmr.msra.gmra.mxu3 %vm481_vm0, %v633_v17 }
 0x2fc   : > { %v698_v18 = vpop.permute.xlu2 %697 }
 0x2fd   : > { %v700_v19 = vsub.f32 %v685_v52, %v698_v18 }
 0x2ff   : > { %v701_v20 = vmul.f32 1.442695, %v700_v19  ;;  %v859_v19 = vld [vmem:[#allocation5] sm:$0xf] }
 0x301   : > { %1269 = vpow2.f32 %v701_v20  ;;  %v864_v20 = vsel %vm549_vm3, %v859_v19, 0 }
 0x302   : > { %873 = vmatpush.bf16.msra.mxu1 %v864_v20 }
 0x304   : > { %v721_v21 = vpop.permute.xlu2 %720 }
 0x305   : > { %v726_v22 = vsel %vm549_vm3, %v721_v21, 0 }
 0x306   : > { %735 = vmatpush.bf16.msrb.mxu3 %v726_v22  ;;  %v626_v22 = vld [vmem:[#allocation4 + $0x8] sm:$0xff] }
 0x307   : > { %v1270_v23 = vpop.eup %1269  ;;  %v781_v24 = vpop.permute.xlu0 %780 }
 0x308   : > { %v783_v25 = vsub.f32 %v1553_v45, %v781_v24  ;;  %v706_v26 = vsel %vm481_vm0, %v1270_v23, 0.0  ;;  %v719_v27 = vpack.c.bf16 %v1270_v23, %v1270_v23  ;;  %v538_v45 = vld [vmem:[#allocation4] sm:$0xff] }
 0x309   : > { %707 = vadd.xlane.f32.xlu1 %v706_v26 }
 0x30a   : > { %v784_v28 = vmul.f32 1.442695, %v783_v25 }
 0x30b   : > { %1197 = vmatmul.msk.bf16.vlgmr.msrb.gmra.mxu3 %vm481_vm0, %v719_v27 }
 0x30c   : > { %1271 = vpow2.f32 %v784_v28 }
 0x30d   : > { %1273 = vpow2.f32 %v776_v32 }
 0x30e   : > { %1275 = vpow2.f32 %v607_v34 }
 0x30f   : > { %1277 = vpow2.f32 %v693_v35 }
 0x312   : > { %v1272_v29 = vpop.eup %1271 }
 0x313   : > { %v789_v30 = vsel %vm481_vm0, %v1272_v29, 0.0  ;;  %v802_v31 = vpack.c.bf16 %v1272_v29, %v1272_v29  ;;  %v1274_v33 = vpop.eup %1273 }
 0x314   : > { %790 = vadd.xlane.f32.xlu2 %v789_v30  ;;  %v1276_v36 = vpop.eup %1275  ;;  %v788_v12 = vmul.f32 %v1274_v33, %v787_v7 }
 0x315   : > { %1199 = vmatmul.msk.bf16.vlgmr.msrb.gmra.mxu2 %vm481_vm0, %v802_v31  ;;  %v1278_v41 = vpop.eup %1277  ;;  %v619_v59 = vmul.f32 %v1276_v36, %v618_v58 }
 0x316   : > { %v705_v63 = vmul.f32 %v1278_v41, %v704_v62  ;;  %v903_v62 = vld [vmem:[#allocation5 + $0x4] sm:$0xf] }
 0x322   : > { %798 = vperm.xlu1 %1259, %v1274_v33   ;;  %v795_v33 = vld [vmem:[#allocation4 + $0x18] sm:$0xff] }
 0x32c   : > { %629 = vperm.xlu2 %1260, %v1276_v36   ;;  %v712_v36 = vld [vmem:[#allocation4 + $0x10] sm:$0xff] }
 0x332   : > { %v534_v40 = vpop.xlane.xlu0 %533 }
 0x333   : > { %v535_v42 = vadd.f32 %v534_v40, %v531_v39 }
 0x334   : > { %715 = vperm.xlu2 %1260, %v1278_v41  }
 0x335   : > { %537 = vst.msk [vmem:[#allocation3] sm:$0xff] %vm472_vm1, %v535_v42 }
 0x33c   : > { %v836_v43 = vld [vmem:[#allocation3] sm:$0xff] }
 0x33d   : > { %1279 = vrcp.f32 %v836_v43  ;;  %v848_v50 = vand.u32 2147483648, %v836_v43  ;;  %v846_v53 = vand.u32 2147483647, %v836_v43  ;;  %vm842_vm5 = vweird.f32 %v836_v43 }
 0x33f   : > { %v849_v55 = vor.u32 1.1754944e-38, %v848_v50  ;;  %vm847_vm7 = vcmp.eq.f32.partialorder %v846_v53, 8.507059e+37 }
 0x343   : > { %v1280_v44 = vpop.eup %1279 }
 0x344   : > { %v838_v46 = vmul.f32 %v1280_v44, %v836_v43  ;;  %vm843_vm4 = vweird.f32 %v1280_v44 }
 0x345   : > { %v542_v47 = vpop.permute.xlu0 %541  ;;  %vm844_vm6 = vmor %vm842_vm5, %vm843_vm4 }
 0x346   : > { %v544_v48 = vmul.f32 %v542_v47, %v538_v45  ;;  %v839_v49 = vsub.f32 1.0, %v838_v46 }
 0x348   : > { %v566_v51 = vadd.f32 %v1546_v38, %v544_v48  ;;  %v840_v52 = vmul.f32 %v1280_v44, %v839_v49 }
 0x34a   : > { %567 = vst.msk [vmem:[#allocation4] sm:$0xff] %vm481_vm0, %v566_v51  ;;  %v841_v54 = vadd.f32 %v1280_v44, %v840_v52 }
 0x34c   : > { %v845_v56 = vsel %vm844_vm6, %v1280_v44, %v841_v54 }
 0x34d   : > { %v850_v57 = vsel %vm847_vm7, %v849_v55, %v845_v56 }
 0x34e   : > { %854 = vperm.xlu2 %1260, %v850_v57  }
 0x36d   : > { %v622_v60 = vpop.xlane.xlu1 %621 }
 0x36e   : > { %v623_v61 = vadd.f32 %v622_v60, %v619_v59  ;;  %v851_v59 = vld [vmem:[#allocation4] sm:$0xff] }
 0x370   : > { %624 = vst.msk [vmem:[#allocation3 + $0x8] sm:$0xff] %vm472_vm1, %v623_v61 }
 0x377   : > { %v880_v38 = vld [vmem:[#allocation3 + $0x8] sm:$0xff] }
 0x378   : > { %1281 = vrcp.f32 %v880_v38  ;;  %v892_v6 = vand.u32 2147483648, %v880_v38  ;;  %v890_v9 = vand.u32 2147483647, %v880_v38  ;;  %vm886_vm9 = vweird.f32 %v880_v38 }
 0x37a   : > { %v893_v13 = vor.u32 1.1754944e-38, %v892_v6  ;;  %vm891_vm11 = vcmp.eq.f32.partialorder %v890_v9, 8.507059e+37 }
 0x37c   : > { %v708_v0 = vpop.xlane.xlu1 %707 }
 0x37d   : > { %v709_v1 = vadd.f32 %v708_v0, %v705_v63  ;;  %v908_v63 = vsel %vm549_vm3, %v903_v62, 0  ;;  %v991_v0 = vld [vmem:[#allocation5 + $0xc] sm:$0xf] }
 0x37e   : > { %v1282_v2 = vpop.eup %1281  ;;  %v654_v3 = vpop.f32.mrf.mxu3  ;;  %917 = vmatpush.bf16.msra.mxu3 %v908_v63 }
 0x37f   : > { %710 = vst.msk [vmem:[#allocation3 + $0x10] sm:$0xff] %vm472_vm1, %v709_v1  ;;  %v882_v4 = vmul.f32 %v1282_v2, %v880_v38  ;;  %vm887_vm8 = vweird.f32 %v1282_v2  ;;  %v996_v1 = vsel %vm549_vm3, %v991_v0, 0 }
 0x380   : > { %vm888_vm10 = vmor %vm886_vm9, %vm887_vm8  ;;  %1005 = vmatpush.bf16.msra.mxu2 %v996_v1 }
 0x381   : > { %v883_v5 = vsub.f32 1.0, %v882_v4 }
 0x383   : > { %v884_v8 = vmul.f32 %v1282_v2, %v883_v5 }
 0x385   : > { %v885_v10 = vadd.f32 %v1282_v2, %v884_v8 }
 0x386   : > { %v656_v11 = vpop.f32.mrf.mxu3  ;;  %v924_v14 = vld [vmem:[#allocation3 + $0x10] sm:$0xff] }
 0x387   : > { %v791_v15 = vpop.xlane.xlu2 %790  ;;  %v889_v16 = vsel %vm888_vm10, %v1282_v2, %v885_v10  ;;  %1283 = vrcp.f32 %v924_v14  ;;  %v934_v28 = vand.u32 2147483647, %v924_v14  ;;  %v936_v29 = vand.u32 2147483648, %v924_v14  ;;  %v947_v2 = vld [vmem:[#allocation5 + $0x8] sm:$0xf] }
 0x388   : > { %v792_v17 = vadd.f32 %v791_v15, %v788_v12  ;;  %v894_v18 = vsel %vm891_vm11, %v893_v13, %v889_v16  ;;  %vm930_vm13 = vweird.f32 %v924_v14 }
 0x389   : > { %898 = vperm.xlu0 %1261, %v894_v18   ;;  %v937_v37 = vor.u32 1.1754944e-38, %v936_v29  ;;  %vm935_vm15 = vcmp.eq.f32.partialorder %v934_v28, 8.507059e+37 }
 0x38a   : > { %793 = vst.msk [vmem:[#allocation3 + $0x18] sm:$0xff] %vm472_vm1, %v792_v17 }
 0x38d   : > { %v1284_v21 = vpop.eup %1283 }
 0x38e   : > { %v737_v23 = vpop.f32.mrf.mxu3  ;;  %v926_v24 = vmul.f32 %v1284_v21, %v924_v14  ;;  %vm931_vm12 = vweird.f32 %v1284_v21 }
 0x38f   : > { %v630_v25 = vpop.permute.xlu2 %629  ;;  %vm932_vm14 = vmor %vm930_vm13, %vm931_vm12 }
 0x390   : > { %v632_v26 = vmul.f32 %v630_v25, %v626_v22  ;;  %v927_v27 = vsub.f32 1.0, %v926_v24  ;;  %v830_v22 = vld [vmem:[%s459_s20] sm:$0xff] }
 0x391   : > { %v968_v30 = vld [vmem:[#allocation3 + $0x18] sm:$0xff] }
 0x392   : > { %v658_v31 = vadd.f32 %v654_v3, %v632_v26  ;;  %v928_v32 = vmul.f32 %v1284_v21, %v927_v27  ;;  %1285 = vrcp.f32 %v968_v30  ;;  %v980_v51 = vand.u32 2147483648, %v968_v30 }
 0x393   : > { %v978_v53 = vand.u32 2147483647, %v968_v30  ;;  %vm974_vm2 = vweird.f32 %v968_v30  ;;  %v952_v3 = vsel %vm549_vm3, %v947_v2, 0 }
 0x394   : > { %659 = vst.msk [vmem:[#allocation4 + $0x8] sm:$0xff] %vm481_vm0, %v658_v31  ;;  %v799_v34 = vpop.permute.xlu1 %798  ;;  %v929_v35 = vadd.f32 %v1284_v21, %v928_v32  ;;  %v981_v56 = vor.u32 1.1754944e-38, %v980_v51  ;;  %961 = vmatpush.bf16.msra.mxu0 %v952_v3 }
 0x395   : > { %v801_v41 = vmul.f32 %v799_v34, %v795_v33  ;;  %vm979_vm5 = vcmp.eq.f32.partialorder %v978_v53, 8.507059e+37 }
 0x396   : > { %v739_v39 = vpop.f32.mrf.mxu3  ;;  %v933_v40 = vsel %vm932_vm14, %v1284_v21, %v929_v35  ;;  %v1262_v21 = vld [vmem:[#allocation7] ss:$0 sm:$0xff] }
 0x397   : > { %v716_v42 = vpop.permute.xlu2 %715  ;;  %v938_v43 = vsel %vm935_vm15, %v937_v37, %v933_v40 }
 0x398   : > { %v1286_v44 = vpop.eup %1285  ;;  %v718_v45 = vmul.f32 %v716_v42, %v712_v36  ;;  %v820_v46 = vpop.f32.mrf.mxu2  ;;  %942 = vperm.xlu0 %1261, %v938_v43  }
 0x399   : > { %v824_v47 = vadd.f32 %v820_v46, %v801_v41  ;;  %v970_v48 = vmul.f32 %v1286_v44, %v968_v30  ;;  %vm975_vm1 = vweird.f32 %v1286_v44 }
 0x39a   : > { %v741_v49 = vadd.f32 %v737_v23, %v718_v45  ;;  %vm976_vm4 = vmor %vm974_vm2, %vm975_vm1  ;;  %v835_v23 = vadd.f32 %v1262_v21, %v830_v22 }
 0x39b   : > { %825 = vst.msk [vmem:[#allocation4 + $0x18] sm:$0xff] %vm481_vm0, %v824_v47  ;;  %v971_v50 = vsub.f32 1.0, %v970_v48  ;;  %v895_v4 = vld [vmem:[#allocation4 + $0x8] sm:$0xff] }
 0x39c   : > { %742 = vst.msk [vmem:[#allocation4 + $0x10] sm:$0xff] %vm481_vm0, %v741_v49 }
 0x39d   : > { %v972_v52 = vmul.f32 %v1286_v44, %v971_v50 }
 0x39f   : > { %v973_v54 = vadd.f32 %v1286_v44, %v972_v52 }
 0x3a0   : > { %v822_v55 = vpop.f32.mrf.mxu2 }
 0x3a1   : > { %v977_v57 = vsel %vm976_vm4, %v1286_v44, %v973_v54 }
 0x3a2   : > { %v982_v58 = vsel %vm979_vm5, %v981_v56, %v977_v57  ;;  %v983_v12 = vld [vmem:[#allocation4 + $0x18] sm:$0xff] }
 0x3a3   : > { %986 = vperm.xlu1 %1259, %v982_v58   ;;  %v939_v8 = vld [vmem:[#allocation4 + $0x10] sm:$0xff] }
 0x3a8   : > { %v855_v60 = vpop.permute.xlu2 %854 }
 0x3a9   : > { %v857_v61 = vmul.f32 %v855_v60, %v851_v59 }
 0x3ab   : > { %v858_v38 = vpack.c.bf16 %v857_v61, %v857_v61 }
 0x3ad   : > { %1200 = vmatmul.msk.bf16.vlgmr.msra.gmra.mxu1 %vm481_vm0, %v858_v38 }
 0x3fb   : > { %v899_v5 = vpop.permute.xlu0 %898 }
 0x3fc   : > { %v901_v6 = vmul.f32 %v899_v5, %v895_v4 }
 0x3fe   : > { %v902_v7 = vpack.c.bf16 %v901_v6, %v901_v6 }
 0x400   : > { %1201 = vmatmul.msk.bf16.vlgmr.msra.gmra.mxu3 %vm481_vm0, %v902_v7 }
 0x40a   : > { %v943_v9 = vpop.permute.xlu0 %942 }
 0x40b   : > { %v945_v10 = vmul.f32 %v943_v9, %v939_v8 }
 0x40d   : > { %v946_v11 = vpack.c.bf16 %v945_v10, %v945_v10 }
 0x40f   : > { %1202 = vmatmul.msk.bf16.vlgmr.msra.gmra.mxu0 %vm481_vm0, %v946_v11 }
 0x415   : > { %v987_v13 = vpop.permute.xlu1 %986 }
 0x416   : > { %v989_v14 = vmul.f32 %v987_v13, %v983_v12 }
 0x418   : > { %v990_v15 = vpack.c.bf16 %v989_v14, %v989_v14 }
 0x41a   : > { %1203 = vmatmul.msk.bf16.vlgmr.msra.gmra.mxu2 %vm481_vm0, %v990_v15  ;;  %vm1012_vm0 = vcmask 261120  }
 0x42a   : > { %v875_v16 = vpop.f32.mrf.mxu1 }
 0x42b   : > { %v879_v25 = vadd.f32 %v875_v16, %v835_v23 }
 0x432   : > { %v877_v17 = vpop.f32.mrf.mxu1 }
 0x483   : > { %v919_v18 = vpop.f32.mrf.mxu3 }
 0x484   : > { %v923_v26 = vadd.f32 %v919_v18, %v879_v25 }
 0x48b   : > { %v921_v19 = vpop.f32.mrf.mxu3 }
 0x48c   : > { %v963_v20 = vpop.f32.mrf.mxu0 }
 0x48d   : > { %v967_v27 = vadd.f32 %v963_v20, %v923_v26 }
 0x494   : > { %v965_v24 = vpop.f32.mrf.mxu0 }
 0x49d   : > { %v1007_v28 = vpop.f32.mrf.mxu2 }
 0x49e   : > { %v1011_v29 = vadd.f32 %v1007_v28, %v967_v27 }
 0x4a0   : > { %1013 = vst.msk [vmem:[%s466_s23] sm:$0xff] %vm1012_vm0, %v1011_v29 }
 0x4a5   : > { %v1009_v30 = vpop.f32.mrf.mxu2 }
 0x4a6 PF: > { %s19_s26 = sadd.s32 1, %s1377_s26   ;;  %s1629_s24 = smov %s1373_s25 }
 0x4a7   : > { %p16_p8 = scmp.ge.s32.totalorder %s19_s26, 4   ;;  %s1630_s25 = smov %s1632_s28 }
 0x4a9   :  { %18 = sbr.rel (!%p16_p8) target bundleno = 3 (0x3), region = 116 }
 0x4ae   :  { %1039 = vsyncpa [#allocation6], 1 }
 0x4af   :  { %1041 = vsyncpa [#allocation6 + $0x1], 1 }
 0x4b0   :  { %1042 = vsyncpa [#allocation8], 1 }

// kernel: encoder_forward.8
= control target key start
LH: loop header
LB: loop body
LE: loop exit
PB: predicated region body
PF: predicated region fallthrough
CT: control target
= control target key end

     0   :  { %14 = vsyncpa [#allocation3], 0  ;;  %s528_s0 = inlined_call_operand.vmem [shape: f32[16,32], index: 0, kind: input, shape index: {}]   ;;  %s529_s1 = inlined_call_operand.vmem [shape: f32[1,32], index: 1, kind: input, shape index: {}]   ;;  %s530_s2 = inlined_call_operand.hbm [shape: f32[1,32], index: 2, kind: input, shape index: {}]   ;;  %s531_s3 = inlined_call_operand.vmem [shape: bf16[32,64], index: 3, kind: input, shape index: {}]   ;;  %s532_s4 = inlined_call_operand.hbm [shape: f32[1,64], index: 4, kind: input, shape index: {}]   ;;  %s533_s5 = inlined_call_operand.vmem [shape: bf16[64,32], index: 5, kind: input, shape index: {}]   ;;  %s534_s6 = inlined_call_operand.hbm [shape: f32[1,32], index: 6, kind: input, shape index: {}]   ;;  %s535_s7 = inlined_call_operand.vmem [shape: f32[1,32], index: 7, kind: input, shape index: {}]   ;;  %s536_s8 = inlined_call_operand.vmem [shape: f32[1,32], index: 8, kind: input, shape index: {}]   ;;  %s537_s9 = inlined_call_operand.vmem [shape: f32[16,32], index: 9, kind: output, shape index: {}]  }
   0x1   :  { %15 = vsyncpa [#allocation5], 0  ;;  %s38_s11 = sshll.u32 %s532_s4, 4  ;;  %s405_s12 = smov [#allocation4]   ;;  %s39_s11 = int_to_ptr.hbm [resolvable:$true] %s38_s11 }
   0x2   :  { %s40_s13 = sshll.u32 %s405_s12, 4  ;;  %s25_s7 = sshll.u32 %s530_s2, 4  ;;  %s41_s13 = int_to_ptr.vmem [resolvable:$true] %s40_s13  ;;  %s26_s7 = int_to_ptr.hbm [resolvable:$true] %s25_s7 }
   0x3   :  { %43 = dma.hbm_to_vmem [thread:$0]  %s39_s11, 16, %s41_s13, [#allocation5]  }
   0x4   :  { %s406_s8 = smov [#allocation2]   ;;  %s51_s19 = sshll.u32 %s534_s6, 4  ;;  %s52_s19 = int_to_ptr.hbm [resolvable:$true] %s51_s19 }
   0x5   :  { %s27_s16 = sshll.u32 %s406_s8, 4  ;;  %s407_s4 = smov [#allocation6]   ;;  %s28_s16 = int_to_ptr.vmem [resolvable:$true] %s27_s16 }
   0x6   :  { %30 = dma.hbm_to_vmem [thread:$0]  %s26_s7, 16, %s28_s16, [#allocation3]  }
   0x7   :  { %s53_s20 = sshll.u32 %s407_s4, 4  ;;  %s54_s20 = int_to_ptr.vmem [resolvable:$true] %s53_s20 }
   0x8   :  { %56 = dma.hbm_to_vmem [thread:$0]  %s52_s19, 16, %s54_s20, [#allocation5]  }
   0x9   :  { %401 = dma.done.wait [#allocation3], 16  }
   0xa   :  { %402 = vsyncadd [#allocation3], 4294967280 }
   0xb   :  { %403 = dma.done.wait [#allocation5], 32  }
   0xc   :  { %404 = vsyncadd [#allocation5], 4294967264  ;;  %vm78_vm0 = vcmask 261120   ;;  %v471_v0 = vld [vmem:[%s528_s0] sm:$0xff]  ;;  %v478_v2 = vld [vmem:[%s528_s0 + $0x8] sm:$0xff]  ;;  %v408_v4 = vmov 32.0  }
   0xd   :  { %v79_v1 = vsel %vm78_vm0, %v471_v0, 0.0  ;;  %v82_v3 = vsel %vm78_vm0, %v478_v2, 0.0  ;;  %319 = vrcp.f32 %v408_v4  ;;  %v306_v21 = vld [vmem:[%s531_s3 + $0x8] sm:$0xff]  ;;  %v305_v23 = vld [vmem:[%s531_s3] sm:$0xff]  ;;  %vm251_vm14 = vcmask 523264  }
   0xe   :  { %80 = vadd.xlane.f32.xlu0 %v79_v1  ;;  %208 = vmatpush.bf16.msra.mxu0 %v306_v21  ;;  %v317_v21 = vld [vmem:[#allocation4] ss:$0 sm:$0xff] }
  0x12   :  { %209 = vmatpush.bf16.msra.mxu0 %v305_v23 }
  0x13   :  { %v320_v5 = vpop.eup %319 }
  0x14   :  { %v86_v6 = vmul.f32 32.0, %v320_v5  ;;  %vm90_vm1 = vweird.f32 %v320_v5 }
  0x16   :  { %83 = vadd.xlane.f32.xlu0 %v82_v3  ;;  %v87_v7 = vsub.f32 1.0, %v86_v6 }
  0x18   :  { %v88_v8 = vmul.f32 %v320_v5, %v87_v7 }
  0x1a   :  { %v89_v9 = vadd.f32 %v320_v5, %v88_v8 }
  0x1c   :  { %v91_v10 = vsel %vm90_vm1, %v320_v5, %v89_v9  ;;  %v315_v5 = vld [vmem:[%s529_s1] ss:$0 sm:$0xff] }
  0x81   :  { %v81_v11 = vpop.xlane.xlu0 %80 }
  0x82   :  { %v92_v12 = vmul.f32 %v91_v10, %v81_v11  ;;  %v316_v11 = vld [vmem:[#allocation2] ss:$0 sm:$0xff] }
  0x84   :  { %v483_v13 = vsub.f32 %v471_v0, %v92_v12 }
  0x86   :  { %v96_v14 = vmul.f32 %v483_v13, %v483_v13 }
  0x88   :  { %v98_v15 = vsel %vm78_vm0, %v96_v14, 0.0 }
  0x89   :  { %99 = vadd.xlane.f32.xlu1 %v98_v15  ;;  %v84_v16 = vpop.xlane.xlu0 %83 }
  0x8a   :  { %v93_v17 = vmul.f32 %v91_v10, %v84_v16 }
  0x8c   :  { %v489_v18 = vsub.f32 %v478_v2, %v93_v17  ;;  %v309_v17 = vld [vmem:[%s533_s5 + $0x10] sm:$0xff] }
  0x8e   :  { %v97_v19 = vmul.f32 %v489_v18, %v489_v18 }
  0x90   :  { %v101_v20 = vsel %vm78_vm0, %v97_v19, 0.0  ;;  %v307_v19 = vld [vmem:[%s533_s5] sm:$0xff] }
  0x91   :  { %102 = vadd.xlane.f32.xlu1 %v101_v20 }
  0xfc   :  { %v100_v22 = vpop.xlane.xlu1 %99 }
  0xfd   :  { %v104_v24 = vmul.f32 0.032258064, %v100_v22 }
  0xff   :  { %321 = vrsqrt.f32 %v104_v24  ;;  %vm113_vm2 = vcmp.eq.f32.partialorder %v104_v24, inf  ;;  %v116_v37 = vand.u32 2147483648, %v104_v24  ;;  %vm115_vm3 = vcmp.eq.f32.partialorder %v104_v24, 0.0 }
 0x104   :  { %v103_v25 = vpop.xlane.xlu1 %102 }
 0x105   :  { %v322_v26 = vpop.eup %321  ;;  %v105_v27 = vmul.f32 0.032258064, %v103_v25 }
 0x106   :  { %v107_v28 = vmul.f32 %v322_v26, %v104_v24 }
 0x107   :  { %323 = vrsqrt.f32 %v105_v27  ;;  %vm125_vm4 = vcmp.eq.f32.partialorder %v105_v27, inf  ;;  %v128_v45 = vand.u32 2147483648, %v105_v27  ;;  %vm127_vm5 = vcmp.eq.f32.partialorder %v105_v27, 0.0 }
 0x108   :  { %v108_v29 = vmul.f32 %v322_v26, %v107_v28  ;;  %v318_v28 = vld [vmem:[#allocation6] ss:$0 sm:$0xff] }
 0x10a   :  { %v109_v30 = vmul.f32 0.5, %v108_v29  ;;  %v177_v29 = vadd.f32 %v318_v28, %v471_v0 }
 0x10c   :  { %v110_v31 = vsub.f32 1.5, %v109_v30 }
 0x10d   :  { %v324_v32 = vpop.eup %323 }
 0x10e   :  { %v111_v33 = vmul.f32 %v322_v26, %v110_v31  ;;  %v119_v34 = vmul.f32 %v324_v32, %v105_v27 }
 0x110   :  { %v112_v35 = vmul.f32 %v111_v33, %v104_v24  ;;  %v120_v36 = vmul.f32 %v324_v32, %v119_v34 }
 0x112   :  { %v114_v38 = vsel %vm113_vm2, %v104_v24, %v112_v35  ;;  %v121_v39 = vmul.f32 0.5, %v120_v36 }
 0x113   :  { %v117_v40 = vsel %vm115_vm3, %v116_v37, %v114_v38 }
 0x114   :  { %v122_v41 = vsub.f32 1.5, %v121_v39  ;;  %v130_v42 = vadd.f32 1e-06, %v117_v40 }
 0x116   :  { %v123_v43 = vmul.f32 %v324_v32, %v122_v41  ;;  %325 = vrcp.f32 %v130_v42  ;;  %v143_v53 = vand.u32 2147483648, %v130_v42  ;;  %vm137_vm7 = vweird.f32 %v130_v42 }
 0x117   :  { %v141_v55 = vand.u32 2147483647, %v130_v42  ;;  %v178_v32 = vadd.f32 %v318_v28, %v478_v2 }
 0x118   :  { %v124_v44 = vmul.f32 %v123_v43, %v105_v27  ;;  %v144_v59 = vor.u32 1.1754944e-38, %v143_v53 }
 0x119   :  { %vm142_vm9 = vcmp.eq.f32.partialorder %v141_v55, 8.507059e+37 }
 0x11a   :  { %v126_v46 = vsel %vm125_vm4, %v105_v27, %v124_v44 }
 0x11b   :  { %v129_v47 = vsel %vm127_vm5, %v128_v45, %v126_v46 }
 0x11c   :  { %v326_v48 = vpop.eup %325  ;;  %v131_v49 = vadd.f32 1e-06, %v129_v47 }
 0x11d   :  { %v133_v50 = vmul.f32 %v326_v48, %v130_v42  ;;  %vm138_vm6 = vweird.f32 %v326_v48 }
 0x11e   :  { %327 = vrcp.f32 %v131_v49  ;;  %vm139_vm8 = vmor %vm137_vm7, %vm138_vm6  ;;  %v158_v62 = vand.u32 2147483648, %v131_v49  ;;  %v156_v1 = vand.u32 2147483647, %v131_v49  ;;  %vm152_vm11 = vweird.f32 %v131_v49 }
 0x11f   :  { %v134_v51 = vsub.f32 1.0, %v133_v50 }
 0x120   :  { %v159_v6 = vor.u32 1.1754944e-38, %v158_v62  ;;  %vm157_vm13 = vcmp.eq.f32.partialorder %v156_v1, 8.507059e+37 }
 0x121   :  { %v135_v52 = vmul.f32 %v326_v48, %v134_v51 }
 0x123   :  { %v136_v54 = vadd.f32 %v326_v48, %v135_v52 }
 0x124   :  { %v328_v56 = vpop.eup %327 }
 0x125   :  { %v140_v57 = vsel %vm139_vm8, %v326_v48, %v136_v54  ;;  %v148_v58 = vmul.f32 %v328_v56, %v131_v49  ;;  %vm153_vm10 = vweird.f32 %v328_v56 }
 0x126   :  { %v145_v61 = vsel %vm142_vm9, %v144_v59, %v140_v57  ;;  %vm154_vm12 = vmor %vm152_vm11, %vm153_vm10 }
 0x127   :  { %v149_v60 = vsub.f32 1.0, %v148_v58  ;;  %v146_v3 = vmul.f32 %v145_v61, %v483_v13  ;;  %v310_v13 = vld [vmem:[%s533_s5 + $0x18] sm:$0xff] }
 0x128   :  { %259 = vmatpush.bf16.msra.mxu1 %v310_v13 }
 0x129   :  { %v150_v63 = vmul.f32 %v328_v56, %v149_v60  ;;  %v165_v10 = vmul.f32 %v315_v5, %v146_v3 }
 0x12b   :  { %v151_v4 = vadd.f32 %v328_v56, %v150_v63  ;;  %v170_v14 = vadd.f32 %v316_v11, %v165_v10 }
 0x12c   :  { %260 = vmatpush.bf16.msra.mxu1 %v309_v17 }
 0x12d   :  { %v155_v7 = vsel %vm154_vm12, %v328_v56, %v151_v4 }
 0x12e   :  { %v160_v8 = vsel %vm157_vm13, %v159_v6, %v155_v7 }
 0x12f   :  { %v161_v9 = vmul.f32 %v160_v8, %v489_v18  ;;  %v308_v18 = vld [vmem:[%s533_s5 + $0x8] sm:$0xff] }
 0x130   :  { %261 = vmatpush.bf16.msra.mxu1 %v308_v18 }
 0x131   :  { %v166_v12 = vmul.f32 %v315_v5, %v161_v9 }
 0x133   :  { %v171_v15 = vadd.f32 %v316_v11, %v166_v12 }
 0x134   :  { %262 = vmatpush.bf16.msra.mxu1 %v307_v19 }
 0x135   :  { %v172_v16 = vpack.c.bf16 %v171_v15, %v170_v14 }
 0x137   :  { %287 = vmatmul.msk.bf16.vlgmr.msra.gmra.mxu0 %vm78_vm0, %v172_v16 }
 0x1b4   :  { %v211_v20 = vpop.f32.mrf.mxu0 }
 0x1b5   :  { %v212_v22 = vadd.f32 %v317_v21, %v211_v20 }
 0x1b7   :  { %v216_v25 = vmax.f32 %v212_v22, 0.0 }
 0x1bc   :  { %v213_v23 = vpop.f32.mrf.mxu0 }
 0x1bd   :  { %v214_v24 = vadd.f32 %v317_v21, %v213_v23 }
 0x1bf   :  { %v217_v26 = vmax.f32 %v214_v24, 0.0 }
 0x1c1   :  { %v218_v27 = vpack.c.bf16 %v217_v26, %v216_v25 }
 0x1c3   :  { %304 = vmatmul.msk.bf16.vlgmr.msra.gmra.mxu1 %vm251_vm14, %v218_v27 }
 0x240   :  { %v264_v30 = vpop.f32.mrf.mxu1 }
 0x241   :  { %v269_v31 = vadd.f32 %v264_v30, %v177_v29 }
 0x243   :  { %271 = vst.msk [vmem:[%s537_s9] sm:$0xff] %vm78_vm0, %v269_v31 }
 0x248   :  { %v266_v33 = vpop.f32.mrf.mxu1 }
 0x249   :  { %v270_v34 = vadd.f32 %v266_v33, %v178_v32 }
 0x24b   :  { %272 = vst.msk [vmem:[%s537_s9 + $0x8] sm:$0xff] %vm78_vm0, %v270_v34 }
 0x24c   :  { %277 = vsyncpa [#allocation3], 1 }
 0x24d   :  { %278 = vsyncpa [#allocation5], 1 }

// kernel: encoder_forward.9
= control target key start
LH: loop header
LB: loop body
LE: loop exit
PB: predicated region body
PF: predicated region fallthrough
CT: control target
= control target key end

     0   :  { %17 = vsyncpa [#allocation3], 0  ;;  %s746_s0 = inlined_call_operand.vmem [shape: f32[16,32], index: 0, kind: input, shape index: {}]   ;;  %s747_s1 = inlined_call_operand.hbm [shape: f32[1,32], index: 1, kind: input, shape index: {}]   ;;  %s748_s2 = inlined_call_operand.hbm [shape: f32[1,32], index: 2, kind: input, shape index: {}]   ;;  %s749_s3 = inlined_call_operand.vmem [shape: bf16[32,32], index: 3, kind: input, shape index: {}]   ;;  %s750_s4 = inlined_call_operand.hbm [shape: f32[1,32], index: 4, kind: input, shape index: {}]   ;;  %s751_s5 = inlined_call_operand.hbm [shape: bf16[32,32], index: 5, kind: input, shape index: {}]   ;;  %s752_s6 = inlined_call_operand.hbm [shape: f32[1,32], index: 6, kind: input, shape index: {}]   ;;  %s753_s7 = inlined_call_operand.hbm [shape: bf16[32,32], index: 7, kind: input, shape index: {}]   ;;  %s754_s8 = inlined_call_operand.hbm [shape: f32[1,32], index: 8, kind: input, shape index: {}]   ;;  %s755_s9 = inlined_call_operand.vmem [shape: bf16[16,32], index: 9, kind: output, shape index: {0}]   ;;  %s756_s10 = inlined_call_operand.vmem [shape: bf16[16,32], index: 10, kind: output, shape index: {1}]   ;;  %s757_s11 = inlined_call_operand.vmem [shape: bf16[16,32], index: 11, kind: output, shape index: {2}]  }
   0x1   :  { %18 = vsyncpa [#allocation5], 0 }
   0x2   :  { %19 = vsyncpa [#allocation8], 0  ;;  %s39_s19 = sshll.u32 %s748_s2, 4  ;;  %s40_s19 = int_to_ptr.hbm [resolvable:$true] %s39_s19 }
   0x3   :  { %20 = vsyncpa [#allocation11], 0  ;;  %s602_s20 = smov [#allocation4]   ;;  %s62_s24 = sshll.u32 %s751_s5, 4  ;;  %s63_s24 = int_to_ptr.hbm [resolvable:$true] %s62_s24 }
   0x4   :  { %s41_s21 = sshll.u32 %s602_s20, 4  ;;  %s603_s25 = smov [#allocation7]   ;;  %s42_s21 = int_to_ptr.vmem [resolvable:$true] %s41_s21 }
   0x5   :  { %44 = dma.hbm_to_vmem [thread:$0]  %s40_s19, 16, %s42_s21, [#allocation5]  }
   0x6   :  { %s64_s26 = sshll.u32 %s603_s25, 4  ;;  %s604_s27 = smov 64   ;;  %s65_s26 = int_to_ptr.vmem [resolvable:$true] %s64_s26 }
   0x7   :  { %s605_s28 = smov 4   ;;  %s86_s2 = sshll.u32 %s753_s7, 4  ;;  %s87_s2 = int_to_ptr.hbm [resolvable:$true] %s86_s2 }
   0x8   :  { %70 = dma.hbm_to_vmem [thread:$0]  %s63_s24, 256, %s65_s26, [#allocation8], %s604_s27, %s604_s27, %s605_s28  }
   0x9   :  { %s606_s12 = smov [#allocation10]   ;;  %s28_s5 = sshll.u32 %s747_s1, 4  ;;  %s29_s5 = int_to_ptr.hbm [resolvable:$true] %s28_s5 }
   0xa   :  { %s88_s13 = sshll.u32 %s606_s12, 4  ;;  %s607_s16 = smov [#allocation2]   ;;  %s89_s13 = int_to_ptr.vmem [resolvable:$true] %s88_s13 }
   0xb   :  { %94 = dma.hbm_to_vmem [thread:$0]  %s87_s2, 256, %s89_s13, [#allocation11], %s604_s27, %s604_s27, %s605_s28  }
   0xc   :  { %s30_s17 = sshll.u32 %s607_s16, 4  ;;  %s52_s20 = sshll.u32 %s750_s4, 4  ;;  %s31_s17 = int_to_ptr.vmem [resolvable:$true] %s30_s17  ;;  %s53_s20 = int_to_ptr.hbm [resolvable:$true] %s52_s20 }
   0xd   :  { %33 = dma.hbm_to_vmem [thread:$0]  %s29_s5, 16, %s31_s17, [#allocation3]  }
   0xe   :  { %s76_s22 = sshll.u32 %s752_s6, 4  ;;  %s608_s23 = smov [#allocation6]   ;;  %s77_s22 = int_to_ptr.hbm [resolvable:$true] %s76_s22 }
   0xf   :  { %s54_s24 = sshll.u32 %s608_s23, 4  ;;  %s609_s1 = smov [#allocation9]   ;;  %s55_s24 = int_to_ptr.vmem [resolvable:$true] %s54_s24 }
  0x10   :  { %57 = dma.hbm_to_vmem [thread:$0]  %s53_s20, 16, %s55_s24, [#allocation5]  }
  0x11   :  { %s78_s25 = sshll.u32 %s609_s1, 4  ;;  %s100_s28 = sshll.u32 %s754_s8, 4  ;;  %s79_s25 = int_to_ptr.vmem [resolvable:$true] %s78_s25  ;;  %s101_s28 = int_to_ptr.hbm [resolvable:$true] %s100_s28 }
  0x12   :  { %81 = dma.hbm_to_vmem [thread:$0]  %s77_s22, 16, %s79_s25, [#allocation8]  }
  0x13   :  { %s610_s4 = smov [#allocation12]  }
  0x14   :  { %s102_s29 = sshll.u32 %s610_s4, 4  ;;  %s103_s29 = int_to_ptr.vmem [resolvable:$true] %s102_s29 }
  0x15   :  { %105 = dma.hbm_to_vmem [thread:$0]  %s101_s28, 16, %s103_s29, [#allocation11]  }
  0x16   :  { %594 = dma.done.wait [#allocation3], 16  }
  0x17   :  { %595 = vsyncadd [#allocation3], 4294967280 }
  0x18   :  { %596 = dma.done.wait [#allocation5], 32  }
  0x19   :  { %597 = vsyncadd [#allocation5], 4294967264 }
  0x1a   :  { %598 = dma.done.wait [#allocation8], 272  }
  0x1b   :  { %599 = vsyncadd [#allocation8], 4294967024 }
  0x1c   :  { %600 = dma.done.wait [#allocation11], 272  }
  0x1d   :  { %601 = vsyncadd [#allocation11], 4294967024  ;;  %vm139_vm0 = vcmask 261120   ;;  %v135_v0 = vld [vmem:[%s746_s0] sm:$0xff]  ;;  %v136_v2 = vld [vmem:[%s746_s0 + $0x8] sm:$0xff]  ;;  %v611_v4 = vmov 32.0  }
  0x1e   :  { %v140_v1 = vsel %vm139_vm0, %v135_v0, 0.0  ;;  %v143_v3 = vsel %vm139_vm0, %v136_v2, 0.0  ;;  %416 = vrcp.f32 %v611_v4  ;;  %v396_v21 = vld [vmem:[%s749_s3 + $0x8] sm:$0xff]  ;;  %v400_v23 = vld [vmem:[#allocation10 + $0x8] sm:$0xff]  ;;  %v399_v28 = vld [vmem:[#allocation10] sm:$0xff]  ;;  %vm273_vm14 = vcmask 257024  }
  0x1f   :  { %141 = vadd.xlane.f32.xlu0 %v140_v1  ;;  %v398_v22 = vld [vmem:[#allocation7 + $0x8] sm:$0xff]  ;;  %263 = vmatpush.bf16.msra.mxu0 %v396_v21  ;;  %v395_v25 = vld [vmem:[%s749_s3] sm:$0xff] }
  0x20   :  { %302 = vmatpush.bf16.msra.mxu1 %v398_v22  ;;  %v397_v26 = vld [vmem:[#allocation7] sm:$0xff]  ;;  %340 = vmatpush.bf16.msra.mxu2 %v400_v23 }
  0x23   :  { %264 = vmatpush.bf16.msra.mxu0 %v395_v25 }
  0x24   :  { %v417_v5 = vpop.eup %416  ;;  %303 = vmatpush.bf16.msra.mxu1 %v397_v26  ;;  %341 = vmatpush.bf16.msra.mxu2 %v399_v28  ;;  %v415_v26 = vld [vmem:[#allocation12] ss:$0 sm:$0xff] }
  0x25   :  { %v147_v6 = vmul.f32 32.0, %v417_v5  ;;  %vm151_vm1 = vweird.f32 %v417_v5 }
  0x27   :  { %144 = vadd.xlane.f32.xlu0 %v143_v3  ;;  %v148_v7 = vsub.f32 1.0, %v147_v6 }
  0x29   :  { %v149_v8 = vmul.f32 %v417_v5, %v148_v7  ;;  %v411_v7 = vld [vmem:[#allocation2] ss:$0 sm:$0xff] }
  0x2b   :  { %v150_v9 = vadd.f32 %v417_v5, %v149_v8 }
  0x2d   :  { %v152_v10 = vsel %vm151_vm1, %v417_v5, %v150_v9 }
  0x92   :  { %v142_v11 = vpop.xlane.xlu0 %141 }
  0x93   :  { %v153_v12 = vmul.f32 %v152_v10, %v142_v11 }
  0x95   :  { %v701_v13 = vsub.f32 %v135_v0, %v153_v12 }
  0x97   :  { %v157_v14 = vmul.f32 %v701_v13, %v701_v13 }
  0x99   :  { %v159_v15 = vsel %vm139_vm0, %v157_v14, 0.0  ;;  %v412_v14 = vld [vmem:[#allocation4] ss:$0 sm:$0xff] }
  0x9a   :  { %160 = vadd.xlane.f32.xlu1 %v159_v15  ;;  %v145_v16 = vpop.xlane.xlu0 %144 }
  0x9b   :  { %v154_v17 = vmul.f32 %v152_v10, %v145_v16 }
  0x9d   :  { %v706_v18 = vsub.f32 %v136_v2, %v154_v17 }
  0x9f   :  { %v158_v19 = vmul.f32 %v706_v18, %v706_v18 }
  0xa1   :  { %v162_v20 = vsel %vm139_vm0, %v158_v19, 0.0 }
  0xa2   :  { %163 = vadd.xlane.f32.xlu1 %v162_v20  ;;  %v414_v20 = vld [vmem:[#allocation9] ss:$0 sm:$0xff] }
 0x10d   :  { %v161_v24 = vpop.xlane.xlu1 %160 }
 0x10e   :  { %v165_v27 = vmul.f32 0.032258064, %v161_v24 }
 0x110   :  { %418 = vrsqrt.f32 %v165_v27  ;;  %vm174_vm2 = vcmp.eq.f32.partialorder %v165_v27, inf  ;;  %v177_v41 = vand.u32 2147483648, %v165_v27  ;;  %vm176_vm3 = vcmp.eq.f32.partialorder %v165_v27, 0.0 }
 0x115   :  { %v164_v29 = vpop.xlane.xlu1 %163 }
 0x116   :  { %v419_v30 = vpop.eup %418  ;;  %v166_v31 = vmul.f32 0.032258064, %v164_v29 }
 0x117   :  { %v168_v32 = vmul.f32 %v419_v30, %v165_v27 }
 0x118   :  { %420 = vrsqrt.f32 %v166_v31  ;;  %vm186_vm4 = vcmp.eq.f32.partialorder %v166_v31, inf  ;;  %v189_v49 = vand.u32 2147483648, %v166_v31  ;;  %vm188_vm5 = vcmp.eq.f32.partialorder %v166_v31, 0.0 }
 0x119   :  { %v169_v33 = vmul.f32 %v419_v30, %v168_v32 }
 0x11b   :  { %v170_v34 = vmul.f32 0.5, %v169_v33 }
 0x11d   :  { %v171_v35 = vsub.f32 1.5, %v170_v34 }
 0x11e   :  { %v421_v36 = vpop.eup %420 }
 0x11f   :  { %v172_v37 = vmul.f32 %v419_v30, %v171_v35  ;;  %v180_v38 = vmul.f32 %v421_v36, %v166_v31 }
 0x121   :  { %v173_v39 = vmul.f32 %v172_v37, %v165_v27  ;;  %v181_v40 = vmul.f32 %v421_v36, %v180_v38 }
 0x123   :  { %v175_v42 = vsel %vm174_vm2, %v165_v27, %v173_v39  ;;  %v182_v43 = vmul.f32 0.5, %v181_v40 }
 0x124   :  { %v178_v44 = vsel %vm176_vm3, %v177_v41, %v175_v42 }
 0x125   :  { %v183_v45 = vsub.f32 1.5, %v182_v43  ;;  %v191_v46 = vadd.f32 1e-06, %v178_v44 }
 0x127   :  { %v184_v47 = vmul.f32 %v421_v36, %v183_v45  ;;  %422 = vrcp.f32 %v191_v46  ;;  %v204_v57 = vand.u32 2147483648, %v191_v46  ;;  %vm198_vm7 = vweird.f32 %v191_v46 }
 0x128   :  { %v202_v59 = vand.u32 2147483647, %v191_v46 }
 0x129   :  { %v185_v48 = vmul.f32 %v184_v47, %v166_v31  ;;  %v205_v63 = vor.u32 1.1754944e-38, %v204_v57 }
 0x12a   :  { %vm203_vm9 = vcmp.eq.f32.partialorder %v202_v59, 8.507059e+37 }
 0x12b   :  { %v187_v50 = vsel %vm186_vm4, %v166_v31, %v185_v48 }
 0x12c   :  { %v190_v51 = vsel %vm188_vm5, %v189_v49, %v187_v50 }
 0x12d   :  { %v423_v52 = vpop.eup %422  ;;  %v192_v53 = vadd.f32 1e-06, %v190_v51 }
 0x12e   :  { %v194_v54 = vmul.f32 %v423_v52, %v191_v46  ;;  %vm199_vm6 = vweird.f32 %v423_v52 }
 0x12f   :  { %424 = vrcp.f32 %v192_v53  ;;  %vm200_vm8 = vmor %vm198_vm7, %vm199_vm6  ;;  %v219_v2 = vand.u32 2147483648, %v192_v53  ;;  %v217_v4 = vand.u32 2147483647, %v192_v53  ;;  %vm213_vm11 = vweird.f32 %v192_v53 }
 0x130   :  { %v195_v55 = vsub.f32 1.0, %v194_v54 }
 0x131   :  { %v220_v8 = vor.u32 1.1754944e-38, %v219_v2  ;;  %vm218_vm13 = vcmp.eq.f32.partialorder %v217_v4, 8.507059e+37 }
 0x132   :  { %v196_v56 = vmul.f32 %v423_v52, %v195_v55 }
 0x134   :  { %v197_v58 = vadd.f32 %v423_v52, %v196_v56 }
 0x135   :  { %v425_v60 = vpop.eup %424 }
 0x136   :  { %v201_v61 = vsel %vm200_vm8, %v423_v52, %v197_v58  ;;  %v209_v62 = vmul.f32 %v425_v60, %v192_v53  ;;  %vm214_vm10 = vweird.f32 %v425_v60 }
 0x137   :  { %v206_v1 = vsel %vm203_vm9, %v205_v63, %v201_v61  ;;  %vm215_vm12 = vmor %vm213_vm11, %vm214_vm10 }
 0x138   :  { %v210_v0 = vsub.f32 1.0, %v209_v62  ;;  %v207_v5 = vmul.f32 %v206_v1, %v701_v13  ;;  %v413_v13 = vld [vmem:[#allocation6] ss:$0 sm:$0xff] }
 0x13a   :  { %v211_v3 = vmul.f32 %v425_v60, %v210_v0  ;;  %v226_v12 = vmul.f32 %v411_v7, %v207_v5 }
 0x13c   :  { %v212_v6 = vadd.f32 %v425_v60, %v211_v3  ;;  %v231_v16 = vadd.f32 %v412_v14, %v226_v12 }
 0x13e   :  { %v216_v9 = vsel %vm215_vm12, %v425_v60, %v212_v6 }
 0x13f   :  { %v221_v10 = vsel %vm218_vm13, %v220_v8, %v216_v9 }
 0x140   :  { %v222_v11 = vmul.f32 %v221_v10, %v706_v18 }
 0x142   :  { %v227_v15 = vmul.f32 %v411_v7, %v222_v11 }
 0x144   :  { %v232_v17 = vadd.f32 %v412_v14, %v227_v15 }
 0x146   :  { %v233_v19 = vpack.c.bf16 %v232_v17, %v231_v16 }
 0x148   :  { %376 = vmatmul.msk.bf16.vlgmr.msra.gmra.mxu0 %vm139_vm0, %v233_v19  ;;  %385 = vmatmul.msk.bf16.vlgmr.msra.gmra.mxu1 %vm139_vm0, %v233_v19 }
 0x149   :  { %394 = vmatmul.msk.bf16.vlgmr.msra.gmra.mxu2 %vm139_vm0, %v233_v19 }
 0x1c5   :  { %v266_v21 = vpop.f32.mrf.mxu0  ;;  %v305_v22 = vpop.f32.mrf.mxu1 }
 0x1c6   :  { %v267_v23 = vadd.f32 %v413_v13, %v266_v21  ;;  %v306_v24 = vadd.f32 %v414_v20, %v305_v22 }
 0x1c8   :  { %v271_v18 = vpack.c.bf16 %v267_v23, %v267_v23  ;;  %v310_v25 = vpack.c.bf16 %v306_v24, %v306_v24 }
 0x1ca   :  { %274 = vst.msk [vmem:[%s755_s9] sm:$0xf] %vm273_vm14, %v271_v18 }
 0x1cb   :  { %312 = vst.msk [vmem:[%s756_s10] sm:$0xf] %vm273_vm14, %v310_v25 }
 0x1cc   :  { %v343_v27 = vpop.f32.mrf.mxu2 }
 0x1cd   :  { %v344_v28 = vadd.f32 %v415_v26, %v343_v27  ;;  %v268_v29 = vpop.f32.mrf.mxu0  ;;  %v307_v30 = vpop.f32.mrf.mxu1 }
 0x1ce   :  { %v269_v31 = vadd.f32 %v413_v13, %v268_v29  ;;  %v308_v32 = vadd.f32 %v414_v20, %v307_v30 }
 0x1cf   :  { %v348_v33 = vpack.c.bf16 %v344_v28, %v344_v28 }
 0x1d0   :  { %v272_v34 = vpack.c.bf16 %v269_v31, %v269_v31  ;;  %v311_v35 = vpack.c.bf16 %v308_v32, %v308_v32 }
 0x1d1   :  { %350 = vst.msk [vmem:[%s757_s11] sm:$0xf] %vm273_vm14, %v348_v33 }
 0x1d2   :  { %275 = vst.msk [vmem:[%s755_s9 + $0x4] sm:$0xf] %vm273_vm14, %v272_v34 }
 0x1d3   :  { %313 = vst.msk [vmem:[%s756_s10 + $0x4] sm:$0xf] %vm273_vm14, %v311_v35 }
 0x1d4   :  { %v345_v36 = vpop.f32.mrf.mxu2 }
 0x1d5   :  { %v346_v37 = vadd.f32 %v415_v26, %v345_v36 }
 0x1d7   :  { %v349_v38 = vpack.c.bf16 %v346_v37, %v346_v37 }
 0x1d9   :  { %351 = vst.msk [vmem:[%s757_s11 + $0x4] sm:$0xf] %vm273_vm14, %v349_v38 }
 0x1da   :  { %364 = vsyncpa [#allocation3], 1 }
 0x1db   :  { %365 = vsyncpa [#allocation5], 1 }
 0x1dc   :  { %366 = vsyncpa [#allocation8], 1 }
 0x1dd   :  { %367 = vsyncpa [#allocation11], 1 }

// kernel: encoder_forward.10
= control target key start
LH: loop header
LB: loop body
LE: loop exit
PB: predicated region body
PF: predicated region fallthrough
CT: control target
= control target key end

     0   :  { %12 = vsyncpa [#allocation6], 0  ;;  %s1357_s24 = smov 0   ;;  %s1359_s25 = smov 0   ;;  %s1519_s0 = inlined_call_operand.vmem [shape: bf16[2,8,32], index: 0, kind: input, shape index: {}]   ;;  %s1520_s1 = inlined_call_operand.vmem [shape: bf16[2,8,32], index: 1, kind: input, shape index: {}]   ;;  %s1521_s2 = inlined_call_operand.vmem [shape: bf16[2,8,32], index: 2, kind: input, shape index: {}]   ;;  %s1522_s3 = inlined_call_operand.vmem [shape: bf16[2,8,8], index: 3, kind: input, shape index: {}]   ;;  %s1523_s4 = inlined_call_operand.hbm [shape: bf16[32,32], index: 4, kind: input, shape index: {}]   ;;  %s1524_s5 = inlined_call_operand.vmem [shape: f32[1,32], index: 5, kind: input, shape index: {}]   ;;  %s1525_s6 = inlined_call_operand.vmem [shape: f32[2,8,32], index: 6, kind: input, shape index: {}]   ;;  %s1526_s7 = inlined_call_operand.vmem [shape: f32[2,8,32], index: 7, kind: output, shape index: {}]  }
   0x1   :  { %s1361_s26 = smov 0  }
   0x2 LB: > { %s1152_s27 = sadd.s32 4294967295, %s1306_s26   ;;  %s37_s28 = sadd.s32 1, %s1302_s25  ;;  %s1306_s26 = sphi %s1361_s26, %s18_s26   ;;  %s1302_s25 = sphi %s1359_s25, %s1530_s25   ;;  %s1298_s24 = sphi %s1357_s24, %s1529_s24  }
   0x3   : > { %p39_p0 = scmp.ge.s32.totalorder %s37_s28, 2  ;;  %p1154_p1 = scmp.ge.s32.totalorder %s1306_s26, 1 }
   0x4   : > { %p254_p2 = scmp.lt.s32.totalorder %s1306_s26, 3  ;;  %p1187_p4 = scmp.eq.s32.totalorder %s1152_s27, 0 }
   0x5   : > { %s1532_s28 = smov (%p39_p0, %s37_s28), 0  ;;  %s265_s8 = sshll.u32 %s1523_s4, 4  ;;  %s266_s8 = int_to_ptr.hbm [resolvable:$true] %s265_s8 }
   0x6   : > { %p255_p3 = pnand %p1154_p1, %p254_p2  ;;  %s1308_s9 = smov [#allocation5]  }
   0x7   : > { %s267_s10 = sshll.u32 %s1308_s9, 4  ;;  %s1309_s11 = smov 64   ;;  %s268_s10 = int_to_ptr.vmem [resolvable:$true] %s267_s10 }
   0x8   : > { %p1183_p5 = pneg %p255_p3  ;;  %s1310_s12 = smov 4  }
   0x9   : > { %339 = sbr.rel (%p255_p3) target bundleno = 1185 (0x4a1), region = 48 }
   0xa   : > { %p1184_p6 = pnand %p1187_p4, %p1183_p5 }
   0xc   : > { %1186 = dma.hbm_to_vmem [thread:$0]  (!%p1184_p6), %s266_s8, 256, %s268_s10, [#allocation6], %s1309_s11, %s1309_s11, %s1310_s12  }
   0xe   : > { %1293 = dma.done.wait (%p1187_p4), [#allocation6], 256  }
   0xf   : > { %1295 = vsyncadd (%p1187_p4), [#allocation6], 4294967040  ;;  %p407_p7 = scmp.lt.s32.totalorder %s1298_s24, 1  ;;  %vm466_vm0 = vcmask 64512   ;;  %vm457_vm1 = vcmask 7168   ;;  %s1312_s23 = smov 104  }
  0x10   : > { %v1311_v3 = vmov -1e+30   ;;  %s1313_s27 = smov 112   ;;  %s1314_s29 = smov 120   ;;  %v1315_v16 = vmov 0   ;;  %v1316_v17 = vmov 0.0  }
  0x11   : > { %s1534_s24 = smov (!%p407_p7, %s1298_s24), 1  ;;  %458 = vst.msk [vmem:[#allocation2] sm:$0xff] %vm457_vm1, %v1311_v3  ;;  %1222 = vset.pattern.permute.xlu1 %v1315_v16  ;;  %1223 = vset.pattern.permute.xlu2 %v1315_v16  ;;  %vm534_vm3 = vcmask 1043456  }
  0x12   : > { %s1382_s13 = sshll.u32 %s1534_s24, 2  ;;  %459 = vst.msk [vmem:[#allocation2 + $0x8] sm:$0xff] %vm457_vm1, %v1311_v3  ;;  %1224 = vset.pattern.permute.xlu0 %v1315_v16  ;;  %s1163_s10 = sshll.u32 %s1534_s24, 3 }
  0x13   : > { %s420_s16 = scalar_lea.vmem %s1520_s1, %s1382_s13  ;;  %s413_s19 = scalar_lea.vmem %s1519_s0, %s1382_s13  ;;  %460 = vst.msk [vmem:[#allocation2 + $0x10] sm:$0xff] %vm457_vm1, %v1311_v3 }
  0x14   : > { %v472_v0 = vld [vmem:[%s420_s16] sm:$0xf]  ;;  %461 = vst.msk [vmem:[#allocation2 + $0x18] sm:$0xff] %vm457_vm1, %v1311_v3  ;;  %s437_s22 = scalar_lea.vmem %s1522_s3, %s1382_s13  ;;  %s427_s9 = scalar_lea.vmem %s1521_s2, %s1382_s13 }
  0x15   : > { %v480_v1 = vsel %vm466_vm0, %v472_v0, 0  ;;  %v471_v2 = vld [vmem:[%s413_s19] sm:$0xf]  ;;  %v560_v6 = vunpack.c.l.b16 %v472_v0  ;;  %462 = vst.msk [vmem:[#allocation3] sm:$0xff] %vm457_vm1, %v1316_v17  ;;  %s444_s13 = scalar_lea.vmem %s1525_s6, %s1163_s10  ;;  %s451_s24 = scalar_lea.vmem %s1526_s7, %s1163_s10 }
  0x16   : > { %489 = vmatpush.bf16.xpose.msra.mxu0 %v480_v1  ;;  %v474_v4 = vld [vmem:[%s437_s22] sm:$0xf]  ;;  %v555_v14 = vunpack.c.l.b16 %v471_v2  ;;  %463 = vst.msk [vmem:[#allocation3 + $0x8] sm:$0xff] %vm457_vm1, %v1316_v17 }
  0x17   : > { %v496_v5 = vunpack.c.l.bf16 %v474_v4  ;;  %v561_v10 = vpack.c.b16 %v560_v6, %v560_v6  ;;  %464 = vst.msk [vmem:[#allocation3 + $0x10] sm:$0xff] %vm457_vm1, %v1316_v17  ;;  %v473_v26 = vld [vmem:[%s427_s9] sm:$0xf] }
  0x18   : > { %v556_v15 = vpack.c.b16 %v555_v14, %v555_v14  ;;  %465 = vst.msk [vmem:[#allocation3 + $0x18] sm:$0xff] %vm457_vm1, %v1316_v17  ;;  %v1421_v18 = vld [vmem:[#allocation2] sm:$0xff]  ;;  %v536_v27 = vsel %vm534_vm3, %v473_v26, 0  ;;  %v620_v54 = vunpack.c.l.b16 %v473_v26 }
  0x19   : > { %vm1402_vm2 = vcmp.eq.f32.partialorder %v496_v5, 0.0  ;;  %731 = vrot.lane.b32.xlu2 %v561_v10, %s1312_s23  ;;  %467 = vst.msk [vmem:[#allocation4] sm:$0xff] %vm466_vm0, %v1316_v17  ;;  %545 = vmatpush.bf16.msra.mxu1 %v536_v27  ;;  %v1461_v57 = vld [vmem:[#allocation2 + $0x8] sm:$0xff] }
  0x1a   : > { %468 = vst.msk [vmem:[#allocation4 + $0x8] sm:$0xff] %vm466_vm0, %v1316_v17  ;;  %v621_v56 = vpack.c.b16 %v620_v54, %v620_v54  ;;  %v672_v1 = vld [vmem:[#allocation2 + $0x10] sm:$0xff] }
  0x1b   : > { %469 = vst.msk [vmem:[#allocation4 + $0x10] sm:$0xff] %vm466_vm0, %v1316_v17  ;;  %v755_v59 = vld [vmem:[#allocation2 + $0x18] sm:$0xff] }
  0x1c   : > { %470 = vst.msk [vmem:[#allocation4 + $0x18] sm:$0xff] %vm466_vm0, %v1316_v17 }
  0x1d   : > { %1165 = vmatmul.msk.bf16.vlgmr.msra.gmra.mxu0 %vm466_vm0, %v471_v2 }
  0x21   : > { %648 = vrot.lane.b32.xlu2 %v561_v10, %s1313_s27 }
  0x29   : > { %646 = vrot.lane.b32.xlu2 %v556_v15, %s1313_s27 }
  0x73   : > { %v732_v24 = vpop.permute.xlu2 %731 }
  0x74   : > { %v737_v25 = vsel %vm466_vm0, %v732_v24, 0 }
  0x75   : > { %746 = vmatpush.bf16.xpose.msrb.mxu0 %v737_v25 }
  0x7b   : > { %v649_v28 = vpop.permute.xlu2 %648 }
  0x7c   : > { %v654_v29 = vsel %vm466_vm0, %v649_v28, 0 }
  0x7d   : > { %663 = vmatpush.bf16.xpose.msrb.mxu1 %v654_v29 }
  0x83   : > { %v647_v37 = vpop.permute.xlu2 %646 }
  0x9a   : > { %v491_v7 = vpop.f32.mrf.mxu0 }
  0x9b   : > { %v495_v9 = vmul.f32 0.35355338, %v491_v7 }
  0x9d   : > { %v498_v11 = vsel %vm1402_vm2, -1e+09, %v495_v9 }
  0x9e   : > { %v500_v12 = vsel %vm466_vm0, %v498_v11, -inf }
  0x9f   : > { %501 = vmax.xlane.f32.xlu0 %v500_v12 }
  0xa2   : > { %v493_v13 = vpop.f32.mrf.mxu0 }
  0xb3   : > { %562 = vrot.lane.b32.xlu0 %v561_v10, %s1314_s29 }
 0x112   : > { %v502_v19 = vpop.xlane.xlu0 %501 }
 0x113   : > { %v1424_v20 = vmax.f32 %v1421_v18, %v502_v19 }
 0x115   : > { %v504_v21 = vsub.f32 %v1421_v18, %v1424_v20  ;;  %553 = vst.msk [vmem:[#allocation2] sm:$0xff] %vm457_vm1, %v1424_v20  ;;  %509 = vperm.xlu1 %1222, %v1424_v20  }
 0x117   : > { %v505_v6 = vmul.f32 1.442695, %v504_v21 }
 0x11d   : > { %557 = vrot.lane.b32.xlu1 %v556_v15, %s1314_s29 }
 0x125   : > { %729 = vrot.lane.b32.xlu1 %v556_v15, %s1312_s23  ;;  %v563_v22 = vpop.permute.xlu0 %562 }
 0x126   : > { %v568_v23 = vsel %vm466_vm0, %v563_v22, 0 }
 0x127   : > { %577 = vmatpush.bf16.xpose.msra.mxu2 %v568_v23 }
 0x187   : > { %v510_v30 = vpop.permute.xlu1 %509 }
 0x188   : > { %v512_v31 = vsub.f32 %v498_v11, %v510_v30 }
 0x18a   : > { %v513_v32 = vmul.f32 1.442695, %v512_v31 }
 0x18c   : > { %1226 = vpow2.f32 %v513_v32 }
 0x18d   : > { %1228 = vpow2.f32 %v505_v6 }
 0x18f   : > { %v558_v33 = vpop.permute.xlu1 %557 }
 0x190   : > { %1167 = vmatmul.msk.bf16.vlgmr.msra.gmra.mxu2 %vm466_vm0, %v558_v33 }
 0x192   : > { %v1227_v34 = vpop.eup %1226 }
 0x193   : > { %v530_v35 = vpack.c.bf16 %v1227_v34, %v1227_v34  ;;  %v517_v5 = vsel %vm466_vm0, %v1227_v34, 0.0  ;;  %v1229_v7 = vpop.eup %1228 }
 0x195   : > { %1166 = vmatmul.msk.bf16.vlgmr.msra.gmra.mxu1 %vm466_vm0, %v530_v35 }
 0x197   : > { %v730_v36 = vpop.permute.xlu1 %729 }
 0x198   : > { %1171 = vmatmul.msk.bf16.vlgmr.msrb.gmra.mxu0 %vm466_vm0, %v730_v36 }
 0x1a5   : > { %1169 = vmatmul.msk.bf16.vlgmr.msrb.gmra.mxu1 %vm466_vm0, %v647_v37  ;;  %v515_v37 = vld [vmem:[#allocation3] sm:$0xff] }
 0x212   : > { %v1445_v38 = vpop.f32.mrf.mxu1 }
 0x213   : > { %v579_v39 = vpop.f32.mrf.mxu2 }
 0x214   : > { %v583_v40 = vmul.f32 0.35355338, %v579_v39  ;;  %v516_v39 = vmul.f32 %v1229_v7, %v515_v37 }
 0x215   : > { %v748_v41 = vpop.f32.mrf.mxu0 }
 0x216   : > { %v752_v42 = vmul.f32 0.35355338, %v748_v41  ;;  %v584_v43 = vsel %vm1402_vm2, -1e+09, %v583_v40 }
 0x217   : > { %v587_v44 = vsel %vm466_vm0, %v584_v43, -inf }
 0x218   : > { %588 = vmax.xlane.f32.xlu1 %v587_v44  ;;  %v1452_v45 = vsel %vm1402_vm2, -1e+09, %v752_v42 }
 0x219   : > { %v756_v46 = vsel %vm466_vm0, %v1452_v45, -inf }
 0x21a   : > { %v549_v47 = vpop.f32.mrf.mxu1  ;;  %757 = vmax.xlane.f32.xlu2 %v756_v46 }
 0x21b   : > { %v581_v48 = vpop.f32.mrf.mxu2 }
 0x21d   : > { %v750_v49 = vpop.f32.mrf.mxu0 }
 0x222   : > { %v665_v50 = vpop.f32.mrf.mxu1 }
 0x223   : > { %v669_v51 = vmul.f32 0.35355338, %v665_v50 }
 0x225   : > { %v670_v52 = vsel %vm1402_vm2, -1e+09, %v669_v51 }
 0x226   : > { %v673_v53 = vsel %vm466_vm0, %v670_v52, -inf }
 0x227   : > { %674 = vmax.xlane.f32.xlu0 %v673_v53 }
 0x22a   : > { %v667_v55 = vpop.f32.mrf.mxu1 }
 0x231   : > { %622 = vrot.lane.b32.xlu1 %v621_v56, %s1314_s29 }
 0x239   : > { %788 = vrot.lane.b32.xlu1 %v621_v56, %s1312_s23 }
 0x28b   : > { %v589_v58 = vpop.xlane.xlu1 %588 }
 0x28c   : > { %v590_v60 = vmax.f32 %v1461_v57, %v589_v58  ;;  %v603_v58 = vld [vmem:[#allocation3 + $0x8] sm:$0xff] }
 0x28d   : > { %v758_v61 = vpop.xlane.xlu2 %757 }
 0x28e   : > { %v591_v62 = vsub.f32 %v1461_v57, %v590_v60  ;;  %645 = vst.msk [vmem:[#allocation2 + $0x8] sm:$0xff] %vm457_vm1, %v590_v60  ;;  %v759_v63 = vmax.f32 %v755_v59, %v758_v61  ;;  %596 = vperm.xlu2 %1223, %v590_v60  }
 0x290   : > { %v760_v0 = vsub.f32 %v755_v59, %v759_v63  ;;  %811 = vst.msk [vmem:[#allocation2 + $0x18] sm:$0xff] %vm457_vm1, %v759_v63  ;;  %765 = vperm.xlu0 %1224, %v759_v63   ;;  %v592_v34 = vmul.f32 1.442695, %v591_v62  ;;  %v689_v62 = vld [vmem:[#allocation3 + $0x10] sm:$0xff] }
 0x292   : > { %v761_v32 = vmul.f32 1.442695, %v760_v0 }
 0x29a   : > { %v675_v2 = vpop.xlane.xlu0 %674 }
 0x29b   : > { %v676_v3 = vmax.f32 %v672_v1, %v675_v2 }
 0x29d   : > { %v677_v4 = vsub.f32 %v672_v1, %v676_v3  ;;  %728 = vst.msk [vmem:[#allocation2 + $0x10] sm:$0xff] %vm457_vm1, %v676_v3  ;;  %682 = vperm.xlu2 %1223, %v676_v3  }
 0x29f   : > { %v678_v35 = vmul.f32 1.442695, %v677_v4 }
 0x2a3   : > { %v623_v8 = vpop.permute.xlu1 %622 }
 0x2a4   : > { %v628_v9 = vsel %vm534_vm3, %v623_v8, 0 }
 0x2a5   : > { %705 = vrot.lane.b32.xlu2 %v621_v56, %s1313_s27  ;;  %637 = vmatpush.bf16.msra.mxu3 %v628_v9 }
 0x2ab   : > { %v789_v10 = vpop.permute.xlu1 %788 }
 0x2ac   : > { %v794_v12 = vsel %vm534_vm3, %v789_v10, 0 }
 0x2ad   : > { %803 = vmatpush.bf16.msrb.mxu2 %v794_v12 }
 0x2ba   : > { %518 = vadd.xlane.f32.xlu0 %v517_v5 }
 0x2ce   : > { %526 = vperm.xlu0 %1224, %v1229_v7   ;;  %v772_v7 = vld [vmem:[#allocation3 + $0x18] sm:$0xff] }
 0x2e8   : > { %v597_v11 = vpop.permute.xlu2 %596 }
 0x2e9   : > { %v599_v13 = vsub.f32 %v584_v43, %v597_v11 }
 0x2eb   : > { %v600_v14 = vmul.f32 1.442695, %v599_v13 }
 0x2ed   : > { %1230 = vpow2.f32 %v600_v14 }
 0x2f3   : > { %v1231_v15 = vpop.eup %1230 }
 0x2f4   : > { %v605_v16 = vsel %vm466_vm0, %v1231_v15, 0.0  ;;  %v618_v17 = vpack.c.bf16 %v1231_v15, %v1231_v15 }
 0x2f5   : > { %606 = vadd.xlane.f32.xlu1 %v605_v16 }
 0x2f6   : > { %1168 = vmatmul.msk.bf16.vlgmr.msra.gmra.mxu3 %vm466_vm0, %v618_v17 }
 0x2f7   : > { %v683_v18 = vpop.permute.xlu2 %682 }
 0x2f8   : > { %v685_v19 = vsub.f32 %v670_v52, %v683_v18 }
 0x2fa   : > { %v686_v20 = vmul.f32 1.442695, %v685_v19  ;;  %v844_v19 = vld [vmem:[#allocation5] sm:$0xf] }
 0x2fc   : > { %1232 = vpow2.f32 %v686_v20  ;;  %v849_v20 = vsel %vm534_vm3, %v844_v19, 0 }
 0x2fd   : > { %858 = vmatpush.bf16.msra.mxu1 %v849_v20 }
 0x2ff   : > { %v706_v21 = vpop.permute.xlu2 %705 }
 0x300   : > { %v711_v22 = vsel %vm534_vm3, %v706_v21, 0 }
 0x301   : > { %720 = vmatpush.bf16.msrb.mxu3 %v711_v22  ;;  %v611_v22 = vld [vmem:[#allocation4 + $0x8] sm:$0xff] }
 0x302   : > { %v1233_v23 = vpop.eup %1232  ;;  %v766_v24 = vpop.permute.xlu0 %765 }
 0x303   : > { %v768_v25 = vsub.f32 %v1452_v45, %v766_v24  ;;  %v691_v26 = vsel %vm466_vm0, %v1233_v23, 0.0  ;;  %v704_v27 = vpack.c.bf16 %v1233_v23, %v1233_v23  ;;  %v523_v45 = vld [vmem:[#allocation4] sm:$0xff] }
 0x304   : > { %692 = vadd.xlane.f32.xlu1 %v691_v26 }
 0x305   : > { %v769_v28 = vmul.f32 1.442695, %v768_v25 }
 0x306   : > { %1170 = vmatmul.msk.bf16.vlgmr.msrb.gmra.mxu3 %vm466_vm0, %v704_v27 }
 0x307   : > { %1234 = vpow2.f32 %v769_v28 }
 0x308   : > { %1236 = vpow2.f32 %v761_v32 }
 0x309   : > { %1238 = vpow2.f32 %v592_v34 }
 0x30a   : > { %1240 = vpow2.f32 %v678_v35 }
 0x30d   : > { %v1235_v29 = vpop.eup %1234 }
 0x30e   : > { %v774_v30 = vsel %vm466_vm0, %v1235_v29, 0.0  ;;  %v787_v31 = vpack.c.bf16 %v1235_v29, %v1235_v29  ;;  %v1237_v33 = vpop.eup %1236 }
 0x30f   : > { %775 = vadd.xlane.f32.xlu2 %v774_v30  ;;  %v1239_v36 = vpop.eup %1238  ;;  %v773_v12 = vmul.f32 %v1237_v33, %v772_v7 }
 0x310   : > { %1172 = vmatmul.msk.bf16.vlgmr.msrb.gmra.mxu2 %vm466_vm0, %v787_v31  ;;  %v1241_v41 = vpop.eup %1240  ;;  %v604_v59 = vmul.f32 %v1239_v36, %v603_v58 }
 0x311   : > { %v690_v63 = vmul.f32 %v1241_v41, %v689_v62  ;;  %v888_v62 = vld [vmem:[#allocation5 + $0x4] sm:$0xf] }
 0x31d   : > { %783 = vperm.xlu1 %1222, %v1237_v33   ;;  %v780_v33 = vld [vmem:[#allocation4 + $0x18] sm:$0xff] }
 0x327   : > { %614 = vperm.xlu2 %1223, %v1239_v36   ;;  %v697_v36 = vld [vmem:[#allocation4 + $0x10] sm:$0xff] }
 0x32d   : > { %v519_v40 = vpop.xlane.xlu0 %518 }
 0x32e   : > { %v520_v42 = vadd.f32 %v519_v40, %v516_v39 }
 0x32f   : > { %700 = vperm.xlu2 %1223, %v1241_v41  }
 0x330   : > { %522 = vst.msk [vmem:[#allocation3] sm:$0xff] %vm457_vm1, %v520_v42 }
 0x337   : > { %v821_v43 = vld [vmem:[#allocation3] sm:$0xff] }
 0x338   : > { %1242 = vrcp.f32 %v821_v43  ;;  %v833_v50 = vand.u32 2147483648, %v821_v43  ;;  %v831_v53 = vand.u32 2147483647, %v821_v43  ;;  %vm827_vm5 = vweird.f32 %v821_v43 }
 0x33a   : > { %v834_v55 = vor.u32 1.1754944e-38, %v833_v50  ;;  %vm832_vm7 = vcmp.eq.f32.partialorder %v831_v53, 8.507059e+37 }
 0x33e   : > { %v1243_v44 = vpop.eup %1242 }
 0x33f   : > { %v823_v46 = vmul.f32 %v1243_v44, %v821_v43  ;;  %vm828_vm4 = vweird.f32 %v1243_v44 }
 0x340   : > { %v527_v47 = vpop.permute.xlu0 %526  ;;  %vm829_vm6 = vmor %vm827_vm5, %vm828_vm4 }
 0x341   : > { %v529_v48 = vmul.f32 %v527_v47, %v523_v45  ;;  %v824_v49 = vsub.f32 1.0, %v823_v46 }
 0x343   : > { %v551_v51 = vadd.f32 %v1445_v38, %v529_v48  ;;  %v825_v52 = vmul.f32 %v1243_v44, %v824_v49 }
 0x345   : > { %552 = vst.msk [vmem:[#allocation4] sm:$0xff] %vm466_vm0, %v551_v51  ;;  %v826_v54 = vadd.f32 %v1243_v44, %v825_v52 }
 0x347   : > { %v830_v56 = vsel %vm829_vm6, %v1243_v44, %v826_v54 }
 0x348   : > { %v835_v57 = vsel %vm832_vm7, %v834_v55, %v830_v56 }
 0x349   : > { %839 = vperm.xlu2 %1223, %v835_v57  }
 0x368   : > { %v607_v60 = vpop.xlane.xlu1 %606 }
 0x369   : > { %v608_v61 = vadd.f32 %v607_v60, %v604_v59  ;;  %v836_v59 = vld [vmem:[#allocation4] sm:$0xff] }
 0x36b   : > { %609 = vst.msk [vmem:[#allocation3 + $0x8] sm:$0xff] %vm457_vm1, %v608_v61 }
 0x372   : > { %v865_v38 = vld [vmem:[#allocation3 + $0x8] sm:$0xff] }
 0x373   : > { %1244 = vrcp.f32 %v865_v38  ;;  %v877_v6 = vand.u32 2147483648, %v865_v38  ;;  %v875_v9 = vand.u32 2147483647, %v865_v38  ;;  %vm871_vm9 = vweird.f32 %v865_v38 }
 0x375   : > { %v878_v13 = vor.u32 1.1754944e-38, %v877_v6  ;;  %vm876_vm11 = vcmp.eq.f32.partialorder %v875_v9, 8.507059e+37 }
 0x377   : > { %v693_v0 = vpop.xlane.xlu1 %692 }
 0x378   : > { %v694_v1 = vadd.f32 %v693_v0, %v690_v63  ;;  %v893_v63 = vsel %vm534_vm3, %v888_v62, 0  ;;  %v976_v0 = vld [vmem:[#allocation5 + $0xc] sm:$0xf] }
 0x379   : > { %v1245_v2 = vpop.eup %1244  ;;  %v639_v3 = vpop.f32.mrf.mxu3  ;;  %902 = vmatpush.bf16.msra.mxu3 %v893_v63 }
 0x37a   : > { %695 = vst.msk [vmem:[#allocation3 + $0x10] sm:$0xff] %vm457_vm1, %v694_v1  ;;  %v867_v4 = vmul.f32 %v1245_v2, %v865_v38  ;;  %vm872_vm8 = vweird.f32 %v1245_v2  ;;  %v981_v1 = vsel %vm534_vm3, %v976_v0, 0 }
 0x37b   : > { %vm873_vm10 = vmor %vm871_vm9, %vm872_vm8  ;;  %990 = vmatpush.bf16.msra.mxu2 %v981_v1 }
 0x37c   : > { %v868_v5 = vsub.f32 1.0, %v867_v4 }
 0x37e   : > { %v869_v8 = vmul.f32 %v1245_v2, %v868_v5 }
 0x380   : > { %v870_v10 = vadd.f32 %v1245_v2, %v869_v8 }
 0x381   : > { %v641_v11 = vpop.f32.mrf.mxu3  ;;  %v909_v14 = vld [vmem:[#allocation3 + $0x10] sm:$0xff] }
 0x382   : > { %v776_v15 = vpop.xlane.xlu2 %775  ;;  %v874_v16 = vsel %vm873_vm10, %v1245_v2, %v870_v10  ;;  %1246 = vrcp.f32 %v909_v14  ;;  %v919_v28 = vand.u32 2147483647, %v909_v14  ;;  %v921_v29 = vand.u32 2147483648, %v909_v14  ;;  %v932_v2 = vld [vmem:[#allocation5 + $0x8] sm:$0xf] }
 0x383   : > { %v777_v17 = vadd.f32 %v776_v15, %v773_v12  ;;  %v879_v18 = vsel %vm876_vm11, %v878_v13, %v874_v16  ;;  %vm915_vm13 = vweird.f32 %v909_v14 }
 0x384   : > { %883 = vperm.xlu0 %1224, %v879_v18   ;;  %v922_v37 = vor.u32 1.1754944e-38, %v921_v29  ;;  %vm920_vm15 = vcmp.eq.f32.partialorder %v919_v28, 8.507059e+37 }
 0x385   : > { %778 = vst.msk [vmem:[#allocation3 + $0x18] sm:$0xff] %vm457_vm1, %v777_v17 }
 0x388   : > { %v1247_v21 = vpop.eup %1246 }
 0x389   : > { %v722_v23 = vpop.f32.mrf.mxu3  ;;  %v911_v24 = vmul.f32 %v1247_v21, %v909_v14  ;;  %vm916_vm12 = vweird.f32 %v1247_v21 }
 0x38a   : > { %v615_v25 = vpop.permute.xlu2 %614  ;;  %vm917_vm14 = vmor %vm915_vm13, %vm916_vm12 }
 0x38b   : > { %v617_v26 = vmul.f32 %v615_v25, %v611_v22  ;;  %v912_v27 = vsub.f32 1.0, %v911_v24  ;;  %v815_v22 = vld [vmem:[%s444_s13] sm:$0xff] }
 0x38c   : > { %v953_v30 = vld [vmem:[#allocation3 + $0x18] sm:$0xff] }
 0x38d   : > { %v643_v31 = vadd.f32 %v639_v3, %v617_v26  ;;  %v913_v32 = vmul.f32 %v1247_v21, %v912_v27  ;;  %1248 = vrcp.f32 %v953_v30  ;;  %v965_v51 = vand.u32 2147483648, %v953_v30 }
 0x38e   : > { %v963_v53 = vand.u32 2147483647, %v953_v30  ;;  %vm959_vm2 = vweird.f32 %v953_v30  ;;  %v937_v3 = vsel %vm534_vm3, %v932_v2, 0 }
 0x38f   : > { %644 = vst.msk [vmem:[#allocation4 + $0x8] sm:$0xff] %vm466_vm0, %v643_v31  ;;  %v784_v34 = vpop.permute.xlu1 %783  ;;  %v914_v35 = vadd.f32 %v1247_v21, %v913_v32  ;;  %v966_v56 = vor.u32 1.1754944e-38, %v965_v51  ;;  %946 = vmatpush.bf16.msra.mxu0 %v937_v3 }
 0x390   : > { %v786_v41 = vmul.f32 %v784_v34, %v780_v33  ;;  %vm964_vm5 = vcmp.eq.f32.partialorder %v963_v53, 8.507059e+37 }
 0x391   : > { %v724_v39 = vpop.f32.mrf.mxu3  ;;  %v918_v40 = vsel %vm917_vm14, %v1247_v21, %v914_v35  ;;  %v1225_v21 = vld [vmem:[%s1524_s5] ss:$0 sm:$0xff] }
 0x392   : > { %v701_v42 = vpop.permute.xlu2 %700  ;;  %v923_v43 = vsel %vm920_vm15, %v922_v37, %v918_v40 }
 0x393   : > { %v1249_v44 = vpop.eup %1248  ;;  %v703_v45 = vmul.f32 %v701_v42, %v697_v36  ;;  %v805_v46 = vpop.f32.mrf.mxu2  ;;  %927 = vperm.xlu0 %1224, %v923_v43  }
 0x394   : > { %v809_v47 = vadd.f32 %v805_v46, %v786_v41  ;;  %v955_v48 = vmul.f32 %v1249_v44, %v953_v30  ;;  %vm960_vm1 = vweird.f32 %v1249_v44 }
 0x395   : > { %v726_v49 = vadd.f32 %v722_v23, %v703_v45  ;;  %vm961_vm4 = vmor %vm959_vm2, %vm960_vm1  ;;  %v820_v23 = vadd.f32 %v1225_v21, %v815_v22 }
 0x396   : > { %810 = vst.msk [vmem:[#allocation4 + $0x18] sm:$0xff] %vm466_vm0, %v809_v47  ;;  %v956_v50 = vsub.f32 1.0, %v955_v48  ;;  %v880_v4 = vld [vmem:[#allocation4 + $0x8] sm:$0xff] }
 0x397   : > { %727 = vst.msk [vmem:[#allocation4 + $0x10] sm:$0xff] %vm466_vm0, %v726_v49 }
 0x398   : > { %v957_v52 = vmul.f32 %v1249_v44, %v956_v50 }
 0x39a   : > { %v958_v54 = vadd.f32 %v1249_v44, %v957_v52 }
 0x39b   : > { %v807_v55 = vpop.f32.mrf.mxu2 }
 0x39c   : > { %v962_v57 = vsel %vm961_vm4, %v1249_v44, %v958_v54 }
 0x39d   : > { %v967_v58 = vsel %vm964_vm5, %v966_v56, %v962_v57  ;;  %v968_v12 = vld [vmem:[#allocation4 + $0x18] sm:$0xff] }
 0x39e   : > { %971 = vperm.xlu1 %1222, %v967_v58   ;;  %v924_v8 = vld [vmem:[#allocation4 + $0x10] sm:$0xff] }
 0x3a3   : > { %v840_v60 = vpop.permute.xlu2 %839 }
 0x3a4   : > { %v842_v61 = vmul.f32 %v840_v60, %v836_v59 }
 0x3a6   : > { %v843_v38 = vpack.c.bf16 %v842_v61, %v842_v61 }
 0x3a8   : > { %1173 = vmatmul.msk.bf16.vlgmr.msra.gmra.mxu1 %vm466_vm0, %v843_v38 }
 0x3f6   : > { %v884_v5 = vpop.permute.xlu0 %883 }
 0x3f7   : > { %v886_v6 = vmul.f32 %v884_v5, %v880_v4 }
 0x3f9   : > { %v887_v7 = vpack.c.bf16 %v886_v6, %v886_v6 }
 0x3fb   : > { %1174 = vmatmul.msk.bf16.vlgmr.msra.gmra.mxu3 %vm466_vm0, %v887_v7 }
 0x405   : > { %v928_v9 = vpop.permute.xlu0 %927 }
 0x406   : > { %v930_v10 = vmul.f32 %v928_v9, %v924_v8 }
 0x408   : > { %v931_v11 = vpack.c.bf16 %v930_v10, %v930_v10 }
 0x40a   : > { %1175 = vmatmul.msk.bf16.vlgmr.msra.gmra.mxu0 %vm466_vm0, %v931_v11 }
 0x410   : > { %v972_v13 = vpop.permute.xlu1 %971 }
 0x411   : > { %v974_v14 = vmul.f32 %v972_v13, %v968_v12 }
 0x413   : > { %v975_v15 = vpack.c.bf16 %v974_v14, %v974_v14 }
 0x415   : > { %1176 = vmatmul.msk.bf16.vlgmr.msra.gmra.mxu2 %vm466_vm0, %v975_v15  ;;  %vm997_vm0 = vcmask 261120  }
 0x425   : > { %v860_v16 = vpop.f32.mrf.mxu1 }
 0x426   : > { %v864_v25 = vadd.f32 %v860_v16, %v820_v23 }
 0x42d   : > { %v862_v17 = vpop.f32.mrf.mxu1 }
 0x47e   : > { %v904_v18 = vpop.f32.mrf.mxu3 }
 0x47f   : > { %v908_v26 = vadd.f32 %v904_v18, %v864_v25 }
 0x486   : > { %v906_v19 = vpop.f32.mrf.mxu3 }
 0x487   : > { %v948_v20 = vpop.f32.mrf.mxu0 }
 0x488   : > { %v952_v27 = vadd.f32 %v948_v20, %v908_v26 }
 0x48f   : > { %v950_v24 = vpop.f32.mrf.mxu0 }
 0x498   : > { %v992_v28 = vpop.f32.mrf.mxu2 }
 0x499   : > { %v996_v29 = vadd.f32 %v992_v28, %v952_v27 }
 0x49b   : > { %998 = vst.msk [vmem:[%s451_s24] sm:$0xff] %vm997_vm0, %v996_v29 }
 0x4a0   : > { %v994_v30 = vpop.f32.mrf.mxu2 }
 0x4a1 PF: > { %s18_s26 = sadd.s32 1, %s1306_s26   ;;  %s1529_s24 = smov %s1302_s25 }
 0x4a2   : > { %p15_p8 = scmp.ge.s32.totalorder %s18_s26, 4   ;;  %s1530_s25 = smov %s1532_s28 }
 0x4a4   :  { %17 = sbr.rel (!%p15_p8) target bundleno = 2 (0x2), region = 112 }
 0x4a9   :  { %1024 = vsyncpa [#allocation6], 1 }
 0x4aa   :  { %1026 = vsyncpa [#allocation6 + $0x1], 1 }

// kernel: encoder_forward.11
= control target key start
LH: loop header
LB: loop body
LE: loop exit
PB: predicated region body
PF: predicated region fallthrough
CT: control target
= control target key end

     0   :  { %vm38_vm0 = vcmask 261120   ;;  %s566_s0 = inlined_call_operand.vmem [shape: f32[16,32], index: 0, kind: input, shape index: {}]   ;;  %s567_s1 = inlined_call_operand.vmem [shape: f32[1,32], index: 1, kind: input, shape index: {}]   ;;  %s568_s2 = inlined_call_operand.vmem [shape: f32[1,32], index: 2, kind: input, shape index: {}]   ;;  %s569_s3 = inlined_call_operand.vmem [shape: bf16[32,64], index: 3, kind: input, shape index: {}]   ;;  %s570_s4 = inlined_call_operand.vmem [shape: f32[1,64], index: 4, kind: input, shape index: {}]   ;;  %s571_s5 = inlined_call_operand.vmem [shape: bf16[64,32], index: 5, kind: input, shape index: {}]   ;;  %s572_s6 = inlined_call_operand.vmem [shape: f32[1,32], index: 6, kind: input, shape index: {}]   ;;  %s573_s7 = inlined_call_operand.vmem [shape: f32[1,32], index: 7, kind: input, shape index: {}]   ;;  %s574_s8 = inlined_call_operand.vmem [shape: f32[1,32], index: 8, kind: input, shape index: {}]   ;;  %s575_s9 = inlined_call_operand.hbm [shape: f32[16,32], index: 9, kind: output, shape index: {}]  }
   0x1   :  { %v482_v0 = vld [vmem:[%s566_s0] sm:$0xff] }
   0x2   :  { %v39_v1 = vsel %vm38_vm0, %v482_v0, 0.0 }
   0x3   :  { %40 = vadd.xlane.f32.xlu0 %v39_v1 }
   0x4   :  { %14 = vsyncpa [#allocation3], 0  ;;  %v489_v2 = vld [vmem:[%s566_s0 + $0x8] sm:$0xff]  ;;  %v425_v4 = vmov 32.0   ;;  %v365_v23 = vld [vmem:[%s569_s3] sm:$0xff]  ;;  %vm211_vm14 = vcmask 523264  }
   0x5   :  { %v42_v3 = vsel %vm38_vm0, %v489_v2, 0.0  ;;  %381 = vrcp.f32 %v425_v4  ;;  %v366_v21 = vld [vmem:[%s569_s3 + $0x8] sm:$0xff]  ;;  %s327_s11 = sshll.u32 %s575_s9, 4  ;;  %s427_s12 = smov 128   ;;  %s328_s11 = int_to_ptr.hbm [resolvable:$true] %s327_s11 }
   0x6   :  { %168 = vmatpush.bf16.msra.mxu0 %v366_v21  ;;  %s428_s0 = smov 8  }
   0xa   :  { %169 = vmatpush.bf16.msra.mxu0 %v365_v23 }
   0xb   :  { %43 = vadd.xlane.f32.xlu0 %v42_v3  ;;  %v382_v5 = vpop.eup %381 }
   0xc   :  { %v46_v6 = vmul.f32 32.0, %v382_v5  ;;  %vm50_vm1 = vweird.f32 %v382_v5 }
   0xe   :  { %v47_v7 = vsub.f32 1.0, %v46_v6 }
  0x10   :  { %v48_v8 = vmul.f32 %v382_v5, %v47_v7 }
  0x12   :  { %v49_v9 = vadd.f32 %v382_v5, %v48_v8 }
  0x14   :  { %v493_v10 = vsel %vm50_vm1, %v382_v5, %v49_v9  ;;  %v375_v5 = vld [vmem:[%s567_s1] ss:$0 sm:$0xff] }
  0x76   :  { %v41_v11 = vpop.xlane.xlu0 %40 }
  0x77   :  { %v52_v12 = vmul.f32 %v493_v10, %v41_v11 }
  0x79   :  { %v497_v13 = vsub.f32 %v482_v0, %v52_v12  ;;  %v376_v12 = vld [vmem:[%s568_s2] ss:$0 sm:$0xff] }
  0x7b   :  { %v56_v14 = vmul.f32 %v497_v13, %v497_v13 }
  0x7d   :  { %v58_v15 = vsel %vm38_vm0, %v56_v14, 0.0 }
  0x7e   :  { %59 = vadd.xlane.f32.xlu1 %v58_v15  ;;  %v44_v16 = vpop.xlane.xlu0 %43 }
  0x7f   :  { %v53_v17 = vmul.f32 %v493_v10, %v44_v16 }
  0x81   :  { %v504_v18 = vsub.f32 %v489_v2, %v53_v17  ;;  %v370_v17 = vld [vmem:[%s571_s5 + $0x18] sm:$0xff] }
  0x82   :  { %219 = vmatpush.bf16.msra.mxu1 %v370_v17 }
  0x83   :  { %v57_v19 = vmul.f32 %v504_v18, %v504_v18 }
  0x85   :  { %v61_v20 = vsel %vm38_vm0, %v57_v19, 0.0  ;;  %v368_v19 = vld [vmem:[%s571_s5 + $0x8] sm:$0xff] }
  0x86   :  { %62 = vadd.xlane.f32.xlu1 %v61_v20  ;;  %v367_v20 = vld [vmem:[%s571_s5] sm:$0xff] }
  0xf1   :  { %v60_v22 = vpop.xlane.xlu1 %59 }
  0xf2   :  { %v64_v24 = vmul.f32 0.032258064, %v60_v22  ;;  %v377_v22 = vld [vmem:[%s570_s4] ss:$0 sm:$0xff] }
  0xf4   :  { %383 = vrsqrt.f32 %v64_v24  ;;  %vm73_vm2 = vcmp.eq.f32.partialorder %v64_v24, inf  ;;  %v76_v37 = vand.u32 2147483648, %v64_v24  ;;  %vm75_vm3 = vcmp.eq.f32.partialorder %v64_v24, 0.0 }
  0xf9   :  { %v63_v25 = vpop.xlane.xlu1 %62 }
  0xfa   :  { %v384_v26 = vpop.eup %383  ;;  %v65_v27 = vmul.f32 0.032258064, %v63_v25 }
  0xfb   :  { %v67_v28 = vmul.f32 %v384_v26, %v64_v24 }
  0xfc   :  { %385 = vrsqrt.f32 %v65_v27  ;;  %vm85_vm4 = vcmp.eq.f32.partialorder %v65_v27, inf  ;;  %v88_v45 = vand.u32 2147483648, %v65_v27  ;;  %vm87_vm5 = vcmp.eq.f32.partialorder %v65_v27, 0.0 }
  0xfd   :  { %v68_v29 = vmul.f32 %v384_v26, %v67_v28 }
  0xff   :  { %v69_v30 = vmul.f32 0.5, %v68_v29  ;;  %v378_v29 = vld [vmem:[%s572_s6] ss:$0 sm:$0xff] }
 0x101   :  { %v70_v31 = vsub.f32 1.5, %v69_v30  ;;  %v137_v30 = vadd.f32 %v378_v29, %v482_v0 }
 0x102   :  { %v386_v32 = vpop.eup %385 }
 0x103   :  { %v71_v33 = vmul.f32 %v384_v26, %v70_v31  ;;  %v79_v34 = vmul.f32 %v386_v32, %v65_v27 }
 0x105   :  { %v72_v35 = vmul.f32 %v71_v33, %v64_v24  ;;  %v80_v36 = vmul.f32 %v386_v32, %v79_v34  ;;  %v138_v34 = vadd.f32 %v378_v29, %v489_v2 }
 0x107   :  { %v74_v38 = vsel %vm73_vm2, %v64_v24, %v72_v35  ;;  %v81_v39 = vmul.f32 0.5, %v80_v36 }
 0x108   :  { %v77_v40 = vsel %vm75_vm3, %v76_v37, %v74_v38 }
 0x109   :  { %v82_v41 = vsub.f32 1.5, %v81_v39  ;;  %v90_v42 = vadd.f32 1e-06, %v77_v40 }
 0x10b   :  { %v83_v43 = vmul.f32 %v386_v32, %v82_v41  ;;  %387 = vrcp.f32 %v90_v42  ;;  %v103_v53 = vand.u32 2147483648, %v90_v42  ;;  %vm97_vm7 = vweird.f32 %v90_v42 }
 0x10c   :  { %v101_v55 = vand.u32 2147483647, %v90_v42 }
 0x10d   :  { %v84_v44 = vmul.f32 %v83_v43, %v65_v27  ;;  %v104_v59 = vor.u32 1.1754944e-38, %v103_v53 }
 0x10e   :  { %vm102_vm9 = vcmp.eq.f32.partialorder %v101_v55, 8.507059e+37 }
 0x10f   :  { %v86_v46 = vsel %vm85_vm4, %v65_v27, %v84_v44 }
 0x110   :  { %v89_v47 = vsel %vm87_vm5, %v88_v45, %v86_v46 }
 0x111   :  { %v388_v48 = vpop.eup %387  ;;  %v91_v49 = vadd.f32 1e-06, %v89_v47 }
 0x112   :  { %v93_v50 = vmul.f32 %v388_v48, %v90_v42  ;;  %vm98_vm6 = vweird.f32 %v388_v48 }
 0x113   :  { %389 = vrcp.f32 %v91_v49  ;;  %vm99_vm8 = vmor %vm97_vm7, %vm98_vm6  ;;  %v118_v62 = vand.u32 2147483648, %v91_v49  ;;  %v116_v1 = vand.u32 2147483647, %v91_v49  ;;  %vm112_vm11 = vweird.f32 %v91_v49 }
 0x114   :  { %v94_v51 = vsub.f32 1.0, %v93_v50 }
 0x115   :  { %v119_v6 = vor.u32 1.1754944e-38, %v118_v62  ;;  %vm117_vm13 = vcmp.eq.f32.partialorder %v116_v1, 8.507059e+37 }
 0x116   :  { %v95_v52 = vmul.f32 %v388_v48, %v94_v51 }
 0x118   :  { %v96_v54 = vadd.f32 %v388_v48, %v95_v52 }
 0x119   :  { %v390_v56 = vpop.eup %389 }
 0x11a   :  { %v100_v57 = vsel %vm99_vm8, %v388_v48, %v96_v54  ;;  %v108_v58 = vmul.f32 %v390_v56, %v91_v49  ;;  %vm113_vm10 = vweird.f32 %v390_v56 }
 0x11b   :  { %v105_v61 = vsel %vm102_vm9, %v104_v59, %v100_v57  ;;  %vm114_vm12 = vmor %vm112_vm11, %vm113_vm10 }
 0x11c   :  { %v109_v60 = vsub.f32 1.0, %v108_v58  ;;  %v106_v3 = vmul.f32 %v105_v61, %v497_v13 }
 0x11e   :  { %v110_v63 = vmul.f32 %v390_v56, %v109_v60  ;;  %v125_v11 = vmul.f32 %v375_v5, %v106_v3 }
 0x120   :  { %v111_v4 = vadd.f32 %v390_v56, %v110_v63  ;;  %v130_v13 = vadd.f32 %v376_v12, %v125_v11 }
 0x122   :  { %v115_v7 = vsel %vm114_vm12, %v390_v56, %v111_v4 }
 0x123   :  { %v120_v8 = vsel %vm117_vm13, %v119_v6, %v115_v7 }
 0x124   :  { %v121_v9 = vmul.f32 %v120_v8, %v504_v18  ;;  %v369_v18 = vld [vmem:[%s571_s5 + $0x10] sm:$0xff] }
 0x125   :  { %220 = vmatpush.bf16.msra.mxu1 %v369_v18 }
 0x126   :  { %v126_v14 = vmul.f32 %v375_v5, %v121_v9 }
 0x128   :  { %v131_v15 = vadd.f32 %v376_v12, %v126_v14 }
 0x129   :  { %221 = vmatpush.bf16.msra.mxu1 %v368_v19 }
 0x12a   :  { %v132_v16 = vpack.c.bf16 %v131_v15, %v130_v13 }
 0x12c   :  { %347 = vmatmul.msk.bf16.vlgmr.msra.gmra.mxu0 %vm38_vm0, %v132_v16 }
 0x12d   :  { %222 = vmatpush.bf16.msra.mxu1 %v367_v20 }
 0x1a9   :  { %v171_v21 = vpop.f32.mrf.mxu0 }
 0x1aa   :  { %v172_v23 = vadd.f32 %v377_v22, %v171_v21  ;;  %v379_v21 = vld [vmem:[%s573_s7] ss:$0 sm:$0xff]  ;;  %s426_s7 = smov [#allocation2]  }
 0x1ab   :  { %s325_s30 = sshll.u32 %s426_s7, 4  ;;  %s326_s30 = int_to_ptr.vmem [resolvable:$true] %s325_s30 }
 0x1ac   :  { %v176_v26 = vmax.f32 %v172_v23, 0.0 }
 0x1b1   :  { %v173_v24 = vpop.f32.mrf.mxu0 }
 0x1b2   :  { %v174_v25 = vadd.f32 %v377_v22, %v173_v24 }
 0x1b4   :  { %v177_v27 = vmax.f32 %v174_v25, 0.0  ;;  %v380_v25 = vld [vmem:[%s574_s8] ss:$0 sm:$0xff] }
 0x1b6   :  { %v178_v28 = vpack.c.bf16 %v177_v27, %v176_v26 }
 0x1b8   :  { %364 = vmatmul.msk.bf16.vlgmr.msra.gmra.mxu1 %vm211_vm14, %v178_v28 }
 0x235   :  { %v224_v31 = vpop.f32.mrf.mxu1 }
 0x236   :  { %v229_v32 = vadd.f32 %v224_v31, %v137_v30 }
 0x238   :  { %v233_v33 = vsel %vm38_vm0, %v229_v32, 0.0 }
 0x239   :  { %234 = vadd.xlane.f32.xlu2 %v233_v33 }
 0x23d   :  { %v226_v35 = vpop.f32.mrf.mxu1 }
 0x23e   :  { %v230_v36 = vadd.f32 %v226_v35, %v138_v34 }
 0x240   :  { %v236_v37 = vsel %vm38_vm0, %v230_v36, 0.0 }
 0x241   :  { %237 = vadd.xlane.f32.xlu2 %v236_v37 }
 0x2ac   :  { %v235_v38 = vpop.xlane.xlu2 %234 }
 0x2ad   :  { %v239_v39 = vmul.f32 %v235_v38, %v493_v10 }
 0x2af   :  { %v241_v40 = vsub.f32 %v229_v32, %v239_v39 }
 0x2b1   :  { %v243_v41 = vmul.f32 %v241_v40, %v241_v40 }
 0x2b3   :  { %v245_v42 = vsel %vm38_vm0, %v243_v41, 0.0 }
 0x2b4   :  { %246 = vadd.xlane.f32.xlu0 %v245_v42  ;;  %v238_v0 = vpop.xlane.xlu2 %237 }
 0x2b5   :  { %v240_v43 = vmul.f32 %v238_v0, %v493_v10 }
 0x2b7   :  { %v549_v44 = vsub.f32 %v230_v36, %v240_v43 }
 0x2b9   :  { %v244_v2 = vmul.f32 %v549_v44, %v549_v44 }
 0x2bb   :  { %v248_v45 = vsel %vm38_vm0, %v244_v2, 0.0 }
 0x2bc   :  { %249 = vadd.xlane.f32.xlu1 %v248_v45 }
 0x327   :  { %v247_v46 = vpop.xlane.xlu0 %246 }
 0x328   :  { %v251_v47 = vmul.f32 0.032258064, %v247_v46 }
 0x32a   :  { %391 = vrsqrt.f32 %v251_v47  ;;  %vm260_vm15 = vcmp.eq.f32.partialorder %v251_v47, inf  ;;  %v263_v59 = vand.u32 2147483648, %v251_v47  ;;  %vm262_vm1 = vcmp.eq.f32.partialorder %v251_v47, 0.0 }
 0x32f   :  { %v250_v48 = vpop.xlane.xlu1 %249 }
 0x330   :  { %v392_v49 = vpop.eup %391  ;;  %v252_v50 = vmul.f32 0.032258064, %v250_v48 }
 0x331   :  { %v254_v51 = vmul.f32 %v392_v49, %v251_v47 }
 0x332   :  { %393 = vrsqrt.f32 %v252_v50  ;;  %vm272_vm2 = vcmp.eq.f32.partialorder %v252_v50, inf  ;;  %v275_v5 = vand.u32 2147483648, %v252_v50  ;;  %vm274_vm3 = vcmp.eq.f32.partialorder %v252_v50, 0.0 }
 0x333   :  { %v255_v52 = vmul.f32 %v392_v49, %v254_v51 }
 0x335   :  { %v256_v53 = vmul.f32 0.5, %v255_v52 }
 0x337   :  { %v257_v54 = vsub.f32 1.5, %v256_v53 }
 0x338   :  { %v394_v10 = vpop.eup %393 }
 0x339   :  { %v258_v55 = vmul.f32 %v392_v49, %v257_v54  ;;  %v266_v56 = vmul.f32 %v394_v10, %v252_v50 }
 0x33b   :  { %v259_v57 = vmul.f32 %v258_v55, %v251_v47  ;;  %v267_v58 = vmul.f32 %v394_v10, %v266_v56 }
 0x33d   :  { %v261_v60 = vsel %vm260_vm15, %v251_v47, %v259_v57  ;;  %v268_v61 = vmul.f32 0.5, %v267_v58 }
 0x33e   :  { %v264_v62 = vsel %vm262_vm1, %v263_v59, %v261_v60 }
 0x33f   :  { %v277_v63 = vadd.f32 1e-06, %v264_v62  ;;  %v269_v1 = vsub.f32 1.5, %v268_v61 }
 0x341   :  { %395 = vrcp.f32 %v277_v63  ;;  %v270_v3 = vmul.f32 %v394_v10, %v269_v1  ;;  %v290_v14 = vand.u32 2147483648, %v277_v63  ;;  %v288_v15 = vand.u32 2147483647, %v277_v63 }
 0x342   :  { %vm284_vm5 = vweird.f32 %v277_v63 }
 0x343   :  { %v271_v4 = vmul.f32 %v270_v3, %v252_v50  ;;  %v291_v18 = vor.u32 1.1754944e-38, %v290_v14  ;;  %vm289_vm7 = vcmp.eq.f32.partialorder %v288_v15, 8.507059e+37 }
 0x345   :  { %v273_v6 = vsel %vm272_vm2, %v252_v50, %v271_v4 }
 0x346   :  { %v276_v7 = vsel %vm274_vm3, %v275_v5, %v273_v6 }
 0x347   :  { %v396_v8 = vpop.eup %395  ;;  %v278_v9 = vadd.f32 1e-06, %v276_v7 }
 0x348   :  { %v280_v11 = vmul.f32 %v396_v8, %v277_v63  ;;  %vm285_vm4 = vweird.f32 %v396_v8 }
 0x349   :  { %397 = vrcp.f32 %v278_v9  ;;  %vm286_vm6 = vmor %vm284_vm5, %vm285_vm4  ;;  %v305_v26 = vand.u32 2147483648, %v278_v9  ;;  %v303_v28 = vand.u32 2147483647, %v278_v9  ;;  %vm299_vm9 = vweird.f32 %v278_v9 }
 0x34a   :  { %v281_v12 = vsub.f32 1.0, %v280_v11 }
 0x34b   :  { %v306_v32 = vor.u32 1.1754944e-38, %v305_v26  ;;  %vm304_vm11 = vcmp.eq.f32.partialorder %v303_v28, 8.507059e+37 }
 0x34c   :  { %v282_v13 = vmul.f32 %v396_v8, %v281_v12 }
 0x34e   :  { %v283_v16 = vadd.f32 %v396_v8, %v282_v13 }
 0x34f   :  { %v398_v17 = vpop.eup %397 }
 0x350   :  { %v287_v19 = vsel %vm286_vm6, %v396_v8, %v283_v16  ;;  %v295_v20 = vmul.f32 %v398_v17, %v278_v9  ;;  %vm300_vm8 = vweird.f32 %v398_v17 }
 0x351   :  { %v292_v22 = vsel %vm289_vm7, %v291_v18, %v287_v19  ;;  %vm301_vm10 = vmor %vm299_vm9, %vm300_vm8 }
 0x352   :  { %v293_v23 = vmul.f32 %v292_v22, %v241_v40  ;;  %v296_v24 = vsub.f32 1.0, %v295_v20 }
 0x354   :  { %v297_v27 = vmul.f32 %v398_v17, %v296_v24  ;;  %v312_v29 = vmul.f32 %v379_v21, %v293_v23 }
 0x356   :  { %v298_v30 = vadd.f32 %v398_v17, %v297_v27  ;;  %v317_v31 = vadd.f32 %v380_v25, %v312_v29 }
 0x358   :  { %v302_v33 = vsel %vm301_vm10, %v398_v17, %v298_v30  ;;  %319 = vst.msk [vmem:[#allocation2] sm:$0xff] %vm38_vm0, %v317_v31 }
 0x359   :  { %v307_v34 = vsel %vm304_vm11, %v306_v32, %v302_v33 }
 0x35a   :  { %v308_v35 = vmul.f32 %v307_v34, %v549_v44 }
 0x35c   :  { %v313_v36 = vmul.f32 %v379_v21, %v308_v35 }
 0x35e   :  { %v318_v37 = vadd.f32 %v380_v25, %v313_v36 }
 0x360   :  { %320 = vst.msk [vmem:[#allocation2 + $0x8] sm:$0xff] %vm38_vm0, %v318_v37 }
 0x361   :  { %333 = dma.vmem_to_hbm [thread:$0]  %s326_s30, 256, %s328_s11, [#allocation3], %s427_s12, %s427_s12, %s428_s0  }
 0x362   :  { %423 = dma.done.wait [#allocation3], 256  }
 0x363   :  { %424 = vsyncadd [#allocation3], 4294967040 }
 0x364   :  { %338 = vsyncpa [#allocation3], 1 }

</bundles_post_ra>
